<compile_context>
chip_gen: v5e
topology: v5e:2x2
jax: 0.10.0
libtpu: 0.0.40
codegen_flags: <defaults>
</compile_context>

<pallas_src>
import functools

import jax
import jax.numpy as jnp
from jax.experimental import pallas as pl
from jax.experimental.pallas import tpu as pltpu


# -----------------------------------------------------------------------------
# helpers
# -----------------------------------------------------------------------------
def _round_up(x, m):
    return ((x + m - 1) // m) * m


def _pick_tile(n, candidates):
    """Largest candidate that divides n (all candidates are multiples of 8)."""
    for t in candidates:
        if t <= n and n % t == 0:
            return t
    return None


# -----------------------------------------------------------------------------
# fused QKV projection:  [q | k | v] = x @ w_qkv + b_qkv, written as 3 outputs
# so the attention kernel can consume q/k/v directly (no wrapper split/transpose).
# w_qkv is VMEM-resident (constant block index); MXU operands are bf16, f32 acc.
# -----------------------------------------------------------------------------
def _qkv_proj_kernel(x_ref, w_ref, b_ref, q_ref, k_ref, v_ref):
    x = x_ref[...].astype(jnp.bfloat16)                      # bf16 MXU operands
    acc = jnp.dot(x, w_ref[...], preferred_element_type=jnp.float32) + b_ref[...]
    C = q_ref.shape[-1]
    q_ref[...] = acc[:, :C].astype(q_ref.dtype)
    k_ref[...] = acc[:, C:2 * C].astype(k_ref.dtype)
    v_ref[...] = acc[:, 2 * C:].astype(v_ref.dtype)


def qkv_projection(x2d, w_qkv, b_qkv, *, out_dtype=jnp.bfloat16, tile_m=256):
    M, K = x2d.shape
    Kw, C3 = w_qkv.shape
    assert K == Kw and C3 % 3 == 0
    C = C3 // 3
    w_qkv = w_qkv.astype(jnp.bfloat16)
    b2 = b_qkv.reshape(1, C3).astype(jnp.float32)

    TILE_M = _pick_tile(M, (tile_m, 512, 256, 128, 64, 32, 16, 8))
    if TILE_M is None:                                       # ragged M fallback
        M_pad = _round_up(M, 128)
        TILE_M = 128
        x2d = jnp.pad(x2d, ((0, M_pad - M), (0, 0)))
    else:
        M_pad = M

    row_map = lambda i: (i, 0)
    q, k, v = pl.pallas_call(
        _qkv_proj_kernel,
        out_shape=tuple(jax.ShapeDtypeStruct((M_pad, C), out_dtype) for _ in range(3)),
        grid_spec=pltpu.PrefetchScalarGridSpec(
            num_scalar_prefetch=0,
            grid=(M_pad // TILE_M,),
            in_specs=[
                pl.BlockSpec((TILE_M, K), row_map),
                pl.BlockSpec((K, C3), lambda i: (0, 0)),     # VMEM-resident fused weight
                pl.BlockSpec((1, C3), lambda i: (0, 0)),     # resident bias
            ],
            out_specs=tuple(pl.BlockSpec((TILE_M, C), row_map) for _ in range(3)),
        ),
        compiler_params=pltpu.CompilerParams(dimension_semantics=("parallel",)),
        cost_estimate=pl.CostEstimate(
            flops=int(2 * M_pad * K * C3),
            transcendentals=0,
            bytes_accessed=int(x2d.dtype.itemsize * M_pad * K + 2 * K * C3 + 4 * C3
                               + 3 * 2 * M_pad * C)),
    )(x2d, w_qkv, b2)
    if M_pad != M:
        q, k, v = q[:M], k[:M], v[:M]
    return q, k, v


# -----------------------------------------------------------------------------
# output projection:  y = x @ w + b   (x bf16, w bf16, f32 accumulate)
# -----------------------------------------------------------------------------
def _proj_kernel(x_ref, w_ref, b_ref, o_ref):
    x = x_ref[...].astype(jnp.bfloat16)
    acc = jnp.dot(x, w_ref[...], preferred_element_type=jnp.float32)
    o_ref[...] = (acc + b_ref[...]).astype(o_ref.dtype)


def linear_proj(x2d, w, b, *, out_dtype, tile_m=256):
    M, K = x2d.shape
    Kw, Nout = w.shape
    assert K == Kw
    w = w.astype(jnp.bfloat16)
    b2 = b.reshape(1, Nout).astype(jnp.float32)

    TILE_M = _pick_tile(M, (tile_m, 512, 256, 128, 64, 32, 16, 8))
    if TILE_M is None:
        M_pad = _round_up(M, 128)
        TILE_M = 128
        x2d = jnp.pad(x2d, ((0, M_pad - M), (0, 0)))
    else:
        M_pad = M

    out = pl.pallas_call(
        _proj_kernel,
        out_shape=jax.ShapeDtypeStruct((M_pad, Nout), out_dtype),
        grid_spec=pltpu.PrefetchScalarGridSpec(
            num_scalar_prefetch=0,
            grid=(M_pad // TILE_M,),
            in_specs=[
                pl.BlockSpec((TILE_M, K), lambda i: (i, 0)),
                pl.BlockSpec((K, Nout), lambda i: (0, 0)),   # VMEM-resident weight
                pl.BlockSpec((1, Nout), lambda i: (0, 0)),   # resident bias
            ],
            out_specs=pl.BlockSpec((TILE_M, Nout), lambda i: (i, 0)),
        ),
        compiler_params=pltpu.CompilerParams(dimension_semantics=("parallel",)),
        cost_estimate=pl.CostEstimate(
            flops=int(2 * M_pad * K * Nout),
            transcendentals=0,
            bytes_accessed=int(x2d.dtype.itemsize * M_pad * K + 2 * K * Nout + 4 * Nout
                               + jnp.dtype(out_dtype).itemsize * M_pad * Nout)),
    )(x2d, w, b2)
    return out[:M] if M_pad != M else out


# -----------------------------------------------------------------------------
# flash attention: grid = (batch, q-tiles, kv-tiles); one grid step covers all
# heads of a (batch, q-tile); online softmax with f32 VMEM scratch (stats are
# replicated across each head's Dh lanes so the finalize is a single vector op).
# Softmax scale is already folded into the q projection weights.
# -----------------------------------------------------------------------------
def _flash_attn_kernel(q_ref, k_ref, v_ref, o_ref, m_sc, l_sc, acc_sc, *,
                       num_heads, seq_len, masked):
    kv_id = pl.program_id(2)
    TQ = q_ref.shape[1]
    TK = k_ref.shape[1]
    C = q_ref.shape[2]
    Dh = C // num_heads

    @pl.when(kv_id == 0)
    def _init():
        m_sc[...] = jnp.full(m_sc.shape, -jnp.inf, m_sc.dtype)
        l_sc[...] = jnp.zeros(l_sc.shape, l_sc.dtype)
        acc_sc[...] = jnp.zeros(acc_sc.shape, acc_sc.dtype)

    q_all = q_ref[0].astype(jnp.bfloat16)                    # (TQ, C) -- scale pre-folded
    k_all = k_ref[0].astype(jnp.bfloat16)                    # (TK, C)
    v_all = v_ref[0].astype(jnp.bfloat16)                    # (TK, C)

    if masked:                                               # only when N was padded (static)
        col = kv_id * TK + jax.lax.broadcasted_iota(jnp.int32, (TQ, TK), 1)
        valid = col < seq_len

    for h in range(num_heads):                               # static unrolled head loop
        lo = h * Dh
        sl = slice(lo, lo + Dh)
        # scores on the MXU, f32 accumulation
        s = jax.lax.dot_general(
            q_all[:, sl], k_all[:, sl], (((1,), (1,)), ((), ())),
            preferred_element_type=jnp.float32)              # (TQ, TK)
        if masked:
            s = jnp.where(valid, s, -1e30)

        m_prev = m_sc[:, lo:lo + 1]                          # (TQ, 1)
        l_prev = l_sc[:, lo:lo + 1]                          # (TQ, 1)
        m_new = jnp.maximum(m_prev, jnp.max(s, axis=-1, keepdims=True))
        alpha = jnp.exp(m_prev - m_new)                      # softmax math stays f32 (v5e-safe)
        p = jnp.exp(s - m_new)
        l_new = alpha * l_prev + jnp.sum(p, axis=-1, keepdims=True)
        acc_sc[:, sl] = alpha * acc_sc[:, sl] + jnp.dot(
            p.astype(jnp.bfloat16), v_all[:, sl], preferred_element_type=jnp.float32)
        # stats replicated across the head's Dh lanes -> vectorized finalize
        m_sc[:, sl] = jnp.broadcast_to(m_new, (TQ, Dh))
        l_sc[:, sl] = jnp.broadcast_to(l_new, (TQ, Dh))

    @pl.when(kv_id == pl.num_programs(2) - 1)
    def _finalize():
        inv_l = pl.reciprocal(l_sc[...], approx=True)        # EUP slot, ~free in epilogue
        o_ref[0] = (acc_sc[...] * inv_l).astype(o_ref.dtype)


def flash_attention(q, k, v, *, num_heads, tq=128, tk=256):
    """q, k, v: (B, N, C) with heads laid out as contiguous Dh-column groups."""
    B, N, C = q.shape
    TQ = _pick_tile(N, (tq, 128, 64, 32, 16, 8))
    TK = _pick_tile(N, (tk, 256, 128, 64, 32, 16, 8))
    if TQ is None or TK is None:
        # ragged N: pad and mask the padded kv positions inside the kernel
        N_pad = _round_up(N, 128)
        TQ = TK = min(128, N_pad)
        pad = ((0, 0), (0, N_pad - N), (0, 0))
        q, k, v = jnp.pad(q, pad), jnp.pad(k, pad), jnp.pad(v, pad)
    else:
        N_pad = N
    masked = N_pad != N

    kernel = functools.partial(_flash_attn_kernel, num_heads=num_heads,
                               seq_len=N, masked=masked)
    itm = q.dtype.itemsize
    out = pl.pallas_call(
        kernel,
        out_shape=jax.ShapeDtypeStruct((B, N_pad, C), q.dtype),
        grid_spec=pltpu.PrefetchScalarGridSpec(
            num_scalar_prefetch=0,
            grid=(B, N_pad // TQ, N_pad // TK),
            in_specs=[
                pl.BlockSpec((1, TQ, C), lambda b, i, j: (b, i, 0)),
                pl.BlockSpec((1, TK, C), lambda b, i, j: (b, j, 0)),
                pl.BlockSpec((1, TK, C), lambda b, i, j: (b, j, 0)),
            ],
            out_specs=pl.BlockSpec((1, TQ, C), lambda b, i, j: (b, i, 0)),
            scratch_shapes=[
                pltpu.VMEM((TQ, C), jnp.float32),   # running max  (replicated per head)
                pltpu.VMEM((TQ, C), jnp.float32),   # running sum
                pltpu.VMEM((TQ, C), jnp.float32),   # f32 output accumulator
            ],
        ),
        compiler_params=pltpu.CompilerParams(
            dimension_semantics=("parallel", "parallel", "arbitrary")),
        cost_estimate=pl.CostEstimate(
            flops=int(4 * B * N_pad * N_pad * C),
            transcendentals=int(B * num_heads * N_pad * N_pad),
            # q + out once, k/v re-read once per q-tile
            bytes_accessed=int(itm * B * N_pad * C * (2 + 2 * (N_pad // TQ)))),
    )(q, k, v)
    return out[:, :N, :] if masked else out


# -----------------------------------------------------------------------------
# full module forward (default config)
# -----------------------------------------------------------------------------
def attention_forward(x, prepared, *, num_heads):
    """Matches Attention.forward for sr_ratio=1, apply_transform=False,
    attn_drop=proj_drop=0.0 (dropout is identity at p=0)."""
    # TODO(synk): sr_ratio > 1 path (depthwise self.sr conv + LayerNorm on kv) and
    #             apply_transform path (1x1 conv over heads + InstanceNorm2d) are not
    #             implemented; this covers the module's default configuration.
    B, N, C = x.shape
    assert C % num_heads == 0

    q, k, v = qkv_projection(x.reshape(B * N, C),
                             prepared["w_qkv"], prepared["b_qkv"])     # bf16 (B*N, C) each
    q = q.reshape(B, N, C)
    k = k.reshape(B, N, C)
    v = v.reshape(B, N, C)

    o = flash_attention(q, k, v, num_heads=num_heads)                  # (B, N, C) bf16

    out = linear_proj(o.reshape(B * N, C), prepared["w_proj"], prepared["b_proj"],
                      out_dtype=x.dtype)
    return out.reshape(B, N, C)


def init_params(key, dim, *, qkv_bias=False):
    """f32 master weights, stored transposed (in, out) so y = x @ w + b."""
    k1, k2, k3, k4 = jax.random.split(key, 4)
    std = dim ** (-0.5)
    wq = jax.random.normal(k1, (dim, dim), jnp.float32) * std
    wkv = jax.random.normal(k2, (dim, 2 * dim), jnp.float32) * std
    w_proj = jax.random.normal(k3, (dim, dim), jnp.float32) * std
    bq = jnp.zeros((dim,), jnp.float32)          # qkv_bias=False in the module default
    bkv = jnp.zeros((2 * dim,), jnp.float32)
    b_proj = jax.random.normal(k4, (dim,), jnp.float32) * 0.02   # proj Linear has a bias
    return dict(wq=wq, wkv=wkv, bq=bq, bkv=bkv, w_proj=w_proj, b_proj=b_proj)


def prepare_params(params, *, num_heads, qk_scale=None):
    """One-time prep: fuse q/kv weights, fold the softmax scale into the q columns,
    pre-cast MXU operands to bf16 (biases stay f32)."""
    C = params["wq"].shape[0]
    scale = qk_scale if qk_scale is not None else (C // num_heads) ** (-0.5)
    w_qkv = jnp.concatenate([params["wq"] * scale, params["wkv"]], axis=1)   # (C, 3C)
    b_qkv = jnp.concatenate([params["bq"] * scale, params["bkv"]], axis=0)   # (3C,)
    return dict(
        w_qkv=w_qkv.astype(jnp.bfloat16),
        b_qkv=b_qkv.astype(jnp.float32),
        w_proj=params["w_proj"].astype(jnp.bfloat16),
        b_proj=params["b_proj"].astype(jnp.float32),
    )


# -----------------------------------------------------------------------------
# pure-JAX reference (HIGHEST precision) for the self-check
# -----------------------------------------------------------------------------
def _attention_ref(x, params, num_heads, qk_scale=None):
    B, N, C = x.shape
    Dh = C // num_heads
    scale = qk_scale if qk_scale is not None else Dh ** (-0.5)
    hi = jax.lax.Precision.HIGHEST
    q = (jnp.dot(x, params["wq"], precision=hi) + params["bq"]
         ).reshape(B, N, num_heads, Dh).transpose(0, 2, 1, 3)
    kv = (jnp.dot(x, params["wkv"], precision=hi) + params["bkv"]
          ).reshape(B, N, 2, num_heads, Dh).transpose(2, 0, 3, 1, 4)
    k, v = kv[0], kv[1]
    attn = jnp.einsum("bhnd,bhmd->bhnm", q, k, precision=hi) * scale
    attn = jax.nn.softmax(attn, axis=-1)
    o = jnp.einsum("bhnm,bhmd->bhnd", attn, v, precision=hi)
    o = o.transpose(0, 2, 1, 3).reshape(B, N, C)
    return (jnp.dot(o, params["w_proj"], precision=hi) + params["b_proj"]
            ).reshape(B, N, C)


if __name__ == "__main__":
    key = jax.random.PRNGKey(0)
    kx, kp = jax.random.split(key)

    B, H, W, C, num_heads = 2, 8, 8, 32, 8
    N = H * W                                    # sequence length = H*W
    x = jax.random.normal(kx, (B, N, C), jnp.float32)

    params = init_params(kp, C)
    prepared = prepare_params(params, num_heads=num_heads)

    fwd = jax.jit(functools.partial(attention_forward, num_heads=num_heads))
    y = fwd(x, prepared)
    jax.block_until_ready(y)
    assert y.shape == (B, N, C), y.shape

    y_ref = _attention_ref(x, params, num_heads)
    max_err = float(jnp.max(jnp.abs(y - y_ref)))
    assert jnp.allclose(y, y_ref, atol=5e-2, rtol=5e-2), max_err

    print("KERNEL_OK")
</pallas_src>

<mosaic_0001>
module attributes {stable_mosaic.version = 11 : i64} {
  func.func @_proj_kernel(%arg0: i32, %arg1: memref<128x32xbf16, #tpu.memory_space<vmem>>, %arg2: memref<32x32xbf16, #tpu.memory_space<vmem>>, %arg3: memref<1x32xf32, #tpu.memory_space<vmem>>, %arg4: memref<128x32xf32, #tpu.memory_space<vmem>>) attributes {dimension_semantics = [#tpu.dimension_semantics<parallel>], iteration_bounds = array<i64: 1>, scalar_prefetch = 0 : i64, scratch_operands = 0 : i64, tpu.core_type = #tpu.core_type<tc>, window_params = [{transform_indices = @transform_0, window_bounds = array<i64: 128, 32>}, {pipeline_mode = #tpu.pipeline_mode<synchronous>, transform_indices = @transform_1, window_bounds = array<i64: 32, 32>}, {pipeline_mode = #tpu.pipeline_mode<synchronous>, transform_indices = @transform_2, window_bounds = array<i64: 1, 32>}, {transform_indices = @transform_3, window_bounds = array<i64: 128, 32>}]} {
    %c0 = arith.constant 0 : index
    %c0_0 = arith.constant 0 : index
    %0 = vector.load %arg1[%c0, %c0_0] : memref<128x32xbf16, #tpu.memory_space<vmem>>, vector<128x32xbf16>
    %c0_1 = arith.constant 0 : index
    %c0_2 = arith.constant 0 : index
    %1 = vector.load %arg2[%c0_1, %c0_2] : memref<32x32xbf16, #tpu.memory_space<vmem>>, vector<32x32xbf16>
    %cst = arith.constant dense<0.000000e+00> : vector<128x32xf32>
    %2 = tpu.matmul %0, %1, %cst {dimension_numbers = #tpu.dot_dimension_numbers<[1], [0], [0], [1], [0, 0, 1, 1], [], []>} : vector<128x32xbf16>, vector<32x32xbf16>, vector<128x32xf32> -> vector<128x32xf32>
    %c0_3 = arith.constant 0 : index
    %c0_4 = arith.constant 0 : index
    %3 = vector.load %arg3[%c0_3, %c0_4] : memref<1x32xf32, #tpu.memory_space<vmem>>, vector<1x32xf32>
    %4 = vector.broadcast %3 : vector<1x32xf32> to vector<128x32xf32>
    %5 = arith.addf %2, %4 : vector<128x32xf32>
    %c0_5 = arith.constant 0 : index
    %c0_6 = arith.constant 0 : index
    %6 = vector.load %arg4[%c0_5, %c0_6] : memref<128x32xf32, #tpu.memory_space<vmem>>, vector<128x32xf32>
    tpu.vector_store %arg4[%c0_5, %c0_6], %5 {strides = array<i32>} : memref<128x32xf32, #tpu.memory_space<vmem>>, vector<128x32xf32>,
    return
  }
  func.func @transform_0(%arg0: i32) -> (i32, i32) {
    %c0_i32 = arith.constant 0 : i32
    %c0_i32_0 = arith.constant 0 : i32
    return %arg0, %c0_i32 : i32, i32
  }
  func.func @transform_1(%arg0: i32) -> (i32, i32) {
    %c0_i32 = arith.constant 0 : i32
    %c0_i32_0 = arith.constant 0 : i32
    %c0_i32_1 = arith.constant 0 : i32
    return %c0_i32, %c0_i32_0 : i32, i32
  }
  func.func @transform_2(%arg0: i32) -> (i32, i32) {
    %c0_i32 = arith.constant 0 : i32
    %c0_i32_0 = arith.constant 0 : i32
    %c0_i32_1 = arith.constant 0 : i32
    return %c0_i32, %c0_i32_0 : i32, i32
  }
  func.func @transform_3(%arg0: i32) -> (i32, i32) {
    %c0_i32 = arith.constant 0 : i32
    %c0_i32_0 = arith.constant 0 : i32
    return %arg0, %c0_i32 : i32, i32
  }
}

module attributes {stable_mosaic.version = 11 : i64} {
  func.func @_qkv_proj_kernel(%arg0: i32, %arg1: memref<128x32xf32, #tpu.memory_space<vmem>>, %arg2: memref<32x96xbf16, #tpu.memory_space<vmem>>, %arg3: memref<1x96xf32, #tpu.memory_space<vmem>>, %arg4: memref<128x32xbf16, #tpu.memory_space<vmem>>, %arg5: memref<128x32xbf16, #tpu.memory_space<vmem>>, %arg6: memref<128x32xbf16, #tpu.memory_space<vmem>>) attributes {dimension_semantics = [#tpu.dimension_semantics<parallel>], iteration_bounds = array<i64: 1>, scalar_prefetch = 0 : i64, scratch_operands = 0 : i64, tpu.core_type = #tpu.core_type<tc>, window_params = [{transform_indices = @transform_0, window_bounds = array<i64: 128, 32>}, {pipeline_mode = #tpu.pipeline_mode<synchronous>, transform_indices = @transform_1, window_bounds = array<i64: 32, 96>}, {pipeline_mode = #tpu.pipeline_mode<synchronous>, transform_indices = @transform_2, window_bounds = array<i64: 1, 96>}, {transform_indices = @transform_3, window_bounds = array<i64: 128, 32>}, {transform_indices = @transform_4, window_bounds = array<i64: 128, 32>}, {transform_indices = @transform_5, window_bounds = array<i64: 128, 32>}]} {
    %c0 = arith.constant 0 : index
    %c0_0 = arith.constant 0 : index
    %0 = vector.load %arg1[%c0, %c0_0] : memref<128x32xf32, #tpu.memory_space<vmem>>, vector<128x32xf32>
    %1 = arith.truncf %0 : vector<128x32xf32> to vector<128x32xbf16>
    %c0_1 = arith.constant 0 : index
    %c0_2 = arith.constant 0 : index
    %2 = vector.load %arg2[%c0_1, %c0_2] : memref<32x96xbf16, #tpu.memory_space<vmem>>, vector<32x96xbf16>
    %cst = arith.constant dense<0.000000e+00> : vector<128x96xf32>
    %3 = tpu.matmul %1, %2, %cst {dimension_numbers = #tpu.dot_dimension_numbers<[1], [0], [0], [1], [0, 0, 1, 1], [], []>} : vector<128x32xbf16>, vector<32x96xbf16>, vector<128x96xf32> -> vector<128x96xf32>
    %c0_3 = arith.constant 0 : index
    %c0_4 = arith.constant 0 : index
    %4 = vector.load %arg3[%c0_3, %c0_4] : memref<1x96xf32, #tpu.memory_space<vmem>>, vector<1x96xf32>
    %5 = vector.broadcast %4 : vector<1x96xf32> to vector<128x96xf32>
    %6 = arith.addf %3, %5 : vector<128x96xf32>
    %7 = vector.extract_strided_slice %6 {offsets = [0, 0], sizes = [128, 32], strides = [1, 1]} : vector<128x96xf32> to vector<128x32xf32>
    %8 = arith.truncf %7 : vector<128x32xf32> to vector<128x32xbf16>
    %c0_5 = arith.constant 0 : index
    %c0_6 = arith.constant 0 : index
    %9 = vector.load %arg4[%c0_5, %c0_6] : memref<128x32xbf16, #tpu.memory_space<vmem>>, vector<128x32xbf16>
    tpu.vector_store %arg4[%c0_5, %c0_6], %8 {strides = array<i32>} : memref<128x32xbf16, #tpu.memory_space<vmem>>, vector<128x32xbf16>,
    %10 = vector.extract_strided_slice %6 {offsets = [0, 32], sizes = [128, 32], strides = [1, 1]} : vector<128x96xf32> to vector<128x32xf32>
    %11 = arith.truncf %10 : vector<128x32xf32> to vector<128x32xbf16>
    %c0_7 = arith.constant 0 : index
    %c0_8 = arith.constant 0 : index
    %12 = vector.load %arg5[%c0_7, %c0_8] : memref<128x32xbf16, #tpu.memory_space<vmem>>, vector<128x32xbf16>
    tpu.vector_store %arg5[%c0_7, %c0_8], %11 {strides = array<i32>} : memref<128x32xbf16, #tpu.memory_space<vmem>>, vector<128x32xbf16>,
    %13 = vector.extract_strided_slice %6 {offsets = [0, 64], sizes = [128, 32], strides = [1, 1]} : vector<128x96xf32> to vector<128x32xf32>
    %14 = arith.truncf %13 : vector<128x32xf32> to vector<128x32xbf16>
    %c0_9 = arith.constant 0 : index
    %c0_10 = arith.constant 0 : index
    %15 = vector.load %arg6[%c0_9, %c0_10] : memref<128x32xbf16, #tpu.memory_space<vmem>>, vector<128x32xbf16>
    tpu.vector_store %arg6[%c0_9, %c0_10], %14 {strides = array<i32>} : memref<128x32xbf16, #tpu.memory_space<vmem>>, vector<128x32xbf16>,
    return
  }
  func.func @transform_0(%arg0: i32) -> (i32, i32) {
    %c0_i32 = arith.constant 0 : i32
    %c0_i32_0 = arith.constant 0 : i32
    return %arg0, %c0_i32 : i32, i32
  }
  func.func @transform_1(%arg0: i32) -> (i32, i32) {
    %c0_i32 = arith.constant 0 : i32
    %c0_i32_0 = arith.constant 0 : i32
    %c0_i32_1 = arith.constant 0 : i32
    return %c0_i32, %c0_i32_0 : i32, i32
  }
  func.func @transform_2(%arg0: i32) -> (i32, i32) {
    %c0_i32 = arith.constant 0 : i32
    %c0_i32_0 = arith.constant 0 : i32
    %c0_i32_1 = arith.constant 0 : i32
    return %c0_i32, %c0_i32_0 : i32, i32
  }
  func.func @transform_3(%arg0: i32) -> (i32, i32) {
    %c0_i32 = arith.constant 0 : i32
    %c0_i32_0 = arith.constant 0 : i32
    return %arg0, %c0_i32 : i32, i32
  }
  func.func @transform_4(%arg0: i32) -> (i32, i32) {
    %c0_i32 = arith.constant 0 : i32
    %c0_i32_0 = arith.constant 0 : i32
    return %arg0, %c0_i32 : i32, i32
  }
  func.func @transform_5(%arg0: i32) -> (i32, i32) {
    %c0_i32 = arith.constant 0 : i32
    %c0_i32_0 = arith.constant 0 : i32
    return %arg0, %c0_i32 : i32, i32
  }
}

module attributes {stable_mosaic.version = 11 : i64} {
  func.func @_flash_attn_kernel(%arg0: i32, %arg1: i32, %arg2: i32, %arg3: memref<1x64x32xbf16, #tpu.memory_space<vmem>>, %arg4: memref<1x64x32xbf16, #tpu.memory_space<vmem>>, %arg5: memref<1x64x32xbf16, #tpu.memory_space<vmem>>, %arg6: memref<1x64x32xbf16, #tpu.memory_space<vmem>>, %arg7: memref<64x32xf32, #tpu.memory_space<vmem>>, %arg8: memref<64x32xf32, #tpu.memory_space<vmem>>, %arg9: memref<64x32xf32, #tpu.memory_space<vmem>>) attributes {dimension_semantics = [#tpu.dimension_semantics<parallel>, #tpu.dimension_semantics<parallel>, #tpu.dimension_semantics<arbitrary>], iteration_bounds = array<i64: 2, 1, 1>, scalar_prefetch = 0 : i64, scratch_operands = 3 : i64, tpu.core_type = #tpu.core_type<tc>, window_params = [{transform_indices = @transform_0, window_bounds = array<i64: 1, 64, 32>}, {transform_indices = @transform_1, window_bounds = array<i64: 1, 64, 32>}, {transform_indices = @transform_2, window_bounds = array<i64: 1, 64, 32>}, {transform_indices = @transform_3, window_bounds = array<i64: 1, 64, 32>}]} {
    %c0_i32 = arith.constant 0 : i32
    %0 = arith.cmpi eq, %arg2, %c0_i32 : i32
    %1 = arith.extui %0 : i1 to i32
    %c0_i32_0 = arith.constant 0 : i32
    %2 = arith.cmpi ne, %1, %c0_i32_0 : i32
    scf.if %2 {
      %cst_131 = arith.constant 0xFF800000 : f32
      %260 = vector.broadcast %cst_131 : f32 to vector<64x32xf32>
      %c0_132 = arith.constant 0 : index
      %c0_133 = arith.constant 0 : index
      %261 = vector.load %arg7[%c0_132, %c0_133] : memref<64x32xf32, #tpu.memory_space<vmem>>, vector<64x32xf32>
      tpu.vector_store %arg7[%c0_132, %c0_133], %260 {strides = array<i32>} : memref<64x32xf32, #tpu.memory_space<vmem>>, vector<64x32xf32>,
      %cst_134 = arith.constant 0.000000e+00 : f32
      %262 = vector.broadcast %cst_134 : f32 to vector<64x32xf32>
      %c0_135 = arith.constant 0 : index
      %c0_136 = arith.constant 0 : index
      %263 = vector.load %arg8[%c0_135, %c0_136] : memref<64x32xf32, #tpu.memory_space<vmem>>, vector<64x32xf32>
      tpu.vector_store %arg8[%c0_135, %c0_136], %262 {strides = array<i32>} : memref<64x32xf32, #tpu.memory_space<vmem>>, vector<64x32xf32>,
      %cst_137 = arith.constant 0.000000e+00 : f32
      %264 = vector.broadcast %cst_137 : f32 to vector<64x32xf32>
      %c0_138 = arith.constant 0 : index
      %c0_139 = arith.constant 0 : index
      %265 = vector.load %arg9[%c0_138, %c0_139] : memref<64x32xf32, #tpu.memory_space<vmem>>, vector<64x32xf32>
      tpu.vector_store %arg9[%c0_138, %c0_139], %264 {strides = array<i32>} : memref<64x32xf32, #tpu.memory_space<vmem>>, vector<64x32xf32>,
    } else {
    }
    %c0 = arith.constant 0 : index
    %c0_1 = arith.constant 0 : index
    %c0_2 = arith.constant 0 : index
    %3 = vector.load %arg3[%c0, %c0_1, %c0_2] : memref<1x64x32xbf16, #tpu.memory_space<vmem>>, vector<1x64x32xbf16>
    %4 = vector.shape_cast %3 : vector<1x64x32xbf16> to vector<64x32xbf16>
    %c0_3 = arith.constant 0 : index
    %c0_4 = arith.constant 0 : index
    %c0_5 = arith.constant 0 : index
    %5 = vector.load %arg4[%c0_3, %c0_4, %c0_5] : memref<1x64x32xbf16, #tpu.memory_space<vmem>>, vector<1x64x32xbf16>
    %6 = vector.shape_cast %5 : vector<1x64x32xbf16> to vector<64x32xbf16>
    %c0_6 = arith.constant 0 : index
    %c0_7 = arith.constant 0 : index
    %c0_8 = arith.constant 0 : index
    %7 = vector.load %arg5[%c0_6, %c0_7, %c0_8] : memref<1x64x32xbf16, #tpu.memory_space<vmem>>, vector<1x64x32xbf16>
    %8 = vector.shape_cast %7 : vector<1x64x32xbf16> to vector<64x32xbf16>
    %9 = vector.extract_strided_slice %4 {offsets = [0, 0], sizes = [64, 4], strides = [1, 1]} : vector<64x32xbf16> to vector<64x4xbf16>
    %10 = vector.extract_strided_slice %6 {offsets = [0, 0], sizes = [64, 4], strides = [1, 1]} : vector<64x32xbf16> to vector<64x4xbf16>
    %cst = arith.constant dense<0.000000e+00> : vector<64x64xf32>
    %11 = tpu.matmul %9, %10, %cst {dimension_numbers = #tpu.dot_dimension_numbers<[1], [1], [0], [0], [0, 0, 1, 0], [], []>} : vector<64x4xbf16>, vector<64x4xbf16>, vector<64x64xf32> -> vector<64x64xf32>
    %c0_9 = arith.constant 0 : index
    %c0_10 = arith.constant 0 : index
    %12 = vector.load %arg7[%c0_9, %c0_10] : memref<64x32xf32, #tpu.memory_space<vmem>>, vector<64x1xf32>
    %c0_11 = arith.constant 0 : index
    %c0_12 = arith.constant 0 : index
    %13 = vector.load %arg8[%c0_11, %c0_12] : memref<64x32xf32, #tpu.memory_space<vmem>>, vector<64x1xf32>
    %cst_13 = arith.constant dense<0xFF800000> : vector<64xf32>
    %14 = vector.multi_reduction <maximumf>, %11, %cst_13 [1] : vector<64x64xf32> to vector<64xf32>
    %15 = vector.shape_cast %14 : vector<64xf32> to vector<64x1xf32>
    %16 = arith.maximumf %12, %15 : vector<64x1xf32>
    %17 = arith.subf %12, %16 : vector<64x1xf32>
    %18 = math.exp %17 : vector<64x1xf32>
    %19 = vector.broadcast %16 : vector<64x1xf32> to vector<64x64xf32>
    %20 = arith.subf %11, %19 : vector<64x64xf32>
    %21 = math.exp %20 : vector<64x64xf32>
    %22 = arith.mulf %18, %13 : vector<64x1xf32>
    %cst_14 = arith.constant dense<0.000000e+00> : vector<64xf32>
    %23 = vector.multi_reduction <add>, %21, %cst_14 [1] : vector<64x64xf32> to vector<64xf32>
    %24 = vector.shape_cast %23 : vector<64xf32> to vector<64x1xf32>
    %25 = arith.addf %22, %24 : vector<64x1xf32>
    %c0_15 = arith.constant 0 : index
    %c0_16 = arith.constant 0 : index
    %26 = vector.load %arg9[%c0_15, %c0_16] : memref<64x32xf32, #tpu.memory_space<vmem>>, vector<64x4xf32>
    %27 = vector.broadcast %18 : vector<64x1xf32> to vector<64x4xf32>
    %28 = arith.mulf %27, %26 : vector<64x4xf32>
    %29 = arith.truncf %21 : vector<64x64xf32> to vector<64x64xbf16>
    %30 = vector.extract_strided_slice %8 {offsets = [0, 0], sizes = [64, 4], strides = [1, 1]} : vector<64x32xbf16> to vector<64x4xbf16>
    %cst_17 = arith.constant dense<0.000000e+00> : vector<64x4xf32>
    %31 = tpu.matmul %29, %30, %cst_17 {dimension_numbers = #tpu.dot_dimension_numbers<[1], [0], [0], [1], [0, 0, 1, 1], [], []>} : vector<64x64xbf16>, vector<64x4xbf16>, vector<64x4xf32> -> vector<64x4xf32>
    %32 = arith.addf %28, %31 : vector<64x4xf32>
    %c0_18 = arith.constant 0 : index
    %c0_19 = arith.constant 0 : index
    %33 = vector.load %arg9[%c0_18, %c0_19] : memref<64x32xf32, #tpu.memory_space<vmem>>, vector<64x4xf32>
    tpu.vector_store %arg9[%c0_18, %c0_19], %32 {strides = array<i32>} : memref<64x32xf32, #tpu.memory_space<vmem>>, vector<64x4xf32>,
    %34 = vector.shape_cast %16 : vector<64x1xf32> to vector<64x1xf32>
    %35 = vector.broadcast %34 : vector<64x1xf32> to vector<64x4xf32>
    %c0_20 = arith.constant 0 : index
    %c0_21 = arith.constant 0 : index
    %36 = vector.load %arg7[%c0_20, %c0_21] : memref<64x32xf32, #tpu.memory_space<vmem>>, vector<64x4xf32>
    tpu.vector_store %arg7[%c0_20, %c0_21], %35 {strides = array<i32>} : memref<64x32xf32, #tpu.memory_space<vmem>>, vector<64x4xf32>,
    %37 = vector.shape_cast %25 : vector<64x1xf32> to vector<64x1xf32>
    %38 = vector.broadcast %37 : vector<64x1xf32> to vector<64x4xf32>
    %c0_22 = arith.constant 0 : index
    %c0_23 = arith.constant 0 : index
    %39 = vector.load %arg8[%c0_22, %c0_23] : memref<64x32xf32, #tpu.memory_space<vmem>>, vector<64x4xf32>
    tpu.vector_store %arg8[%c0_22, %c0_23], %38 {strides = array<i32>} : memref<64x32xf32, #tpu.memory_space<vmem>>, vector<64x4xf32>,
    %40 = vector.extract_strided_slice %4 {offsets = [0, 4], sizes = [64, 4], strides = [1, 1]} : vector<64x32xbf16> to vector<64x4xbf16>
    %41 = vector.extract_strided_slice %6 {offsets = [0, 4], sizes = [64, 4], strides = [1, 1]} : vector<64x32xbf16> to vector<64x4xbf16>
    %cst_24 = arith.constant dense<0.000000e+00> : vector<64x64xf32>
    %42 = tpu.matmul %40, %41, %cst_24 {dimension_numbers = #tpu.dot_dimension_numbers<[1], [1], [0], [0], [0, 0, 1, 0], [], []>} : vector<64x4xbf16>, vector<64x4xbf16>, vector<64x64xf32> -> vector<64x64xf32>
    %c0_25 = arith.constant 0 : index
    %c4 = arith.constant 4 : index
    %43 = vector.load %arg7[%c0_25, %c4] : memref<64x32xf32, #tpu.memory_space<vmem>>, vector<64x1xf32>
    %c0_26 = arith.constant 0 : index
    %c4_27 = arith.constant 4 : index
    %44 = vector.load %arg8[%c0_26, %c4_27] : memref<64x32xf32, #tpu.memory_space<vmem>>, vector<64x1xf32>
    %cst_28 = arith.constant dense<0xFF800000> : vector<64xf32>
    %45 = vector.multi_reduction <maximumf>, %42, %cst_28 [1] : vector<64x64xf32> to vector<64xf32>
    %46 = vector.shape_cast %45 : vector<64xf32> to vector<64x1xf32>
    %47 = arith.maximumf %43, %46 : vector<64x1xf32>
    %48 = arith.subf %43, %47 : vector<64x1xf32>
    %49 = math.exp %48 : vector<64x1xf32>
    %50 = vector.broadcast %47 : vector<64x1xf32> to vector<64x64xf32>
    %51 = arith.subf %42, %50 : vector<64x64xf32>
    %52 = math.exp %51 : vector<64x64xf32>
    %53 = arith.mulf %49, %44 : vector<64x1xf32>
    %cst_29 = arith.constant dense<0.000000e+00> : vector<64xf32>
    %54 = vector.multi_reduction <add>, %52, %cst_29 [1] : vector<64x64xf32> to vector<64xf32>
    %55 = vector.shape_cast %54 : vector<64xf32> to vector<64x1xf32>
    %56 = arith.addf %53, %55 : vector<64x1xf32>
    %c0_30 = arith.constant 0 : index
    %c4_31 = arith.constant 4 : index
    %57 = vector.load %arg9[%c0_30, %c4_31] : memref<64x32xf32, #tpu.memory_space<vmem>>, vector<64x4xf32>
    %58 = vector.broadcast %49 : vector<64x1xf32> to vector<64x4xf32>
    %59 = arith.mulf %58, %57 : vector<64x4xf32>
    %60 = arith.truncf %52 : vector<64x64xf32> to vector<64x64xbf16>
    %61 = vector.extract_strided_slice %8 {offsets = [0, 4], sizes = [64, 4], strides = [1, 1]} : vector<64x32xbf16> to vector<64x4xbf16>
    %cst_32 = arith.constant dense<0.000000e+00> : vector<64x4xf32>
    %62 = tpu.matmul %60, %61, %cst_32 {dimension_numbers = #tpu.dot_dimension_numbers<[1], [0], [0], [1], [0, 0, 1, 1], [], []>} : vector<64x64xbf16>, vector<64x4xbf16>, vector<64x4xf32> -> vector<64x4xf32>
    %63 = arith.addf %59, %62 : vector<64x4xf32>
    %c0_33 = arith.constant 0 : index
    %c4_34 = arith.constant 4 : index
    %64 = vector.load %arg9[%c0_33, %c4_34] : memref<64x32xf32, #tpu.memory_space<vmem>>, vector<64x4xf32>
    tpu.vector_store %arg9[%c0_33, %c4_34], %63 {strides = array<i32>} : memref<64x32xf32, #tpu.memory_space<vmem>>, vector<64x4xf32>,
    %65 = vector.shape_cast %47 : vector<64x1xf32> to vector<64x1xf32>
    %66 = vector.broadcast %65 : vector<64x1xf32> to vector<64x4xf32>
    %c0_35 = arith.constant 0 : index
    %c4_36 = arith.constant 4 : index
    %67 = vector.load %arg7[%c0_35, %c4_36] : memref<64x32xf32, #tpu.memory_space<vmem>>, vector<64x4xf32>
    tpu.vector_store %arg7[%c0_35, %c4_36], %66 {strides = array<i32>} : memref<64x32xf32, #tpu.memory_space<vmem>>, vector<64x4xf32>,
    %68 = vector.shape_cast %56 : vector<64x1xf32> to vector<64x1xf32>
    %69 = vector.broadcast %68 : vector<64x1xf32> to vector<64x4xf32>
    %c0_37 = arith.constant 0 : index
    %c4_38 = arith.constant 4 : index
    %70 = vector.load %arg8[%c0_37, %c4_38] : memref<64x32xf32, #tpu.memory_space<vmem>>, vector<64x4xf32>
    tpu.vector_store %arg8[%c0_37, %c4_38], %69 {strides = array<i32>} : memref<64x32xf32, #tpu.memory_space<vmem>>, vector<64x4xf32>,
    %71 = vector.extract_strided_slice %4 {offsets = [0, 8], sizes = [64, 4], strides = [1, 1]} : vector<64x32xbf16> to vector<64x4xbf16>
    %72 = vector.extract_strided_slice %6 {offsets = [0, 8], sizes = [64, 4], strides = [1, 1]} : vector<64x32xbf16> to vector<64x4xbf16>
    %cst_39 = arith.constant dense<0.000000e+00> : vector<64x64xf32>
    %73 = tpu.matmul %71, %72, %cst_39 {dimension_numbers = #tpu.dot_dimension_numbers<[1], [1], [0], [0], [0, 0, 1, 0], [], []>} : vector<64x4xbf16>, vector<64x4xbf16>, vector<64x64xf32> -> vector<64x64xf32>
    %c0_40 = arith.constant 0 : index
    %c8 = arith.constant 8 : index
    %74 = vector.load %arg7[%c0_40, %c8] : memref<64x32xf32, #tpu.memory_space<vmem>>, vector<64x1xf32>
    %c0_41 = arith.constant 0 : index
    %c8_42 = arith.constant 8 : index
    %75 = vector.load %arg8[%c0_41, %c8_42] : memref<64x32xf32, #tpu.memory_space<vmem>>, vector<64x1xf32>
    %cst_43 = arith.constant dense<0xFF800000> : vector<64xf32>
    %76 = vector.multi_reduction <maximumf>, %73, %cst_43 [1] : vector<64x64xf32> to vector<64xf32>
    %77 = vector.shape_cast %76 : vector<64xf32> to vector<64x1xf32>
    %78 = arith.maximumf %74, %77 : vector<64x1xf32>
    %79 = arith.subf %74, %78 : vector<64x1xf32>
    %80 = math.exp %79 : vector<64x1xf32>
    %81 = vector.broadcast %78 : vector<64x1xf32> to vector<64x64xf32>
    %82 = arith.subf %73, %81 : vector<64x64xf32>
    %83 = math.exp %82 : vector<64x64xf32>
    %84 = arith.mulf %80, %75 : vector<64x1xf32>
    %cst_44 = arith.constant dense<0.000000e+00> : vector<64xf32>
    %85 = vector.multi_reduction <add>, %83, %cst_44 [1] : vector<64x64xf32> to vector<64xf32>
    %86 = vector.shape_cast %85 : vector<64xf32> to vector<64x1xf32>
    %87 = arith.addf %84, %86 : vector<64x1xf32>
    %c0_45 = arith.constant 0 : index
    %c8_46 = arith.constant 8 : index
    %88 = vector.load %arg9[%c0_45, %c8_46] : memref<64x32xf32, #tpu.memory_space<vmem>>, vector<64x4xf32>
    %89 = vector.broadcast %80 : vector<64x1xf32> to vector<64x4xf32>
    %90 = arith.mulf %89, %88 : vector<64x4xf32>
    %91 = arith.truncf %83 : vector<64x64xf32> to vector<64x64xbf16>
    %92 = vector.extract_strided_slice %8 {offsets = [0, 8], sizes = [64, 4], strides = [1, 1]} : vector<64x32xbf16> to vector<64x4xbf16>
    %cst_47 = arith.constant dense<0.000000e+00> : vector<64x4xf32>
    %93 = tpu.matmul %91, %92, %cst_47 {dimension_numbers = #tpu.dot_dimension_numbers<[1], [0], [0], [1], [0, 0, 1, 1], [], []>} : vector<64x64xbf16>, vector<64x4xbf16>, vector<64x4xf32> -> vector<64x4xf32>
    %94 = arith.addf %90, %93 : vector<64x4xf32>
    %c0_48 = arith.constant 0 : index
    %c8_49 = arith.constant 8 : index
    %95 = vector.load %arg9[%c0_48, %c8_49] : memref<64x32xf32, #tpu.memory_space<vmem>>, vector<64x4xf32>
    tpu.vector_store %arg9[%c0_48, %c8_49], %94 {strides = array<i32>} : memref<64x32xf32, #tpu.memory_space<vmem>>, vector<64x4xf32>,
    %96 = vector.shape_cast %78 : vector<64x1xf32> to vector<64x1xf32>
    %97 = vector.broadcast %96 : vector<64x1xf32> to vector<64x4xf32>
    %c0_50 = arith.constant 0 : index
    %c8_51 = arith.constant 8 : index
    %98 = vector.load %arg7[%c0_50, %c8_51] : memref<64x32xf32, #tpu.memory_space<vmem>>, vector<64x4xf32>
    tpu.vector_store %arg7[%c0_50, %c8_51], %97 {strides = array<i32>} : memref<64x32xf32, #tpu.memory_space<vmem>>, vector<64x4xf32>,
    %99 = vector.shape_cast %87 : vector<64x1xf32> to vector<64x1xf32>
    %100 = vector.broadcast %99 : vector<64x1xf32> to vector<64x4xf32>
    %c0_52 = arith.constant 0 : index
    %c8_53 = arith.constant 8 : index
    %101 = vector.load %arg8[%c0_52, %c8_53] : memref<64x32xf32, #tpu.memory_space<vmem>>, vector<64x4xf32>
    tpu.vector_store %arg8[%c0_52, %c8_53], %100 {strides = array<i32>} : memref<64x32xf32, #tpu.memory_space<vmem>>, vector<64x4xf32>,
    %102 = vector.extract_strided_slice %4 {offsets = [0, 12], sizes = [64, 4], strides = [1, 1]} : vector<64x32xbf16> to vector<64x4xbf16>
    %103 = vector.extract_strided_slice %6 {offsets = [0, 12], sizes = [64, 4], strides = [1, 1]} : vector<64x32xbf16> to vector<64x4xbf16>
    %cst_54 = arith.constant dense<0.000000e+00> : vector<64x64xf32>
    %104 = tpu.matmul %102, %103, %cst_54 {dimension_numbers = #tpu.dot_dimension_numbers<[1], [1], [0], [0], [0, 0, 1, 0], [], []>} : vector<64x4xbf16>, vector<64x4xbf16>, vector<64x64xf32> -> vector<64x64xf32>
    %c0_55 = arith.constant 0 : index
    %c12 = arith.constant 12 : index
    %105 = vector.load %arg7[%c0_55, %c12] : memref<64x32xf32, #tpu.memory_space<vmem>>, vector<64x1xf32>
    %c0_56 = arith.constant 0 : index
    %c12_57 = arith.constant 12 : index
    %106 = vector.load %arg8[%c0_56, %c12_57] : memref<64x32xf32, #tpu.memory_space<vmem>>, vector<64x1xf32>
    %cst_58 = arith.constant dense<0xFF800000> : vector<64xf32>
    %107 = vector.multi_reduction <maximumf>, %104, %cst_58 [1] : vector<64x64xf32> to vector<64xf32>
    %108 = vector.shape_cast %107 : vector<64xf32> to vector<64x1xf32>
    %109 = arith.maximumf %105, %108 : vector<64x1xf32>
    %110 = arith.subf %105, %109 : vector<64x1xf32>
    %111 = math.exp %110 : vector<64x1xf32>
    %112 = vector.broadcast %109 : vector<64x1xf32> to vector<64x64xf32>
    %113 = arith.subf %104, %112 : vector<64x64xf32>
    %114 = math.exp %113 : vector<64x64xf32>
    %115 = arith.mulf %111, %106 : vector<64x1xf32>
    %cst_59 = arith.constant dense<0.000000e+00> : vector<64xf32>
    %116 = vector.multi_reduction <add>, %114, %cst_59 [1] : vector<64x64xf32> to vector<64xf32>
    %117 = vector.shape_cast %116 : vector<64xf32> to vector<64x1xf32>
    %118 = arith.addf %115, %117 : vector<64x1xf32>
    %c0_60 = arith.constant 0 : index
    %c12_61 = arith.constant 12 : index
    %119 = vector.load %arg9[%c0_60, %c12_61] : memref<64x32xf32, #tpu.memory_space<vmem>>, vector<64x4xf32>
    %120 = vector.broadcast %111 : vector<64x1xf32> to vector<64x4xf32>
    %121 = arith.mulf %120, %119 : vector<64x4xf32>
    %122 = arith.truncf %114 : vector<64x64xf32> to vector<64x64xbf16>
    %123 = vector.extract_strided_slice %8 {offsets = [0, 12], sizes = [64, 4], strides = [1, 1]} : vector<64x32xbf16> to vector<64x4xbf16>
    %cst_62 = arith.constant dense<0.000000e+00> : vector<64x4xf32>
    %124 = tpu.matmul %122, %123, %cst_62 {dimension_numbers = #tpu.dot_dimension_numbers<[1], [0], [0], [1], [0, 0, 1, 1], [], []>} : vector<64x64xbf16>, vector<64x4xbf16>, vector<64x4xf32> -> vector<64x4xf32>
    %125 = arith.addf %121, %124 : vector<64x4xf32>
    %c0_63 = arith.constant 0 : index
    %c12_64 = arith.constant 12 : index
    %126 = vector.load %arg9[%c0_63, %c12_64] : memref<64x32xf32, #tpu.memory_space<vmem>>, vector<64x4xf32>
    tpu.vector_store %arg9[%c0_63, %c12_64], %125 {strides = array<i32>} : memref<64x32xf32, #tpu.memory_space<vmem>>, vector<64x4xf32>,
    %127 = vector.shape_cast %109 : vector<64x1xf32> to vector<64x1xf32>
    %128 = vector.broadcast %127 : vector<64x1xf32> to vector<64x4xf32>
    %c0_65 = arith.constant 0 : index
    %c12_66 = arith.constant 12 : index
    %129 = vector.load %arg7[%c0_65, %c12_66] : memref<64x32xf32, #tpu.memory_space<vmem>>, vector<64x4xf32>
    tpu.vector_store %arg7[%c0_65, %c12_66], %128 {strides = array<i32>} : memref<64x32xf32, #tpu.memory_space<vmem>>, vector<64x4xf32>,
    %130 = vector.shape_cast %118 : vector<64x1xf32> to vector<64x1xf32>
    %131 = vector.broadcast %130 : vector<64x1xf32> to vector<64x4xf32>
    %c0_67 = arith.constant 0 : index
    %c12_68 = arith.constant 12 : index
    %132 = vector.load %arg8[%c0_67, %c12_68] : memref<64x32xf32, #tpu.memory_space<vmem>>, vector<64x4xf32>
    tpu.vector_store %arg8[%c0_67, %c12_68], %131 {strides = array<i32>} : memref<64x32xf32, #tpu.memory_space<vmem>>, vector<64x4xf32>,
    %133 = vector.extract_strided_slice %4 {offsets = [0, 16], sizes = [64, 4], strides = [1, 1]} : vector<64x32xbf16> to vector<64x4xbf16>
    %134 = vector.extract_strided_slice %6 {offsets = [0, 16], sizes = [64, 4], strides = [1, 1]} : vector<64x32xbf16> to vector<64x4xbf16>
    %cst_69 = arith.constant dense<0.000000e+00> : vector<64x64xf32>
    %135 = tpu.matmul %133, %134, %cst_69 {dimension_numbers = #tpu.dot_dimension_numbers<[1], [1], [0], [0], [0, 0, 1, 0], [], []>} : vector<64x4xbf16>, vector<64x4xbf16>, vector<64x64xf32> -> vector<64x64xf32>
    %c0_70 = arith.constant 0 : index
    %c16 = arith.constant 16 : index
    %136 = vector.load %arg7[%c0_70, %c16] : memref<64x32xf32, #tpu.memory_space<vmem>>, vector<64x1xf32>
    %c0_71 = arith.constant 0 : index
    %c16_72 = arith.constant 16 : index
    %137 = vector.load %arg8[%c0_71, %c16_72] : memref<64x32xf32, #tpu.memory_space<vmem>>, vector<64x1xf32>
    %cst_73 = arith.constant dense<0xFF800000> : vector<64xf32>
    %138 = vector.multi_reduction <maximumf>, %135, %cst_73 [1] : vector<64x64xf32> to vector<64xf32>
    %139 = vector.shape_cast %138 : vector<64xf32> to vector<64x1xf32>
    %140 = arith.maximumf %136, %139 : vector<64x1xf32>
    %141 = arith.subf %136, %140 : vector<64x1xf32>
    %142 = math.exp %141 : vector<64x1xf32>
    %143 = vector.broadcast %140 : vector<64x1xf32> to vector<64x64xf32>
    %144 = arith.subf %135, %143 : vector<64x64xf32>
    %145 = math.exp %144 : vector<64x64xf32>
    %146 = arith.mulf %142, %137 : vector<64x1xf32>
    %cst_74 = arith.constant dense<0.000000e+00> : vector<64xf32>
    %147 = vector.multi_reduction <add>, %145, %cst_74 [1] : vector<64x64xf32> to vector<64xf32>
    %148 = vector.shape_cast %147 : vector<64xf32> to vector<64x1xf32>
    %149 = arith.addf %146, %148 : vector<64x1xf32>
    %c0_75 = arith.constant 0 : index
    %c16_76 = arith.constant 16 : index
    %150 = vector.load %arg9[%c0_75, %c16_76] : memref<64x32xf32, #tpu.memory_space<vmem>>, vector<64x4xf32>
    %151 = vector.broadcast %142 : vector<64x1xf32> to vector<64x4xf32>
    %152 = arith.mulf %151, %150 : vector<64x4xf32>
    %153 = arith.truncf %145 : vector<64x64xf32> to vector<64x64xbf16>
    %154 = vector.extract_strided_slice %8 {offsets = [0, 16], sizes = [64, 4], strides = [1, 1]} : vector<64x32xbf16> to vector<64x4xbf16>
    %cst_77 = arith.constant dense<0.000000e+00> : vector<64x4xf32>
    %155 = tpu.matmul %153, %154, %cst_77 {dimension_numbers = #tpu.dot_dimension_numbers<[1], [0], [0], [1], [0, 0, 1, 1], [], []>} : vector<64x64xbf16>, vector<64x4xbf16>, vector<64x4xf32> -> vector<64x4xf32>
    %156 = arith.addf %152, %155 : vector<64x4xf32>
    %c0_78 = arith.constant 0 : index
    %c16_79 = arith.constant 16 : index
    %157 = vector.load %arg9[%c0_78, %c16_79] : memref<64x32xf32, #tpu.memory_space<vmem>>, vector<64x4xf32>
    tpu.vector_store %arg9[%c0_78, %c16_79], %156 {strides = array<i32>} : memref<64x32xf32, #tpu.memory_space<vmem>>, vector<64x4xf32>,
    %158 = vector.shape_cast %140 : vector<64x1xf32> to vector<64x1xf32>
    %159 = vector.broadcast %158 : vector<64x1xf32> to vector<64x4xf32>
    %c0_80 = arith.constant 0 : index
    %c16_81 = arith.constant 16 : index
    %160 = vector.load %arg7[%c0_80, %c16_81] : memref<64x32xf32, #tpu.memory_space<vmem>>, vector<64x4xf32>
    tpu.vector_store %arg7[%c0_80, %c16_81], %159 {strides = array<i32>} : memref<64x32xf32, #tpu.memory_space<vmem>>, vector<64x4xf32>,
    %161 = vector.shape_cast %149 : vector<64x1xf32> to vector<64x1xf32>
    %162 = vector.broadcast %161 : vector<64x1xf32> to vector<64x4xf32>
    %c0_82 = arith.constant 0 : index
    %c16_83 = arith.constant 16 : index
    %163 = vector.load %arg8[%c0_82, %c16_83] : memref<64x32xf32, #tpu.memory_space<vmem>>, vector<64x4xf32>
    tpu.vector_store %arg8[%c0_82, %c16_83], %162 {strides = array<i32>} : memref<64x32xf32, #tpu.memory_space<vmem>>, vector<64x4xf32>,
    %164 = vector.extract_strided_slice %4 {offsets = [0, 20], sizes = [64, 4], strides = [1, 1]} : vector<64x32xbf16> to vector<64x4xbf16>
    %165 = vector.extract_strided_slice %6 {offsets = [0, 20], sizes = [64, 4], strides = [1, 1]} : vector<64x32xbf16> to vector<64x4xbf16>
    %cst_84 = arith.constant dense<0.000000e+00> : vector<64x64xf32>
    %166 = tpu.matmul %164, %165, %cst_84 {dimension_numbers = #tpu.dot_dimension_numbers<[1], [1], [0], [0], [0, 0, 1, 0], [], []>} : vector<64x4xbf16>, vector<64x4xbf16>, vector<64x64xf32> -> vector<64x64xf32>
    %c0_85 = arith.constant 0 : index
    %c20 = arith.constant 20 : index
    %167 = vector.load %arg7[%c0_85, %c20] : memref<64x32xf32, #tpu.memory_space<vmem>>, vector<64x1xf32>
    %c0_86 = arith.constant 0 : index
    %c20_87 = arith.constant 20 : index
    %168 = vector.load %arg8[%c0_86, %c20_87] : memref<64x32xf32, #tpu.memory_space<vmem>>, vector<64x1xf32>
    %cst_88 = arith.constant dense<0xFF800000> : vector<64xf32>
    %169 = vector.multi_reduction <maximumf>, %166, %cst_88 [1] : vector<64x64xf32> to vector<64xf32>
    %170 = vector.shape_cast %169 : vector<64xf32> to vector<64x1xf32>
    %171 = arith.maximumf %167, %170 : vector<64x1xf32>
    %172 = arith.subf %167, %171 : vector<64x1xf32>
    %173 = math.exp %172 : vector<64x1xf32>
    %174 = vector.broadcast %171 : vector<64x1xf32> to vector<64x64xf32>
    %175 = arith.subf %166, %174 : vector<64x64xf32>
    %176 = math.exp %175 : vector<64x64xf32>
    %177 = arith.mulf %173, %168 : vector<64x1xf32>
    %cst_89 = arith.constant dense<0.000000e+00> : vector<64xf32>
    %178 = vector.multi_reduction <add>, %176, %cst_89 [1] : vector<64x64xf32> to vector<64xf32>
    %179 = vector.shape_cast %178 : vector<64xf32> to vector<64x1xf32>
    %180 = arith.addf %177, %179 : vector<64x1xf32>
    %c0_90 = arith.constant 0 : index
    %c20_91 = arith.constant 20 : index
    %181 = vector.load %arg9[%c0_90, %c20_91] : memref<64x32xf32, #tpu.memory_space<vmem>>, vector<64x4xf32>
    %182 = vector.broadcast %173 : vector<64x1xf32> to vector<64x4xf32>
    %183 = arith.mulf %182, %181 : vector<64x4xf32>
    %184 = arith.truncf %176 : vector<64x64xf32> to vector<64x64xbf16>
    %185 = vector.extract_strided_slice %8 {offsets = [0, 20], sizes = [64, 4], strides = [1, 1]} : vector<64x32xbf16> to vector<64x4xbf16>
    %cst_92 = arith.constant dense<0.000000e+00> : vector<64x4xf32>
    %186 = tpu.matmul %184, %185, %cst_92 {dimension_numbers = #tpu.dot_dimension_numbers<[1], [0], [0], [1], [0, 0, 1, 1], [], []>} : vector<64x64xbf16>, vector<64x4xbf16>, vector<64x4xf32> -> vector<64x4xf32>
    %187 = arith.addf %183, %186 : vector<64x4xf32>
    %c0_93 = arith.constant 0 : index
    %c20_94 = arith.constant 20 : index
    %188 = vector.load %arg9[%c0_93, %c20_94] : memref<64x32xf32, #tpu.memory_space<vmem>>, vector<64x4xf32>
    tpu.vector_store %arg9[%c0_93, %c20_94], %187 {strides = array<i32>} : memref<64x32xf32, #tpu.memory_space<vmem>>, vector<64x4xf32>,
    %189 = vector.shape_cast %171 : vector<64x1xf32> to vector<64x1xf32>
    %190 = vector.broadcast %189 : vector<64x1xf32> to vector<64x4xf32>
    %c0_95 = arith.constant 0 : index
    %c20_96 = arith.constant 20 : index
    %191 = vector.load %arg7[%c0_95, %c20_96] : memref<64x32xf32, #tpu.memory_space<vmem>>, vector<64x4xf32>
    tpu.vector_store %arg7[%c0_95, %c20_96], %190 {strides = array<i32>} : memref<64x32xf32, #tpu.memory_space<vmem>>, vector<64x4xf32>,
    %192 = vector.shape_cast %180 : vector<64x1xf32> to vector<64x1xf32>
    %193 = vector.broadcast %192 : vector<64x1xf32> to vector<64x4xf32>
    %c0_97 = arith.constant 0 : index
    %c20_98 = arith.constant 20 : index
    %194 = vector.load %arg8[%c0_97, %c20_98] : memref<64x32xf32, #tpu.memory_space<vmem>>, vector<64x4xf32>
    tpu.vector_store %arg8[%c0_97, %c20_98], %193 {strides = array<i32>} : memref<64x32xf32, #tpu.memory_space<vmem>>, vector<64x4xf32>,
    %195 = vector.extract_strided_slice %4 {offsets = [0, 24], sizes = [64, 4], strides = [1, 1]} : vector<64x32xbf16> to vector<64x4xbf16>
    %196 = vector.extract_strided_slice %6 {offsets = [0, 24], sizes = [64, 4], strides = [1, 1]} : vector<64x32xbf16> to vector<64x4xbf16>
    %cst_99 = arith.constant dense<0.000000e+00> : vector<64x64xf32>
    %197 = tpu.matmul %195, %196, %cst_99 {dimension_numbers = #tpu.dot_dimension_numbers<[1], [1], [0], [0], [0, 0, 1, 0], [], []>} : vector<64x4xbf16>, vector<64x4xbf16>, vector<64x64xf32> -> vector<64x64xf32>
    %c0_100 = arith.constant 0 : index
    %c24 = arith.constant 24 : index
    %198 = vector.load %arg7[%c0_100, %c24] : memref<64x32xf32, #tpu.memory_space<vmem>>, vector<64x1xf32>
    %c0_101 = arith.constant 0 : index
    %c24_102 = arith.constant 24 : index
    %199 = vector.load %arg8[%c0_101, %c24_102] : memref<64x32xf32, #tpu.memory_space<vmem>>, vector<64x1xf32>
    %cst_103 = arith.constant dense<0xFF800000> : vector<64xf32>
    %200 = vector.multi_reduction <maximumf>, %197, %cst_103 [1] : vector<64x64xf32> to vector<64xf32>
    %201 = vector.shape_cast %200 : vector<64xf32> to vector<64x1xf32>
    %202 = arith.maximumf %198, %201 : vector<64x1xf32>
    %203 = arith.subf %198, %202 : vector<64x1xf32>
    %204 = math.exp %203 : vector<64x1xf32>
    %205 = vector.broadcast %202 : vector<64x1xf32> to vector<64x64xf32>
    %206 = arith.subf %197, %205 : vector<64x64xf32>
    %207 = math.exp %206 : vector<64x64xf32>
    %208 = arith.mulf %204, %199 : vector<64x1xf32>
    %cst_104 = arith.constant dense<0.000000e+00> : vector<64xf32>
    %209 = vector.multi_reduction <add>, %207, %cst_104 [1] : vector<64x64xf32> to vector<64xf32>
    %210 = vector.shape_cast %209 : vector<64xf32> to vector<64x1xf32>
    %211 = arith.addf %208, %210 : vector<64x1xf32>
    %c0_105 = arith.constant 0 : index
    %c24_106 = arith.constant 24 : index
    %212 = vector.load %arg9[%c0_105, %c24_106] : memref<64x32xf32, #tpu.memory_space<vmem>>, vector<64x4xf32>
    %213 = vector.broadcast %204 : vector<64x1xf32> to vector<64x4xf32>
    %214 = arith.mulf %213, %212 : vector<64x4xf32>
    %215 = arith.truncf %207 : vector<64x64xf32> to vector<64x64xbf16>
    %216 = vector.extract_strided_slice %8 {offsets = [0, 24], sizes = [64, 4], strides = [1, 1]} : vector<64x32xbf16> to vector<64x4xbf16>
    %cst_107 = arith.constant dense<0.000000e+00> : vector<64x4xf32>
    %217 = tpu.matmul %215, %216, %cst_107 {dimension_numbers = #tpu.dot_dimension_numbers<[1], [0], [0], [1], [0, 0, 1, 1], [], []>} : vector<64x64xbf16>, vector<64x4xbf16>, vector<64x4xf32> -> vector<64x4xf32>
    %218 = arith.addf %214, %217 : vector<64x4xf32>
    %c0_108 = arith.constant 0 : index
    %c24_109 = arith.constant 24 : index
    %219 = vector.load %arg9[%c0_108, %c24_109] : memref<64x32xf32, #tpu.memory_space<vmem>>, vector<64x4xf32>
    tpu.vector_store %arg9[%c0_108, %c24_109], %218 {strides = array<i32>} : memref<64x32xf32, #tpu.memory_space<vmem>>, vector<64x4xf32>,
    %220 = vector.shape_cast %202 : vector<64x1xf32> to vector<64x1xf32>
    %221 = vector.broadcast %220 : vector<64x1xf32> to vector<64x4xf32>
    %c0_110 = arith.constant 0 : index
    %c24_111 = arith.constant 24 : index
    %222 = vector.load %arg7[%c0_110, %c24_111] : memref<64x32xf32, #tpu.memory_space<vmem>>, vector<64x4xf32>
    tpu.vector_store %arg7[%c0_110, %c24_111], %221 {strides = array<i32>} : memref<64x32xf32, #tpu.memory_space<vmem>>, vector<64x4xf32>,
    %223 = vector.shape_cast %211 : vector<64x1xf32> to vector<64x1xf32>
    %224 = vector.broadcast %223 : vector<64x1xf32> to vector<64x4xf32>
    %c0_112 = arith.constant 0 : index
    %c24_113 = arith.constant 24 : index
    %225 = vector.load %arg8[%c0_112, %c24_113] : memref<64x32xf32, #tpu.memory_space<vmem>>, vector<64x4xf32>
    tpu.vector_store %arg8[%c0_112, %c24_113], %224 {strides = array<i32>} : memref<64x32xf32, #tpu.memory_space<vmem>>, vector<64x4xf32>,
    %226 = vector.extract_strided_slice %4 {offsets = [0, 28], sizes = [64, 4], strides = [1, 1]} : vector<64x32xbf16> to vector<64x4xbf16>
    %227 = vector.extract_strided_slice %6 {offsets = [0, 28], sizes = [64, 4], strides = [1, 1]} : vector<64x32xbf16> to vector<64x4xbf16>
    %cst_114 = arith.constant dense<0.000000e+00> : vector<64x64xf32>
    %228 = tpu.matmul %226, %227, %cst_114 {dimension_numbers = #tpu.dot_dimension_numbers<[1], [1], [0], [0], [0, 0, 1, 0], [], []>} : vector<64x4xbf16>, vector<64x4xbf16>, vector<64x64xf32> -> vector<64x64xf32>
    %c0_115 = arith.constant 0 : index
    %c28 = arith.constant 28 : index
    %229 = vector.load %arg7[%c0_115, %c28] : memref<64x32xf32, #tpu.memory_space<vmem>>, vector<64x1xf32>
    %c0_116 = arith.constant 0 : index
    %c28_117 = arith.constant 28 : index
    %230 = vector.load %arg8[%c0_116, %c28_117] : memref<64x32xf32, #tpu.memory_space<vmem>>, vector<64x1xf32>
    %cst_118 = arith.constant dense<0xFF800000> : vector<64xf32>
    %231 = vector.multi_reduction <maximumf>, %228, %cst_118 [1] : vector<64x64xf32> to vector<64xf32>
    %232 = vector.shape_cast %231 : vector<64xf32> to vector<64x1xf32>
    %233 = arith.maximumf %229, %232 : vector<64x1xf32>
    %234 = arith.subf %229, %233 : vector<64x1xf32>
    %235 = math.exp %234 : vector<64x1xf32>
    %236 = vector.broadcast %233 : vector<64x1xf32> to vector<64x64xf32>
    %237 = arith.subf %228, %236 : vector<64x64xf32>
    %238 = math.exp %237 : vector<64x64xf32>
    %239 = arith.mulf %235, %230 : vector<64x1xf32>
    %cst_119 = arith.constant dense<0.000000e+00> : vector<64xf32>
    %240 = vector.multi_reduction <add>, %238, %cst_119 [1] : vector<64x64xf32> to vector<64xf32>
    %241 = vector.shape_cast %240 : vector<64xf32> to vector<64x1xf32>
    %242 = arith.addf %239, %241 : vector<64x1xf32>
    %c0_120 = arith.constant 0 : index
    %c28_121 = arith.constant 28 : index
    %243 = vector.load %arg9[%c0_120, %c28_121] : memref<64x32xf32, #tpu.memory_space<vmem>>, vector<64x4xf32>
    %244 = vector.broadcast %235 : vector<64x1xf32> to vector<64x4xf32>
    %245 = arith.mulf %244, %243 : vector<64x4xf32>
    %246 = arith.truncf %238 : vector<64x64xf32> to vector<64x64xbf16>
    %247 = vector.extract_strided_slice %8 {offsets = [0, 28], sizes = [64, 4], strides = [1, 1]} : vector<64x32xbf16> to vector<64x4xbf16>
    %cst_122 = arith.constant dense<0.000000e+00> : vector<64x4xf32>
    %248 = tpu.matmul %246, %247, %cst_122 {dimension_numbers = #tpu.dot_dimension_numbers<[1], [0], [0], [1], [0, 0, 1, 1], [], []>} : vector<64x64xbf16>, vector<64x4xbf16>, vector<64x4xf32> -> vector<64x4xf32>
    %249 = arith.addf %245, %248 : vector<64x4xf32>
    %c0_123 = arith.constant 0 : index
    %c28_124 = arith.constant 28 : index
    %250 = vector.load %arg9[%c0_123, %c28_124] : memref<64x32xf32, #tpu.memory_space<vmem>>, vector<64x4xf32>
    tpu.vector_store %arg9[%c0_123, %c28_124], %249 {strides = array<i32>} : memref<64x32xf32, #tpu.memory_space<vmem>>, vector<64x4xf32>,
    %251 = vector.shape_cast %233 : vector<64x1xf32> to vector<64x1xf32>
    %252 = vector.broadcast %251 : vector<64x1xf32> to vector<64x4xf32>
    %c0_125 = arith.constant 0 : index
    %c28_126 = arith.constant 28 : index
    %253 = vector.load %arg7[%c0_125, %c28_126] : memref<64x32xf32, #tpu.memory_space<vmem>>, vector<64x4xf32>
    tpu.vector_store %arg7[%c0_125, %c28_126], %252 {strides = array<i32>} : memref<64x32xf32, #tpu.memory_space<vmem>>, vector<64x4xf32>,
    %254 = vector.shape_cast %242 : vector<64x1xf32> to vector<64x1xf32>
    %255 = vector.broadcast %254 : vector<64x1xf32> to vector<64x4xf32>
    %c0_127 = arith.constant 0 : index
    %c28_128 = arith.constant 28 : index
    %256 = vector.load %arg8[%c0_127, %c28_128] : memref<64x32xf32, #tpu.memory_space<vmem>>, vector<64x4xf32>
    tpu.vector_store %arg8[%c0_127, %c28_128], %255 {strides = array<i32>} : memref<64x32xf32, #tpu.memory_space<vmem>>, vector<64x4xf32>,
    %c0_i32_129 = arith.constant 0 : i32
    %257 = arith.cmpi eq, %arg2, %c0_i32_129 : i32
    %258 = arith.extui %257 : i1 to i32
    %c0_i32_130 = arith.constant 0 : i32
    %259 = arith.cmpi ne, %258, %c0_i32_130 : i32
    scf.if %259 {
      %c0_131 = arith.constant 0 : index
      %c0_132 = arith.constant 0 : index
      %260 = vector.load %arg8[%c0_131, %c0_132] : memref<64x32xf32, #tpu.memory_space<vmem>>, vector<64x32xf32>
      %261 = tpu.reciprocal %260 {approx = true} : vector<64x32xf32> -> vector<64x32xf32>
      %c0_133 = arith.constant 0 : index
      %c0_134 = arith.constant 0 : index
      %262 = vector.load %arg9[%c0_133, %c0_134] : memref<64x32xf32, #tpu.memory_space<vmem>>, vector<64x32xf32>
      %263 = arith.mulf %262, %261 : vector<64x32xf32>
      %264 = arith.truncf %263 : vector<64x32xf32> to vector<64x32xbf16>
      %c0_135 = arith.constant 0 : index
      %c0_136 = arith.constant 0 : index
      %c0_137 = arith.constant 0 : index
      %265 = vector.load %arg6[%c0_135, %c0_136, %c0_137] : memref<1x64x32xbf16, #tpu.memory_space<vmem>>, vector<1x64x32xbf16>
      %266 = vector.shape_cast %265 : vector<1x64x32xbf16> to vector<64x32xbf16>
      %267 = vector.shape_cast %264 : vector<64x32xbf16> to vector<1x64x32xbf16>
      tpu.vector_store %arg6[%c0_135, %c0_136, %c0_137], %267 {strides = array<i32>} : memref<1x64x32xbf16, #tpu.memory_space<vmem>>, vector<1x64x32xbf16>,
    } else {
    }
    return
  }
  func.func @transform_0(%arg0: i32, %arg1: i32, %arg2: i32) -> (i32, i32, i32) {
    %c0_i32 = arith.constant 0 : i32
    %c0_i32_0 = arith.constant 0 : i32
    return %arg0, %arg1, %c0_i32 : i32, i32, i32
  }
  func.func @transform_1(%arg0: i32, %arg1: i32, %arg2: i32) -> (i32, i32, i32) {
    %c0_i32 = arith.constant 0 : i32
    %c0_i32_0 = arith.constant 0 : i32
    return %arg0, %arg2, %c0_i32 : i32, i32, i32
  }
  func.func @transform_2(%arg0: i32, %arg1: i32, %arg2: i32) -> (i32, i32, i32) {
    %c0_i32 = arith.constant 0 : i32
    %c0_i32_0 = arith.constant 0 : i32
    return %arg0, %arg2, %c0_i32 : i32, i32, i32
  }
  func.func @transform_3(%arg0: i32, %arg1: i32, %arg2: i32) -> (i32, i32, i32) {
    %c0_i32 = arith.constant 0 : i32
    %c0_i32_0 = arith.constant 0 : i32
    return %arg0, %arg1, %c0_i32 : i32, i32, i32
  }
}

</mosaic_0001>

<bundles_post_ra>
// kernel: attention_forward.5
= control target key start
LH: loop header
LB: loop body
LE: loop exit
PB: predicated region body
PF: predicated region fallthrough
CT: control target
= control target key end

     0   :  { %vm91_vm0 = vcmask 261120   ;;  %s375_s1 = inlined_call_operand.vmem [shape: bf16[32,32], index: 1, kind: input, shape index: {}]   ;;  %s376_s0 = inlined_call_operand.vmem [shape: bf16[128,32], index: 0, kind: input, shape index: {}]   ;;  %s377_s2 = inlined_call_operand.vmem [shape: f32[1,32], index: 2, kind: input, shape index: {}]   ;;  %s378_s3 = inlined_call_operand.vmem [shape: f32[128,32], index: 3, kind: output, shape index: {}]  }
   0x1   :  { %v242_v0 = vld [vmem:[%s375_s1 + $0x8] sm:$0xff]  ;;  %v241_v1 = vld [vmem:[%s375_s1] sm:$0xff]  ;;  %v235_v3 = vld [vmem:[%s376_s0 + $0x10] sm:$0xff] }
   0x2   :  { %122 = vmatpush.bf16.msra.mxu0 %v242_v0  ;;  %243 = vmatpush.bf16.msra.mxu1 %v242_v0  ;;  %v233_v2 = vld [vmem:[%s376_s0] sm:$0xff]  ;;  %v239_v5 = vld [vmem:[%s376_s0 + $0x30] sm:$0xff]  ;;  %v234_v6 = vld [vmem:[%s376_s0 + $0x8] sm:$0xff] }
   0x3   :  { %244 = vmatpush.bf16.msra.mxu2 %v242_v0  ;;  %245 = vmatpush.bf16.msra.mxu3 %v242_v0  ;;  %v237_v4 = vld [vmem:[%s376_s0 + $0x20] sm:$0xff]  ;;  %v236_v7 = vld [vmem:[%s376_s0 + $0x18] sm:$0xff]  ;;  %v238_v8 = vld [vmem:[%s376_s0 + $0x28] sm:$0xff] }
   0x4   :  { %v240_v9 = vld [vmem:[%s376_s0 + $0x38] sm:$0xff]  ;;  %v249_v10 = vld [vmem:[%s377_s2] ss:$0 sm:$0xff] }
   0x6   :  { %123 = vmatpush.bf16.msra.mxu0 %v241_v1  ;;  %246 = vmatpush.bf16.msra.mxu1 %v241_v1 }
   0x7   :  { %247 = vmatpush.bf16.msra.mxu2 %v241_v1  ;;  %248 = vmatpush.bf16.msra.mxu3 %v241_v1 }
   0x9   :  { %225 = vmatmul.msk.bf16.vlgmr.msra.gmra.mxu0 %vm91_vm0, %v233_v2  ;;  %227 = vmatmul.msk.bf16.vlgmr.msra.gmra.mxu1 %vm91_vm0, %v235_v3 }
   0xa   :  { %229 = vmatmul.msk.bf16.vlgmr.msra.gmra.mxu2 %vm91_vm0, %v237_v4  ;;  %231 = vmatmul.msk.bf16.vlgmr.msra.gmra.mxu3 %vm91_vm0, %v239_v5 }
  0x19   :  { %226 = vmatmul.msk.bf16.gmra.mxu0 %vm91_vm0, %v234_v6  ;;  %228 = vmatmul.msk.bf16.gmra.mxu1 %vm91_vm0, %v236_v7 }
  0x1a   :  { %230 = vmatmul.msk.bf16.gmra.mxu2 %vm91_vm0, %v238_v8  ;;  %232 = vmatmul.msk.bf16.gmra.mxu3 %vm91_vm0, %v240_v9 }
  0x86   :  { %v125_v11 = vpop.f32.mrf.mxu0  ;;  %v135_v12 = vpop.f32.mrf.mxu1 }
  0x87   :  { %v126_v13 = vadd.f32 %v249_v10, %v125_v11  ;;  %v136_v14 = vadd.f32 %v249_v10, %v135_v12 }
  0x89   :  { %165 = vst.msk [vmem:[%s378_s3] sm:$0xff] %vm91_vm0, %v126_v13 }
  0x8a   :  { %169 = vst.msk [vmem:[%s378_s3 + $0x20] sm:$0xff] %vm91_vm0, %v136_v14 }
  0x8d   :  { %v145_v15 = vpop.f32.mrf.mxu2  ;;  %v155_v16 = vpop.f32.mrf.mxu3 }
  0x8e   :  { %v146_v17 = vadd.f32 %v249_v10, %v145_v15  ;;  %v156_v18 = vadd.f32 %v249_v10, %v155_v16  ;;  %v127_v19 = vpop.f32.mrf.mxu0  ;;  %v137_v20 = vpop.f32.mrf.mxu1 }
  0x8f   :  { %v128_v21 = vadd.f32 %v249_v10, %v127_v19  ;;  %v138_v22 = vadd.f32 %v249_v10, %v137_v20 }
  0x90   :  { %173 = vst.msk [vmem:[%s378_s3 + $0x40] sm:$0xff] %vm91_vm0, %v146_v17 }
  0x91   :  { %177 = vst.msk [vmem:[%s378_s3 + $0x60] sm:$0xff] %vm91_vm0, %v156_v18 }
  0x92   :  { %166 = vst.msk [vmem:[%s378_s3 + $0x8] sm:$0xff] %vm91_vm0, %v128_v21 }
  0x93   :  { %170 = vst.msk [vmem:[%s378_s3 + $0x28] sm:$0xff] %vm91_vm0, %v138_v22 }
  0x95   :  { %v147_v23 = vpop.f32.mrf.mxu2  ;;  %v157_v24 = vpop.f32.mrf.mxu3 }
  0x96   :  { %v148_v25 = vadd.f32 %v249_v10, %v147_v23  ;;  %v158_v26 = vadd.f32 %v249_v10, %v157_v24  ;;  %v130_v27 = vpop.f32.mrf.mxu0  ;;  %v140_v28 = vpop.f32.mrf.mxu1 }
  0x97   :  { %v131_v29 = vadd.f32 %v249_v10, %v130_v27  ;;  %v141_v30 = vadd.f32 %v249_v10, %v140_v28 }
  0x98   :  { %174 = vst.msk [vmem:[%s378_s3 + $0x48] sm:$0xff] %vm91_vm0, %v148_v25 }
  0x99   :  { %178 = vst.msk [vmem:[%s378_s3 + $0x68] sm:$0xff] %vm91_vm0, %v158_v26 }
  0x9a   :  { %167 = vst.msk [vmem:[%s378_s3 + $0x10] sm:$0xff] %vm91_vm0, %v131_v29 }
  0x9b   :  { %171 = vst.msk [vmem:[%s378_s3 + $0x30] sm:$0xff] %vm91_vm0, %v141_v30 }
  0x9d   :  { %v150_v31 = vpop.f32.mrf.mxu2  ;;  %v160_v32 = vpop.f32.mrf.mxu3 }
  0x9e   :  { %v151_v33 = vadd.f32 %v249_v10, %v150_v31  ;;  %v161_v34 = vadd.f32 %v249_v10, %v160_v32  ;;  %v132_v35 = vpop.f32.mrf.mxu0  ;;  %v142_v36 = vpop.f32.mrf.mxu1 }
  0x9f   :  { %v133_v37 = vadd.f32 %v249_v10, %v132_v35  ;;  %v143_v38 = vadd.f32 %v249_v10, %v142_v36 }
  0xa0   :  { %175 = vst.msk [vmem:[%s378_s3 + $0x50] sm:$0xff] %vm91_vm0, %v151_v33 }
  0xa1   :  { %179 = vst.msk [vmem:[%s378_s3 + $0x70] sm:$0xff] %vm91_vm0, %v161_v34 }
  0xa2   :  { %168 = vst.msk [vmem:[%s378_s3 + $0x18] sm:$0xff] %vm91_vm0, %v133_v37 }
  0xa3   :  { %172 = vst.msk [vmem:[%s378_s3 + $0x38] sm:$0xff] %vm91_vm0, %v143_v38 }
  0xa5   :  { %v152_v39 = vpop.f32.mrf.mxu2  ;;  %v162_v40 = vpop.f32.mrf.mxu3 }
  0xa6   :  { %v153_v41 = vadd.f32 %v249_v10, %v152_v39  ;;  %v163_v42 = vadd.f32 %v249_v10, %v162_v40 }
  0xa8   :  { %176 = vst.msk [vmem:[%s378_s3 + $0x58] sm:$0xff] %vm91_vm0, %v153_v41 }
  0xa9   :  { %180 = vst.msk [vmem:[%s378_s3 + $0x78] sm:$0xff] %vm91_vm0, %v163_v42 }

// kernel: attention_forward.3
= control target key start
LH: loop header
LB: loop body
LE: loop exit
PB: predicated region body
PF: predicated region fallthrough
CT: control target
= control target key end

     0   :  { %vm62_vm0 = vcmask 261120   ;;  %vm152_vm1 = vcmask 257024   ;;  %s353_s6 = smov 64   ;;  %s691_s1 = inlined_call_operand.vmem [shape: bf16[32,96], index: 1, kind: input, shape index: {}]   ;;  %s692_s0 = inlined_call_operand.vmem [shape: f32[128,32], index: 0, kind: input, shape index: {}]   ;;  %s693_s2 = inlined_call_operand.vmem [shape: f32[1,96], index: 2, kind: input, shape index: {}]   ;;  %s694_s3 = inlined_call_operand.vmem [shape: bf16[128,32], index: 3, kind: output, shape index: {0}]   ;;  %s695_s4 = inlined_call_operand.vmem [shape: bf16[128,32], index: 4, kind: output, shape index: {1}]   ;;  %s696_s5 = inlined_call_operand.vmem [shape: bf16[128,32], index: 5, kind: output, shape index: {2}]  }
   0x1   :  { %v342_v0 = vld [vmem:[%s691_s1 + $0x8] sm:$0xff]  ;;  %v341_v1 = vld [vmem:[%s691_s1] sm:$0xff]  ;;  %v20_v14 = vld [vmem:[%s692_s0 + $0x10] sm:$0xff]  ;;  %s352_s1 = smov 96  }
   0x2   :  { %v18_v2 = vld [vmem:[%s692_s0] sm:$0xff]  ;;  %v19_v3 = vld [vmem:[%s692_s0 + $0x8] sm:$0xff]  ;;  %93 = vmatpush.bf16.msra.mxu0 %v342_v0  ;;  %343 = vmatpush.bf16.msra.mxu1 %v342_v0  ;;  %v21_v15 = vld [vmem:[%s692_s0 + $0x18] sm:$0xff] }
   0x3   :  { %v22_v4 = vld [vmem:[%s692_s0 + $0x20] sm:$0xff]  ;;  %v23_v5 = vld [vmem:[%s692_s0 + $0x28] sm:$0xff]  ;;  %345 = vmatpush.bf16.msra.mxu3 %v342_v0  ;;  %344 = vmatpush.bf16.msra.mxu2 %v342_v0  ;;  %v34_v10 = vpack.c.bf16 %v19_v3, %v18_v2  ;;  %v24_v16 = vld [vmem:[%s692_s0 + $0x30] sm:$0xff]  ;;  %v35_v22 = vpack.c.bf16 %v21_v15, %v20_v14 }
   0x4   :  { %v30_v6 = vld [vmem:[%s692_s0 + $0x60] sm:$0xff]  ;;  %v31_v7 = vld [vmem:[%s692_s0 + $0x68] sm:$0xff]  ;;  %v36_v11 = vpack.c.bf16 %v23_v5, %v22_v4  ;;  %v25_v17 = vld [vmem:[%s692_s0 + $0x38] sm:$0xff] }
   0x5   :  { %v26_v8 = vld [vmem:[%s692_s0 + $0x40] sm:$0xff]  ;;  %v27_v9 = vld [vmem:[%s692_s0 + $0x48] sm:$0xff]  ;;  %v40_v12 = vpack.c.bf16 %v31_v7, %v30_v6  ;;  %v28_v18 = vld [vmem:[%s692_s0 + $0x50] sm:$0xff]  ;;  %v37_v23 = vpack.c.bf16 %v25_v17, %v24_v16 }
   0x6   :  { %94 = vmatpush.bf16.msra.mxu0 %v341_v1  ;;  %346 = vmatpush.bf16.msra.mxu1 %v341_v1  ;;  %v38_v13 = vpack.c.bf16 %v27_v9, %v26_v8  ;;  %v29_v19 = vld [vmem:[%s692_s0 + $0x58] sm:$0xff]  ;;  %v32_v20 = vld [vmem:[%s692_s0 + $0x70] sm:$0xff]  ;;  %v449_v26 = vld [vmem:[%s693_s2] ss:$0 sm:$0xff] }
   0x7   :  { %348 = vmatpush.bf16.msra.mxu3 %v341_v1  ;;  %347 = vmatpush.bf16.msra.mxu2 %v341_v1  ;;  %v33_v21 = vld [vmem:[%s692_s0 + $0x78] sm:$0xff]  ;;  %v39_v24 = vpack.c.bf16 %v29_v19, %v28_v18 }
   0x8   :  { %v41_v25 = vpack.c.bf16 %v33_v21, %v32_v20 }
   0x9   :  { %333 = vmatmul.msk.bf16.vlgmr.msra.gmra.mxu0 %vm62_vm0, %v34_v10  ;;  %335 = vmatmul.msk.bf16.vlgmr.msra.gmra.mxu1 %vm62_vm0, %v36_v11 }
   0xa   :  { %339 = vmatmul.msk.bf16.vlgmr.msra.gmra.mxu3 %vm62_vm0, %v40_v12  ;;  %337 = vmatmul.msk.bf16.vlgmr.msra.gmra.mxu2 %vm62_vm0, %v38_v13 }
  0x19   :  { %334 = vmatmul.msk.bf16.gmra.mxu0 %vm62_vm0, %v35_v22  ;;  %336 = vmatmul.msk.bf16.gmra.mxu1 %vm62_vm0, %v37_v23 }
  0x1a   :  { %338 = vmatmul.msk.bf16.gmra.mxu2 %vm62_vm0, %v39_v24  ;;  %340 = vmatmul.msk.bf16.gmra.mxu3 %vm62_vm0, %v41_v25 }
  0x86   :  { %v96_v27 = vpop.f32.mrf.mxu0  ;;  %v106_v28 = vpop.f32.mrf.mxu1 }
  0x87   :  { %v97_v29 = vadd.f32 %v449_v26, %v96_v27  ;;  %v107_v30 = vadd.f32 %v449_v26, %v106_v28 }
  0x89   :  { %v136_v31 = vpack.c.bf16 %v97_v29, %v97_v29  ;;  %v140_v32 = vpack.c.bf16 %v107_v30, %v107_v30 }
  0x8b   :  { %153 = vst.msk [vmem:[%s694_s3] sm:$0xf] %vm152_vm1, %v136_v31  ;;  %193 = vrot.lane.b32.xlu2 %v140_v32, %s352_s1  ;;  %249 = vrot.lane.b32.xlu1 %v136_v31, %s353_s6 }
  0x8c   :  { %157 = vst.msk [vmem:[%s694_s3 + $0x10] sm:$0xf] %vm152_vm1, %v140_v32  ;;  %185 = vrot.lane.b32.xlu0 %v136_v31, %s352_s1 }
  0x8d   :  { %v126_v33 = vpop.f32.mrf.mxu3  ;;  %v116_v34 = vpop.f32.mrf.mxu2 }
  0x8e   :  { %v127_v35 = vadd.f32 %v449_v26, %v126_v33  ;;  %v98_v36 = vpop.f32.mrf.mxu0  ;;  %v117_v37 = vadd.f32 %v449_v26, %v116_v34  ;;  %v108_v38 = vpop.f32.mrf.mxu1 }
  0x8f   :  { %v99_v39 = vadd.f32 %v449_v26, %v98_v36  ;;  %v109_v40 = vadd.f32 %v449_v26, %v108_v38 }
  0x90   :  { %v148_v41 = vpack.c.bf16 %v127_v35, %v127_v35  ;;  %v144_v42 = vpack.c.bf16 %v117_v37, %v117_v37 }
  0x91   :  { %v137_v43 = vpack.c.bf16 %v99_v39, %v99_v39  ;;  %v141_v44 = vpack.c.bf16 %v109_v40, %v109_v40 }
  0x92   :  { %165 = vst.msk [vmem:[%s694_s3 + $0x30] sm:$0xf] %vm152_vm1, %v148_v41 }
  0x93   :  { %154 = vst.msk [vmem:[%s694_s3 + $0x4] sm:$0xf] %vm152_vm1, %v137_v43  ;;  %257 = vrot.lane.b32.xlu2 %v140_v32, %s353_s6  ;;  %273 = vrot.lane.b32.xlu1 %v148_v41, %s353_s6 }
  0x94   :  { %161 = vst.msk [vmem:[%s694_s3 + $0x20] sm:$0xf] %vm152_vm1, %v144_v42  ;;  %209 = vrot.lane.b32.xlu0 %v148_v41, %s352_s1 }
  0x95   :  { %v128_v45 = vpop.f32.mrf.mxu3  ;;  %v118_v46 = vpop.f32.mrf.mxu2  ;;  %158 = vst.msk [vmem:[%s694_s3 + $0x14] sm:$0xf] %vm152_vm1, %v141_v44 }
  0x96   :  { %v129_v47 = vadd.f32 %v449_v26, %v128_v45  ;;  %v119_v48 = vadd.f32 %v449_v26, %v118_v46  ;;  %v101_v49 = vpop.f32.mrf.mxu0  ;;  %v111_v50 = vpop.f32.mrf.mxu1 }
  0x97   :  { %v102_v51 = vadd.f32 %v449_v26, %v101_v49  ;;  %v112_v52 = vadd.f32 %v449_v26, %v111_v50 }
  0x98   :  { %v149_v53 = vpack.c.bf16 %v129_v47, %v129_v47  ;;  %v145_v54 = vpack.c.bf16 %v119_v48, %v119_v48 }
  0x99   :  { %v138_v55 = vpack.c.bf16 %v102_v51, %v102_v51  ;;  %v142_v56 = vpack.c.bf16 %v112_v52, %v112_v52 }
  0x9a   :  { %166 = vst.msk [vmem:[%s694_s3 + $0x34] sm:$0xf] %vm152_vm1, %v149_v53 }
  0x9b   :  { %162 = vst.msk [vmem:[%s694_s3 + $0x24] sm:$0xf] %vm152_vm1, %v145_v54  ;;  %201 = vrot.lane.b32.xlu2 %v144_v42, %s352_s1  ;;  %211 = vrot.lane.b32.xlu1 %v149_v53, %s352_s1 }
  0x9c   :  { %265 = vrot.lane.b32.xlu0 %v144_v42, %s353_s6  ;;  %155 = vst.msk [vmem:[%s694_s3 + $0x8] sm:$0xf] %vm152_vm1, %v138_v55 }
  0x9d   :  { %159 = vst.msk [vmem:[%s694_s3 + $0x18] sm:$0xf] %vm152_vm1, %v142_v56  ;;  %v121_v57 = vpop.f32.mrf.mxu2  ;;  %v131_v58 = vpop.f32.mrf.mxu3 }
  0x9e   :  { %v103_v59 = vpop.f32.mrf.mxu0  ;;  %v113_v60 = vpop.f32.mrf.mxu1  ;;  %v122_v61 = vadd.f32 %v449_v26, %v121_v57  ;;  %v132_v0 = vadd.f32 %v449_v26, %v131_v58 }
  0x9f   :  { %v104_v62 = vadd.f32 %v449_v26, %v103_v59  ;;  %v114_v63 = vadd.f32 %v449_v26, %v113_v60 }
  0xa0   :  { %v146_v1 = vpack.c.bf16 %v122_v61, %v122_v61  ;;  %v150_v4 = vpack.c.bf16 %v132_v0, %v132_v0 }
  0xa1   :  { %v139_v2 = vpack.c.bf16 %v104_v62, %v104_v62  ;;  %v143_v3 = vpack.c.bf16 %v114_v63, %v114_v63 }
  0xa2   :  { %163 = vst.msk [vmem:[%s694_s3 + $0x28] sm:$0xf] %vm152_vm1, %v146_v1 }
  0xa3   :  { %195 = vrot.lane.b32.xlu2 %v141_v44, %s352_s1  ;;  %267 = vrot.lane.b32.xlu1 %v145_v54, %s353_s6  ;;  %156 = vst.msk [vmem:[%s694_s3 + $0xc] sm:$0xf] %vm152_vm1, %v139_v2 }
  0xa4   :  { %187 = vrot.lane.b32.xlu0 %v137_v43, %s352_s1  ;;  %160 = vst.msk [vmem:[%s694_s3 + $0x1c] sm:$0xf] %vm152_vm1, %v143_v3 }
  0xa5   :  { %167 = vst.msk [vmem:[%s694_s3 + $0x38] sm:$0xf] %vm152_vm1, %v150_v4  ;;  %v123_v5 = vpop.f32.mrf.mxu2  ;;  %v133_v6 = vpop.f32.mrf.mxu3 }
  0xa6   :  { %v124_v7 = vadd.f32 %v449_v26, %v123_v5  ;;  %v134_v8 = vadd.f32 %v449_v26, %v133_v6 }
  0xa8   :  { %v147_v9 = vpack.c.bf16 %v124_v7, %v124_v7  ;;  %v151_v10 = vpack.c.bf16 %v134_v8, %v134_v8 }
  0xaa   :  { %164 = vst.msk [vmem:[%s694_s3 + $0x2c] sm:$0xf] %vm152_vm1, %v147_v9 }
  0xab   :  { %251 = vrot.lane.b32.xlu2 %v137_v43, %s353_s6  ;;  %189 = vrot.lane.b32.xlu1 %v138_v55, %s352_s1  ;;  %168 = vst.msk [vmem:[%s694_s3 + $0x3c] sm:$0xf] %vm152_vm1, %v151_v10 }
  0xac   :  { %259 = vrot.lane.b32.xlu0 %v141_v44, %s353_s6 }
  0xb3   :  { %213 = vrot.lane.b32.xlu2 %v150_v4, %s352_s1  ;;  %261 = vrot.lane.b32.xlu1 %v142_v56, %s353_s6 }
  0xb4   :  { %203 = vrot.lane.b32.xlu0 %v145_v54, %s352_s1 }
  0xbb   :  { %269 = vrot.lane.b32.xlu2 %v146_v1, %s353_s6  ;;  %205 = vrot.lane.b32.xlu1 %v146_v1, %s352_s1 }
  0xbc   :  { %197 = vrot.lane.b32.xlu0 %v142_v56, %s352_s1 }
  0xc3   :  { %263 = vrot.lane.b32.xlu2 %v143_v3, %s353_s6  ;;  %191 = vrot.lane.b32.xlu1 %v139_v2, %s352_s1 }
  0xc4   :  { %253 = vrot.lane.b32.xlu0 %v138_v55, %s353_s6 }
  0xcb   :  { %207 = vrot.lane.b32.xlu2 %v147_v9, %s352_s1  ;;  %199 = vrot.lane.b32.xlu1 %v143_v3, %s352_s1 }
  0xcc   :  { %215 = vrot.lane.b32.xlu0 %v151_v10, %s352_s1 }
  0xd3   :  { %275 = vrot.lane.b32.xlu2 %v149_v53, %s353_s6  ;;  %255 = vrot.lane.b32.xlu1 %v139_v2, %s353_s6 }
  0xd4   :  { %271 = vrot.lane.b32.xlu0 %v147_v9, %s353_s6 }
  0xdb   :  { %279 = vrot.lane.b32.xlu1 %v151_v10, %s353_s6 }
  0xdc   :  { %277 = vrot.lane.b32.xlu0 %v150_v4, %s353_s6 }
  0xe5   :  { %v194_v11 = vpop.permute.xlu2 %193 }
  0xe6   :  { %237 = vst.msk [vmem:[%s695_s4 + $0x10] sm:$0xf] %vm152_vm1, %v194_v11 }
  0xed   :  { %v258_v12 = vpop.permute.xlu2 %257 }
  0xee   :  { %301 = vst.msk [vmem:[%s696_s5 + $0x10] sm:$0xf] %vm152_vm1, %v258_v12 }
  0xf5   :  { %v202_v13 = vpop.permute.xlu2 %201 }
  0xf6   :  { %241 = vst.msk [vmem:[%s695_s4 + $0x20] sm:$0xf] %vm152_vm1, %v202_v13 }
  0xfd   :  { %v196_v14 = vpop.permute.xlu2 %195  ;;  %v250_v15 = vpop.permute.xlu1 %249 }
  0xfe   :  { %238 = vst.msk [vmem:[%s695_s4 + $0x14] sm:$0xf] %vm152_vm1, %v196_v14  ;;  %v186_v16 = vpop.permute.xlu0 %185 }
  0xff   :  { %297 = vst.msk [vmem:[%s696_s5] sm:$0xf] %vm152_vm1, %v250_v15 }
 0x100   :  { %233 = vst.msk [vmem:[%s695_s4] sm:$0xf] %vm152_vm1, %v186_v16 }
 0x105   :  { %v252_v17 = vpop.permute.xlu2 %251  ;;  %v274_v18 = vpop.permute.xlu1 %273 }
 0x106   :  { %298 = vst.msk [vmem:[%s696_s5 + $0x4] sm:$0xf] %vm152_vm1, %v252_v17  ;;  %v210_v19 = vpop.permute.xlu0 %209 }
 0x107   :  { %309 = vst.msk [vmem:[%s696_s5 + $0x30] sm:$0xf] %vm152_vm1, %v274_v18 }
 0x108   :  { %245 = vst.msk [vmem:[%s695_s4 + $0x30] sm:$0xf] %vm152_vm1, %v210_v19 }
 0x10d   :  { %v214_v20 = vpop.permute.xlu2 %213  ;;  %v212_v21 = vpop.permute.xlu1 %211 }
 0x10e   :  { %247 = vst.msk [vmem:[%s695_s4 + $0x38] sm:$0xf] %vm152_vm1, %v214_v20  ;;  %v266_v22 = vpop.permute.xlu0 %265 }
 0x10f   :  { %246 = vst.msk [vmem:[%s695_s4 + $0x34] sm:$0xf] %vm152_vm1, %v212_v21 }
 0x110   :  { %305 = vst.msk [vmem:[%s696_s5 + $0x20] sm:$0xf] %vm152_vm1, %v266_v22 }
 0x115   :  { %v270_v23 = vpop.permute.xlu2 %269  ;;  %v268_v24 = vpop.permute.xlu1 %267 }
 0x116   :  { %307 = vst.msk [vmem:[%s696_s5 + $0x28] sm:$0xf] %vm152_vm1, %v270_v23  ;;  %v188_v25 = vpop.permute.xlu0 %187 }
 0x117   :  { %306 = vst.msk [vmem:[%s696_s5 + $0x24] sm:$0xf] %vm152_vm1, %v268_v24 }
 0x118   :  { %234 = vst.msk [vmem:[%s695_s4 + $0x4] sm:$0xf] %vm152_vm1, %v188_v25 }
 0x11d   :  { %v264_v26 = vpop.permute.xlu2 %263  ;;  %v190_v27 = vpop.permute.xlu1 %189 }
 0x11e   :  { %304 = vst.msk [vmem:[%s696_s5 + $0x1c] sm:$0xf] %vm152_vm1, %v264_v26  ;;  %v260_v28 = vpop.permute.xlu0 %259 }
 0x11f   :  { %235 = vst.msk [vmem:[%s695_s4 + $0x8] sm:$0xf] %vm152_vm1, %v190_v27 }
 0x120   :  { %302 = vst.msk [vmem:[%s696_s5 + $0x14] sm:$0xf] %vm152_vm1, %v260_v28 }
 0x125   :  { %v208_v29 = vpop.permute.xlu2 %207  ;;  %v262_v30 = vpop.permute.xlu1 %261 }
 0x126   :  { %244 = vst.msk [vmem:[%s695_s4 + $0x2c] sm:$0xf] %vm152_vm1, %v208_v29  ;;  %v204_v31 = vpop.permute.xlu0 %203 }
 0x127   :  { %303 = vst.msk [vmem:[%s696_s5 + $0x18] sm:$0xf] %vm152_vm1, %v262_v30 }
 0x128   :  { %242 = vst.msk [vmem:[%s695_s4 + $0x24] sm:$0xf] %vm152_vm1, %v204_v31 }
 0x12d   :  { %v276_v32 = vpop.permute.xlu2 %275  ;;  %v206_v33 = vpop.permute.xlu1 %205 }
 0x12e   :  { %310 = vst.msk [vmem:[%s696_s5 + $0x34] sm:$0xf] %vm152_vm1, %v276_v32  ;;  %v198_v34 = vpop.permute.xlu0 %197 }
 0x12f   :  { %243 = vst.msk [vmem:[%s695_s4 + $0x28] sm:$0xf] %vm152_vm1, %v206_v33 }
 0x130   :  { %239 = vst.msk [vmem:[%s695_s4 + $0x18] sm:$0xf] %vm152_vm1, %v198_v34 }
 0x135   :  { %v192_v35 = vpop.permute.xlu1 %191 }
 0x136   :  { %236 = vst.msk [vmem:[%s695_s4 + $0xc] sm:$0xf] %vm152_vm1, %v192_v35  ;;  %v254_v36 = vpop.permute.xlu0 %253 }
 0x137   :  { %299 = vst.msk [vmem:[%s696_s5 + $0x8] sm:$0xf] %vm152_vm1, %v254_v36 }
 0x13d   :  { %v200_v37 = vpop.permute.xlu1 %199 }
 0x13e   :  { %240 = vst.msk [vmem:[%s695_s4 + $0x1c] sm:$0xf] %vm152_vm1, %v200_v37  ;;  %v216_v38 = vpop.permute.xlu0 %215 }
 0x13f   :  { %248 = vst.msk [vmem:[%s695_s4 + $0x3c] sm:$0xf] %vm152_vm1, %v216_v38 }
 0x145   :  { %v256_v39 = vpop.permute.xlu1 %255 }
 0x146   :  { %300 = vst.msk [vmem:[%s696_s5 + $0xc] sm:$0xf] %vm152_vm1, %v256_v39  ;;  %v272_v40 = vpop.permute.xlu0 %271 }
 0x147   :  { %308 = vst.msk [vmem:[%s696_s5 + $0x2c] sm:$0xf] %vm152_vm1, %v272_v40 }
 0x14d   :  { %v280_v41 = vpop.permute.xlu1 %279 }
 0x14e   :  { %312 = vst.msk [vmem:[%s696_s5 + $0x3c] sm:$0xf] %vm152_vm1, %v280_v41  ;;  %v278_v42 = vpop.permute.xlu0 %277 }
 0x14f   :  { %311 = vst.msk [vmem:[%s696_s5 + $0x38] sm:$0xf] %vm152_vm1, %v278_v42 }

// kernel: attention_forward.4
= control target key start
LH: loop header
LB: loop body
LE: loop exit
PB: predicated region body
PF: predicated region fallthrough
CT: control target
= control target key end

     0   :  { %s4836_s12 = smov 0   ;;  %s4838_s13 = smov 0   ;;  %s6918_s0 = inlined_call_operand.vmem [shape: bf16[2,64,32], index: 0, kind: input, shape index: {}]   ;;  %s6919_s1 = inlined_call_operand.vmem [shape: bf16[2,64,32], index: 1, kind: input, shape index: {}]   ;;  %s6920_s2 = inlined_call_operand.vmem [shape: bf16[2,64,32], index: 2, kind: input, shape index: {}]   ;;  %s6921_s3 = inlined_call_operand.vmem [shape: bf16[2,64,32], index: 3, kind: output, shape index: {}]  }
   0x1   :  { %s4840_s14 = smov 0  }
   0x2 LB: > { %s32_s15 = sadd.s32 1, %s4786_s13  ;;  %p4234_p0 = scmp.ge.s32.totalorder %s4790_s14, 1  ;;  %s4790_s14 = sphi %s4840_s14, %s13_s14   ;;  %s4786_s13 = sphi %s4838_s13, %s6968_s13   ;;  %s4782_s12 = sphi %s4836_s12, %s6967_s12  }
   0x3   : > { %p34_p1 = scmp.ge.s32.totalorder %s32_s15, 2  ;;  %p199_p2 = scmp.lt.s32.totalorder %s4790_s14, 3 }
   0x5   : > { %s6970_s15 = smov (%p34_p1, %s32_s15), 0  ;;  %p200_p3 = pnand %p4234_p0, %p199_p2 }
   0x7   : > { %203 = sbr.rel (%p200_p3) target bundleno = 4587 (0x11eb), region = 32 }
   0xc   : > { %p250_p4 = scmp.lt.s32.totalorder %s4782_s12, 1  ;;  %s4792_s23 = smov 124   ;;  %vm383_vm0 = vcmask 31744   ;;  %vm453_vm1 = vcmask 523264   ;;  %vm294_vm2 = vcmask 261120   ;;  %vm1209_vm3 = vcmask 64544  }
   0xd   : > { %s4793_s27 = smov 120   ;;  %s4794_s28 = smov 116   ;;  %vm1672_vm4 = vcmask 97344   ;;  %vm2135_vm5 = vcmask 130144   ;;  %vm2598_vm6 = vcmask 162944   ;;  %vm3061_vm7 = vcmask 195744  }
   0xe   : > { %s6972_s12 = smov (!%p250_p4, %s4782_s12), 1  ;;  %s4795_s29 = smov 112   ;;  %vm3524_vm8 = vcmask 228544   ;;  %vm3987_vm9 = vcmask 261344   ;;  %vm4095_vm10 = vcmask 257024  }
   0xf   : > { %s4854_s16 = sshll.u32 %s6972_s12, 5  ;;  %s4800_s30 = smov 4  }
  0x10   : > { %s4860_s19 = scalar_lea.vmem %s6918_s0, %s4854_s16  ;;  %s4872_s22 = scalar_lea.vmem %s6920_s2, %s4854_s16 }
  0x11   : > { %v4863_v0 = vld [vmem:[%s4860_s19 + $0x10] sm:$0xff]  ;;  %v4866_v1 = vld [vmem:[%s4860_s19] sm:$0xff]  ;;  %v4875_v2 = vld [vmem:[%s4860_s19 + $0x8] sm:$0xff]  ;;  %s4884_s26 = scalar_lea.vmem %s6919_s1, %s4854_s16  ;;  %s4804_s4 = smov 8  }
  0x12   : > { %815 = vrot.lane.b32.xlu1 %v4863_v0, %s4792_s23  ;;  %811 = vrot.lane.b32.xlu0 %v4866_v1, %s4792_s23  ;;  %v4372_v3 = vld [vmem:[%s4872_s22 + $0x18] sm:$0xff]  ;;  %v4888_v4 = vld [vmem:[%s4884_s26 + $0x8] sm:$0xff]  ;;  %s4805_s5 = smov 12   ;;  %s4806_s6 = smov 108  }
  0x13   : > { %813 = vrot.lane.b32.xlu2 %v4875_v2, %s4792_s23  ;;  %714 = vmatpush.bf16.msra.mxu1 %v4372_v3  ;;  %v4891_v5 = vld [vmem:[%s4860_s19 + $0x18] sm:$0xff]  ;;  %v4371_v6 = vld [vmem:[%s4872_s22 + $0x10] sm:$0xff]  ;;  %v4365_v7 = vld [vmem:[%s4884_s26] sm:$0xff]  ;;  %v400_v14 = vsel %vm383_vm0, %v4888_v4, 0  ;;  %s4807_s7 = smov 16   ;;  %s4809_s8 = smov 20  }
  0x14   : > { %v4368_v8 = vld [vmem:[%s4884_s26 + $0x18] sm:$0xff]  ;;  %v4369_v10 = vld [vmem:[%s4872_s22] sm:$0xff]  ;;  %v4367_v11 = vld [vmem:[%s4884_s26 + $0x10] sm:$0xff]  ;;  %v397_v15 = vsel %vm383_vm0, %v4365_v7, 0  ;;  %s4810_s9 = smov 104   ;;  %s4811_s10 = smov 100  }
  0x15   : > { %v406_v9 = vsel %vm383_vm0, %v4368_v8, 0  ;;  %v403_v12 = vsel %vm383_vm0, %v4367_v11, 0  ;;  %v4370_v13 = vld [vmem:[%s4872_s22 + $0x8] sm:$0xff]  ;;  %s4814_s11 = smov 24   ;;  %s4815_s12 = smov 28  }
  0x16   : > { %412 = vmatpush.bf16.xpose.msra.mxu0 %v406_v9 }
  0x17   : > { %715 = vmatpush.bf16.msra.mxu1 %v4371_v6 }
  0x1a   : > { %821 = vrot.lane.b32.xlu1 %v4888_v4, %s4792_s23  ;;  %817 = vrot.lane.b32.xlu0 %v4891_v5, %s4792_s23 }
  0x1b   : > { %819 = vrot.lane.b32.xlu2 %v4365_v7, %s4792_s23  ;;  %716 = vmatpush.bf16.msra.mxu1 %v4370_v13 }
  0x1e   : > { %413 = vmatpush.bf16.xpose.msra.mxu0 %v403_v12 }
  0x1f   : > { %717 = vmatpush.bf16.msra.mxu1 %v4369_v10 }
  0x22   : > { %1116 = vrot.lane.b32.xlu1 %v4369_v10, %s4792_s23  ;;  %823 = vrot.lane.b32.xlu0 %v4367_v11, %s4792_s23 }
  0x23   : > { %825 = vrot.lane.b32.xlu2 %v4368_v8, %s4792_s23 }
  0x26   : > { %414 = vmatpush.bf16.xpose.msra.mxu0 %v400_v14 }
  0x2a   : > { %1122 = vrot.lane.b32.xlu1 %v4372_v3, %s4792_s23  ;;  %1120 = vrot.lane.b32.xlu0 %v4371_v6, %s4792_s23 }
  0x2b   : > { %1118 = vrot.lane.b32.xlu2 %v4370_v13, %s4792_s23 }
  0x2e   : > { %415 = vmatpush.bf16.xpose.msra.mxu0 %v397_v15 }
  0x32   : > { %1276 = vrot.lane.b32.xlu1 %v4875_v2, %s4793_s27  ;;  %1274 = vrot.lane.b32.xlu0 %v4866_v1, %s4793_s27 }
  0x33   : > { %1278 = vrot.lane.b32.xlu2 %v4863_v0, %s4793_s27 }
  0x35   : > { %4275 = vmatmul.msk.bf16.vlgmr.msra.gmra.mxu0 %vm383_vm0, %v4866_v1 }
  0x3a   : > { %1282 = vrot.lane.b32.xlu1 %v4365_v7, %s4793_s27  ;;  %1280 = vrot.lane.b32.xlu0 %v4891_v5, %s4793_s27 }
  0x3b   : > { %1284 = vrot.lane.b32.xlu2 %v4888_v4, %s4793_s27 }
  0x42   : > { %1288 = vrot.lane.b32.xlu1 %v4368_v8, %s4793_s27  ;;  %1286 = vrot.lane.b32.xlu0 %v4367_v11, %s4793_s27 }
  0x43   : > { %1581 = vrot.lane.b32.xlu2 %v4370_v13, %s4793_s27 }
  0x45   : > { %4276 = vmatmul.msk.bf16.gmra.mxu0 %vm383_vm0, %v4875_v2 }
  0x4a   : > { %1579 = vrot.lane.b32.xlu1 %v4369_v10, %s4793_s27  ;;  %1583 = vrot.lane.b32.xlu0 %v4371_v6, %s4793_s27 }
  0x4b   : > { %1741 = vrot.lane.b32.xlu2 %v4863_v0, %s4794_s28 }
  0x52   : > { %1585 = vrot.lane.b32.xlu1 %v4372_v3, %s4793_s27  ;;  %1737 = vrot.lane.b32.xlu0 %v4866_v1, %s4794_s28 }
  0x53   : > { %1747 = vrot.lane.b32.xlu2 %v4888_v4, %s4794_s28 }
  0x55   : > { %4277 = vmatmul.msk.bf16.gmra.mxu0 %vm383_vm0, %v4863_v0 }
  0x5a   : > { %1739 = vrot.lane.b32.xlu1 %v4875_v2, %s4794_s28  ;;  %1743 = vrot.lane.b32.xlu0 %v4891_v5, %s4794_s28 }
  0x5b   : > { %2042 = vrot.lane.b32.xlu2 %v4369_v10, %s4794_s28 }
  0x62   : > { %1745 = vrot.lane.b32.xlu1 %v4365_v7, %s4794_s28  ;;  %1749 = vrot.lane.b32.xlu0 %v4367_v11, %s4794_s28 }
  0x63   : > { %2048 = vrot.lane.b32.xlu2 %v4372_v3, %s4794_s28 }
  0x65   : > { %4278 = vmatmul.msk.bf16.gmra.mxu0 %vm383_vm0, %v4891_v5 }
  0x6a   : > { %1751 = vrot.lane.b32.xlu1 %v4368_v8, %s4794_s28  ;;  %2044 = vrot.lane.b32.xlu0 %v4370_v13, %s4794_s28 }
  0x6b   : > { %2202 = vrot.lane.b32.xlu2 %v4875_v2, %s4795_s29 }
  0x6d   : > { %v814_v16 = vpop.permute.xlu2 %813 }
  0x72   : > { %2046 = vrot.lane.b32.xlu1 %v4371_v6, %s4794_s28  ;;  %2204 = vrot.lane.b32.xlu0 %v4863_v0, %s4795_s29 }
  0x73   : > { %2208 = vrot.lane.b32.xlu2 %v4365_v7, %s4795_s29 }
  0x75   : > { %v820_v17 = vpop.permute.xlu2 %819 }
  0x76   : > { %v840_v33 = vsel %vm383_vm0, %v820_v17, 0  ;;  %v4796_v17 = vmov -inf  }
  0x77   : > { %295 = vst.msk [vmem:[#allocation2] sm:$0xff] %vm294_vm2, %v4796_v17 }
  0x78   : > { %296 = vst.msk [vmem:[#allocation2 + $0x8] sm:$0xff] %vm294_vm2, %v4796_v17 }
  0x79   : > { %297 = vst.msk [vmem:[#allocation2 + $0x10] sm:$0xff] %vm294_vm2, %v4796_v17 }
  0x7a   : > { %2210 = vrot.lane.b32.xlu0 %v4888_v4, %s4795_s29  ;;  %2200 = vrot.lane.b32.xlu1 %v4866_v1, %s4795_s29  ;;  %298 = vst.msk [vmem:[#allocation2 + $0x18] sm:$0xff] %vm294_vm2, %v4796_v17 }
  0x7b   : > { %2214 = vrot.lane.b32.xlu2 %v4368_v8, %s4795_s29  ;;  %299 = vst.msk [vmem:[#allocation2 + $0x20] sm:$0xff] %vm294_vm2, %v4796_v17 }
  0x7c   : > { %300 = vst.msk [vmem:[#allocation2 + $0x28] sm:$0xff] %vm294_vm2, %v4796_v17 }
  0x7d   : > { %v826_v18 = vpop.permute.xlu2 %825  ;;  %301 = vst.msk [vmem:[#allocation2 + $0x30] sm:$0xff] %vm294_vm2, %v4796_v17 }
  0x7e   : > { %v849_v19 = vsel %vm383_vm0, %v826_v18, 0  ;;  %302 = vst.msk [vmem:[#allocation2 + $0x38] sm:$0xff] %vm294_vm2, %v4796_v17 }
  0x7f   : > { %855 = vmatpush.bf16.xpose.msra.mxu2 %v849_v19 }
  0x82   : > { %2206 = vrot.lane.b32.xlu1 %v4891_v5, %s4795_s29 }
  0x84   : > { %v816_v20 = vpop.permute.xlu1 %815  ;;  %v812_v21 = vpop.permute.xlu0 %811 }
  0x85   : > { %v1119_v30 = vpop.permute.xlu2 %1118 }
  0x8a   : > { %2212 = vrot.lane.b32.xlu1 %v4367_v11, %s4795_s29 }
  0x8c   : > { %v822_v22 = vpop.permute.xlu1 %821  ;;  %v818_v23 = vpop.permute.xlu0 %817 }
  0x8d   : > { %v843_v29 = vsel %vm383_vm0, %v822_v22, 0  ;;  %v4949_v38 = vpop.permute.xlu2 %1278 }
  0x94   : > { %v1117_v24 = vpop.permute.xlu1 %1116  ;;  %v824_v25 = vpop.permute.xlu0 %823 }
  0x95   : > { %v846_v26 = vsel %vm383_vm0, %v824_v25, 0  ;;  %v1285_v44 = vpop.permute.xlu2 %1284  ;;  %v4797_v25 = vmov 0.0  }
  0x96   : > { %856 = vmatpush.bf16.xpose.msra.mxu2 %v846_v26  ;;  %v1306_v47 = vsel %vm383_vm0, %v1285_v44, 0  ;;  %311 = vst.msk [vmem:[#allocation4] sm:$0xff] %vm294_vm2, %v4797_v25 }
  0x97   : > { %303 = vst.msk [vmem:[#allocation3] sm:$0xff] %vm294_vm2, %v4797_v25 }
  0x98   : > { %304 = vst.msk [vmem:[#allocation3 + $0x8] sm:$0xff] %vm294_vm2, %v4797_v25 }
  0x99   : > { %305 = vst.msk [vmem:[#allocation3 + $0x10] sm:$0xff] %vm294_vm2, %v4797_v25 }
  0x9a   : > { %306 = vst.msk [vmem:[#allocation3 + $0x18] sm:$0xff] %vm294_vm2, %v4797_v25 }
  0x9b   : > { %307 = vst.msk [vmem:[#allocation3 + $0x20] sm:$0xff] %vm294_vm2, %v4797_v25 }
  0x9c   : > { %v1123_v27 = vpop.permute.xlu1 %1122  ;;  %v1121_v28 = vpop.permute.xlu0 %1120  ;;  %308 = vst.msk [vmem:[#allocation3 + $0x28] sm:$0xff] %vm294_vm2, %v4797_v25 }
  0x9d   : > { %1144 = vmatpush.bf16.msra.mxu3 %v1123_v27  ;;  %v1582_v50 = vpop.permute.xlu2 %1581  ;;  %v6924_v27 = vmov 0   ;;  %309 = vst.msk [vmem:[#allocation3 + $0x30] sm:$0xff] %vm294_vm2, %v4797_v25 }
  0x9e   : > { %857 = vmatpush.bf16.xpose.msra.mxu2 %v843_v29  ;;  %4423 = vset.pattern.permute.xlu1 %v6924_v27  ;;  %310 = vst.msk [vmem:[#allocation3 + $0x38] sm:$0xff] %vm294_vm2, %v4797_v25 }
  0x9f   : > { %4421 = vset.pattern.permute.xlu2 %v6924_v27  ;;  %4422 = vset.pattern.permute.xlu0 %v6924_v27  ;;  %312 = vst.msk [vmem:[#allocation4 + $0x8] sm:$0xff] %vm294_vm2, %v4797_v25 }
  0xa0   : > { %313 = vst.msk [vmem:[#allocation4 + $0x10] sm:$0xff] %vm294_vm2, %v4797_v25 }
  0xa1   : > { %1145 = vmatpush.bf16.msra.mxu3 %v1121_v28  ;;  %314 = vst.msk [vmem:[#allocation4 + $0x18] sm:$0xff] %vm294_vm2, %v4797_v25 }
  0xa2   : > { %315 = vst.msk [vmem:[#allocation4 + $0x20] sm:$0xff] %vm294_vm2, %v4797_v25 }
  0xa3   : > { %316 = vst.msk [vmem:[#allocation4 + $0x28] sm:$0xff] %vm294_vm2, %v4797_v25 }
  0xa4   : > { %v4940_v31 = vpop.permute.xlu1 %1276  ;;  %v4942_v32 = vpop.permute.xlu0 %1274  ;;  %317 = vst.msk [vmem:[#allocation4 + $0x30] sm:$0xff] %vm294_vm2, %v4797_v25 }
  0xa5   : > { %1146 = vmatpush.bf16.msra.mxu3 %v1119_v30  ;;  %v1742_v54 = vpop.permute.xlu2 %1741  ;;  %318 = vst.msk [vmem:[#allocation4 + $0x38] sm:$0xff] %vm294_vm2, %v4797_v25 }
  0xa6   : > { %858 = vmatpush.bf16.xpose.msra.mxu2 %v840_v33 }
  0xa9   : > { %1147 = vmatpush.bf16.msra.mxu3 %v1117_v24 }
  0xac   : > { %v1283_v34 = vpop.permute.xlu1 %1282  ;;  %v4946_v35 = vpop.permute.xlu0 %1280 }
  0xad   : > { %4299 = vmatmul.msk.bf16.vlgmr.msra.gmra.mxu2 %vm383_vm0, %v812_v21  ;;  %v1303_v53 = vsel %vm383_vm0, %v1283_v34, 0  ;;  %v1748_v57 = vpop.permute.xlu2 %1747  ;;  %v437_v21 = vld [vmem:[#allocation2] sm:$0xff] }
  0xae   : > { %v1769_v1 = vsel %vm383_vm0, %v1748_v57, 0 }
  0xb2   : > { %v4951_v40 = vpop.f32.mrf.mxu0 }
  0xb3   : > { %v454_v41 = vsel %vm453_vm1, %v4951_v40, -inf }
  0xb4   : > { %v1289_v36 = vpop.permute.xlu1 %1288  ;;  %v1287_v39 = vpop.permute.xlu0 %1286  ;;  %455 = vmax.xlane.f32.xlu0 %v454_v41 }
  0xb5   : > { %v1312_v37 = vsel %vm383_vm0, %v1289_v36, 0  ;;  %v1309_v42 = vsel %vm383_vm0, %v1287_v39, 0  ;;  %v2043_v63 = vpop.permute.xlu2 %2042  ;;  %v438_v36 = vld [vmem:[#allocation2 + $0x8] sm:$0xff] }
  0xb6   : > { %1318 = vmatpush.bf16.xpose.msrb.mxu1 %v1312_v37 }
  0xba   : > { %v4957_v45 = vpop.f32.mrf.mxu0 }
  0xbb   : > { %v457_v46 = vsel %vm453_vm1, %v4957_v45, -inf }
  0xbc   : > { %v1580_v43 = vpop.permute.xlu1 %1579  ;;  %458 = vmax.xlane.f32.xlu0 %v457_v46  ;;  %v1584_v49 = vpop.permute.xlu0 %1583 }
  0xbd   : > { %4300 = vmatmul.msk.bf16.gmra.mxu2 %vm383_vm0, %v814_v16  ;;  %v2049_v3 = vpop.permute.xlu2 %2048 }
  0xbe   : > { %1319 = vmatpush.bf16.xpose.msrb.mxu1 %v1309_v42  ;;  %2070 = vmatpush.bf16.msrb.mxu2 %v2049_v3 }
  0xc2   : > { %v4966_v60 = vpop.f32.mrf.mxu0 }
  0xc3   : > { %v460_v4 = vsel %vm453_vm1, %v4966_v60, -inf }
  0xc4   : > { %v1586_v48 = vpop.permute.xlu1 %1585  ;;  %v1738_v52 = vpop.permute.xlu0 %1737  ;;  %461 = vmax.xlane.f32.xlu1 %v460_v4  ;;  %v440_v4 = vld [vmem:[#allocation2 + $0x18] sm:$0xff] }
  0xc5   : > { %1607 = vmatpush.bf16.msrb.mxu3 %v1586_v48 }
  0xc6   : > { %1320 = vmatpush.bf16.xpose.msrb.mxu1 %v1306_v47 }
  0xc9   : > { %1608 = vmatpush.bf16.msrb.mxu3 %v1584_v49 }
  0xca   : > { %v4969_v0 = vpop.f32.mrf.mxu0 }
  0xcb   : > { %v463_v6 = vsel %vm453_vm1, %v4969_v0, -inf }
  0xcc   : > { %v1740_v51 = vpop.permute.xlu1 %1739  ;;  %v1744_v56 = vpop.permute.xlu0 %1743  ;;  %464 = vmax.xlane.f32.xlu1 %v463_v6 }
  0xcd   : > { %4301 = vmatmul.msk.bf16.gmra.mxu2 %vm383_vm0, %v816_v20  ;;  %1609 = vmatpush.bf16.msrb.mxu3 %v1582_v50  ;;  %v439_v50 = vld [vmem:[#allocation2 + $0x10] sm:$0xff] }
  0xce   : > { %1321 = vmatpush.bf16.xpose.msrb.mxu1 %v1303_v53 }
  0xd1   : > { %1610 = vmatpush.bf16.msrb.mxu3 %v1580_v43 }
  0xd2   : > { %v4972_v2 = vpop.f32.mrf.mxu0 }
  0xd3   : > { %v466_v11 = vsel %vm453_vm1, %v4972_v2, -inf }
  0xd4   : > { %v1746_v55 = vpop.permute.xlu1 %1745  ;;  %v1750_v61 = vpop.permute.xlu0 %1749  ;;  %467 = vmax.xlane.f32.xlu2 %v466_v11 }
  0xd5   : > { %v1772_v62 = vsel %vm383_vm0, %v1750_v61, 0  ;;  %v1766_v8 = vsel %vm383_vm0, %v1746_v55, 0 }
  0xda   : > { %v4979_v9 = vpop.f32.mrf.mxu0 }
  0xdb   : > { %v469_v12 = vsel %vm453_vm1, %v4979_v9, -inf }
  0xdc   : > { %v1752_v58 = vpop.permute.xlu1 %1751  ;;  %v2045_v7 = vpop.permute.xlu0 %2044  ;;  %470 = vmax.xlane.f32.xlu2 %v469_v12 }
  0xdd   : > { %4302 = vmatmul.msk.bf16.gmra.mxu2 %vm383_vm0, %v818_v23  ;;  %v1775_v59 = vsel %vm383_vm0, %v1752_v58, 0 }
  0xde   : > { %1781 = vmatpush.bf16.xpose.msrb.mxu0 %v1775_v59 }
  0xe2   : > { %v4982_v10 = vpop.f32.mrf.mxu0 }
  0xe3   : > { %v472_v15 = vsel %vm453_vm1, %v4982_v10, -inf }
  0xe4   : > { %v2047_v5 = vpop.permute.xlu1 %2046  ;;  %473 = vmax.xlane.f32.xlu0 %v472_v15  ;;  %v4996_v16 = vpop.permute.xlu0 %2204 }
  0xe5   : > { %2071 = vmatpush.bf16.msrb.mxu2 %v2047_v5 }
  0xe6   : > { %1782 = vmatpush.bf16.xpose.msrb.mxu0 %v1772_v62 }
  0xe9   : > { %2072 = vmatpush.bf16.msrb.mxu2 %v2045_v7 }
  0xea   : > { %v4988_v13 = vpop.f32.mrf.mxu0 }
  0xeb   : > { %v475_v14 = vsel %vm453_vm1, %v4988_v13, -inf }
  0xec   : > { %476 = vmax.xlane.f32.xlu1 %v475_v14  ;;  %v5002_v18 = vpop.permute.xlu0 %2210  ;;  %v5043_v39 = vpop.permute.xlu1 %2200 }
  0xed   : > { %2073 = vmatpush.bf16.msrb.mxu2 %v2043_v63 }
  0xee   : > { %1783 = vmatpush.bf16.xpose.msrb.mxu0 %v1769_v1 }
  0xf4   : > { %v5049_v46 = vpop.permute.xlu1 %2206 }
  0xf6   : > { %1784 = vmatpush.bf16.xpose.msrb.mxu0 %v1766_v8 }
  0xfc   : > { %v5051_v48 = vpop.permute.xlu1 %2212 }
  0xfd   : > { %4315 = vmatmul.msk.bf16.vlgmr.msrb.gmra.mxu0 %vm383_vm0, %v1738_v52 }
 0x10d   : > { %4316 = vmatmul.msk.bf16.gmra.mxu0 %vm383_vm0, %v1740_v51 }
 0x11d   : > { %4317 = vmatmul.msk.bf16.gmra.mxu0 %vm383_vm0, %v1742_v54  ;;  %v5058_v54 = vpop.permute.xlu2 %2202 }
 0x125   : > { %v5066_v59 = vpop.permute.xlu2 %2208 }
 0x127   : > { %v456_v22 = vpop.xlane.xlu0 %455 }
 0x128   : > { %v478_v23 = vmax.f32 %v437_v21, %v456_v22 }
 0x12a   : > { %v486_v24 = vsub.f32 %v437_v21, %v478_v23 }
 0x12c   : > { %v494_v26 = vmul.f32 1.442695, %v486_v24 }
 0x12d   : > { %4318 = vmatmul.msk.bf16.gmra.mxu0 %vm383_vm0, %v1744_v56  ;;  %v2215_v6 = vpop.permute.xlu2 %2214 }
 0x12e   : > { %4474 = vpow2.f32 %v494_v26 }
 0x12f   : > { %v459_v37 = vpop.xlane.xlu0 %458 }
 0x130   : > { %v5008_v19 = vpop.f32.mrf.mxu2  ;;  %v479_v41 = vmax.f32 %v438_v36, %v459_v37 }
 0x131   : > { %v896_v20 = vsel %vm453_vm1, %v5008_v19, -inf }
 0x132   : > { %897 = vmax.xlane.f32.xlu1 %v896_v20  ;;  %v487_v44 = vsub.f32 %v438_v36, %v479_v41  ;;  %v441_v20 = vld [vmem:[#allocation2 + $0x20] sm:$0xff] }
 0x134   : > { %v5030_v28 = vpop.eup %4474  ;;  %v496_v47 = vmul.f32 1.442695, %v487_v44 }
 0x136   : > { %4476 = vpow2.f32 %v496_v47 }
 0x137   : > { %v462_v51 = vpop.xlane.xlu1 %461 }
 0x138   : > { %v480_v52 = vmax.f32 %v439_v50, %v462_v51  ;;  %v5056_v53 = vpop.f32.mrf.mxu2 }
 0x139   : > { %v899_v56 = vsel %vm453_vm1, %v5056_v53, -inf }
 0x13a   : > { %v488_v58 = vsub.f32 %v439_v50, %v480_v52 }
 0x13c   : > { %v5053_v49 = vpop.eup %4476  ;;  %v498_v63 = vmul.f32 1.442695, %v488_v58 }
 0x13e   : > { %4478 = vpow2.f32 %v498_v63 }
 0x13f   : > { %v465_v5 = vpop.xlane.xlu1 %464 }
 0x140   : > { %v5060_v55 = vpop.f32.mrf.mxu2  ;;  %v481_v8 = vmax.f32 %v440_v4, %v465_v5 }
 0x141   : > { %v902_v57 = vsel %vm453_vm1, %v5060_v55, -inf }
 0x142   : > { %v489_v11 = vsub.f32 %v440_v4, %v481_v8 }
 0x144   : > { %v5076_v7 = vpop.eup %4478  ;;  %v500_v12 = vmul.f32 1.442695, %v489_v11  ;;  %v2238_v11 = vsel %vm383_vm0, %v2215_v6, 0  ;;  %v442_v6 = vld [vmem:[#allocation2 + $0x28] sm:$0xff] }
 0x146   : > { %4480 = vpow2.f32 %v500_v12 }
 0x147   : > { %v468_v14 = vpop.xlane.xlu2 %467 }
 0x148   : > { %v5070_v62 = vpop.f32.mrf.mxu2  ;;  %v482_v21 = vmax.f32 %v441_v20, %v468_v14 }
 0x149   : > { %v905_v3 = vsel %vm453_vm1, %v5070_v62, -inf }
 0x14b   : > { %624 = vperm.xlu1 %4423, %v5030_v28  }
 0x14c   : > { %v5079_v15 = vpop.eup %4480 }
 0x14f   : > { %v471_v17 = vpop.xlane.xlu2 %470 }
 0x150   : > { %v5095_v37 = vpop.f32.mrf.mxu2 }
 0x151   : > { %v908_v44 = vsel %vm453_vm1, %v5095_v37, -inf }
 0x157   : > { %v474_v25 = vpop.xlane.xlu0 %473 }
 0x17a   : > { %v5035_v29 = vpop.f32.mrf.mxu0 }
 0x17b   : > { %v1822_v30 = vsel %vm453_vm1, %v5035_v29, -inf }
 0x17c   : > { %1823 = vmax.xlane.f32.xlu2 %v1822_v30 }
 0x182   : > { %v5039_v33 = vpop.f32.mrf.mxu0 }
 0x183   : > { %v1825_v34 = vsel %vm453_vm1, %v5039_v33, -inf }
 0x184   : > { %1826 = vmax.xlane.f32.xlu0 %v1825_v34 }
 0x18a   : > { %v5045_v42 = vpop.f32.mrf.mxu0 }
 0x18b   : > { %v1828_v43 = vsel %vm453_vm1, %v5045_v42, -inf }
 0x18c   : > { %1829 = vmax.xlane.f32.xlu1 %v1828_v43 }
 0x192   : > { %v5068_v61 = vpop.f32.mrf.mxu0 }
 0x193   : > { %v1831_v1 = vsel %vm453_vm1, %v5068_v61, -inf }
 0x194   : > { %512 = vperm.xlu2 %4421, %v478_v23   ;;  %v5084_v23 = vpop.xlane.xlu1 %476 }
 0x198   : > { %517 = vperm.xlu0 %4422, %v479_v41  }
 0x19a   : > { %v5087_v26 = vpop.f32.mrf.mxu0 }
 0x19b   : > { %6942 = vst [vmem:[#allocation5_spill] sm:$0xff] %v5087_v26  ;;  %v1834_v34 = vsel %vm453_vm1, %v5087_v26, -inf }
 0x19c   : > { %629 = vperm.xlu2 %4421, %v5053_v49  }
 0x1a5   : > { %522 = vperm.xlu1 %4423, %v480_v52   ;;  %v5089_v30 = vpop.xlane.xlu1 %897  ;;  %v490_v52 = vsub.f32 %v441_v20, %v482_v21 }
 0x1bd   : > { %v5098_v43 = vpop.permute.xlu1 %624 }
 0x1c2   : > { %900 = vmax.xlane.f32.xlu0 %v899_v56 }
 0x1c5   : > { %903 = vmax.xlane.f32.xlu2 %v902_v57  ;;  %v5104_v57 = vpop.f32.mrf.mxu0 }
 0x1c6   : > { %6943 = vst [vmem:[#allocation6_spill] sm:$0xff] %v5104_v57  ;;  %v1837_v63 = vsel %vm453_vm1, %v5104_v57, -inf }
 0x1cd   : > { %1832 = vmax.xlane.f32.xlu2 %v1831_v1  ;;  %v5110_v1 = vpop.f32.mrf.mxu2  ;;  %v5123_v12 = vpop.f32.mrf.mxu0 }
 0x1ce   : > { %v911_v4 = vsel %vm453_vm1, %v5110_v1, -inf  ;;  %6944 = vst [vmem:[#allocation7_spill] sm:$0xff] %v5123_v12  ;;  %v1840_v20 = vsel %vm453_vm1, %v5123_v12, -inf }
 0x1cf   : > { %906 = vmax.xlane.f32.xlu1 %v905_v3 }
 0x1d6   : > { %634 = vperm.xlu0 %4422, %v5076_v7  }
 0x1e5   : > { %527 = vperm.xlu2 %4421, %v481_v8  }
 0x1e8   : > { %639 = vperm.xlu1 %4423, %v5079_v15  }
 0x1ed   : > { %532 = vperm.xlu2 %4421, %v482_v21   ;;  %v2235_v21 = vsel %vm383_vm0, %v5051_v48, 0 }
 0x1ef   : > { %v5082_v22 = vpop.xlane.xlu2 %1823 }
 0x1f7   : > { %v513_v24 = vpop.permute.xlu2 %512  ;;  %v5093_v36 = vpop.xlane.xlu0 %1826 }
 0x1f8   : > { %755 = vst.msk [vmem:[#allocation2] sm:$0xff] %vm383_vm0, %v513_v24  ;;  %v550_v41 = vsub.f32 %v4951_v40, %v513_v24  ;;  %v502_v40 = vmul.f32 1.442695, %v490_v52  ;;  %v2232_v24 = vsel %vm383_vm0, %v5002_v18, 0  ;;  %v5143_v18 = vpop.f32.mrf.mxu2 }
 0x1fa   : > { %v558_v47 = vmul.f32 1.442695, %v550_v41 }
 0x1fc   : > { %4482 = vpow2.f32 %v558_v47  ;;  %v2229_v47 = vsel %vm383_vm0, %v5066_v59, 0 }
 0x1ff   : > { %v5106_v58 = vpop.xlane.xlu1 %1829 }
 0x200   : > { %1835 = vmax.xlane.f32.xlu0 %v1834_v34  ;;  %v483_v34 = vmax.f32 %v442_v6, %v471_v17 }
 0x202   : > { %v5112_v3 = vpop.eup %4482  ;;  %v491_v41 = vsub.f32 %v442_v6, %v483_v34  ;;  %v5156_v6 = vpop.f32.mrf.mxu2 }
 0x208   : > { %909 = vmax.xlane.f32.xlu0 %v908_v44  ;;  %v5134_v44 = vpop.permute.xlu2 %629 }
 0x20a   : > { %v518_v50 = vpop.permute.xlu0 %517 }
 0x20b   : > { %v551_v51 = vsub.f32 %v4957_v45, %v518_v50  ;;  %756 = vst.msk [vmem:[#allocation2 + $0x8] sm:$0xff] %vm383_vm0, %v518_v50  ;;  %v443_v50 = vld [vmem:[#allocation2 + $0x30] sm:$0xff] }
 0x20c   : > { %v484_v52 = vmax.f32 %v443_v50, %v474_v25 }
 0x20d   : > { %v560_v56 = vmul.f32 1.442695, %v551_v51  ;;  %v504_v51 = vmul.f32 1.442695, %v491_v41 }
 0x20f   : > { %4484 = vpow2.f32 %v560_v56 }
 0x210   : > { %4486 = vpow2.f32 %v502_v40  ;;  %v5147_v40 = vpop.f32.mrf.mxu0 }
 0x211   : > { %4488 = vpow2.f32 %v504_v51  ;;  %6945 = vst [vmem:[#allocation8_spill] sm:$0xff] %v5147_v40  ;;  %v1843_v25 = vsel %vm453_vm1, %v5147_v40, -inf  ;;  %v914_v51 = vsel %vm453_vm1, %v5143_v18, -inf }
 0x212   : > { %1838 = vmax.xlane.f32.xlu1 %v1837_v63  ;;  %v880_v63 = vld [vmem:[#allocation2] sm:$0xff] }
 0x215   : > { %v5114_v45 = vpop.eup %4484 }
 0x216   : > { %912 = vmax.xlane.f32.xlu2 %v911_v4  ;;  %v670_v5 = vpack.c.bf16 %v5114_v45, %v5112_v3  ;;  %v5125_v14 = vpop.eup %4486  ;;  %v920_v4 = vmax.f32 %v880_v63, %v5089_v30  ;;  %v917_v30 = vsel %vm453_vm1, %v5156_v6, -inf }
 0x217   : > { %v523_v8 = vpop.permute.xlu1 %522  ;;  %v5140_v56 = vpop.eup %4488 }
 0x218   : > { %757 = vst.msk [vmem:[#allocation2 + $0x10] sm:$0xff] %vm383_vm0, %v523_v8  ;;  %4295 = vmatmul.msk.bf16.vlgmr.msra.gmra.mxu1 %vm453_vm1, %v670_v5  ;;  %v552_v59 = vsub.f32 %v4966_v60, %v523_v8  ;;  %v6922_v5 = vmov 4   ;;  %v444_v60 = vld [vmem:[#allocation2 + $0x38] sm:$0xff] }
 0x219   : > { %2244 = vmatpush.bf16.xpose.msra.mxu1 %v2238_v11  ;;  %v485_v8 = vmax.f32 %v444_v60, %v5084_v23 }
 0x21a   : > { %v562_v11 = vmul.f32 1.442695, %v552_v59 }
 0x21c   : > { %644 = vperm.xlu0 %4422, %v5125_v14   ;;  %4490 = vpow2.f32 %v562_v11  ;;  %v492_v11 = vsub.f32 %v443_v50, %v484_v52 }
 0x21e   : > { %1841 = vmax.xlane.f32.xlu2 %v1840_v20 }
 0x221   : > { %2245 = vmatpush.bf16.xpose.msra.mxu1 %v2235_v21 }
 0x222   : > { %v5162_v41 = vpop.eup %4490 }
 0x229   : > { %2246 = vmatpush.bf16.xpose.msra.mxu1 %v2232_v24 }
 0x22b   : > { %537 = vperm.xlu1 %4423, %v483_v34  }
 0x231   : > { %2247 = vmatpush.bf16.xpose.msra.mxu1 %v2229_v47  ;;  %v493_v47 = vsub.f32 %v444_v60, %v485_v8  ;;  %v928_v60 = vsub.f32 %v880_v63, %v920_v4 }
 0x236   : > { %542 = vperm.xlu2 %4421, %v484_v52  }
 0x238   : > { %v5138_v48 = vpop.xlane.xlu2 %903 }
 0x23e   : > { %649 = vperm.xlu2 %4421, %v5140_v56  }
 0x240   : > { %v5145_v17 = vpop.xlane.xlu2 %1832 }
 0x242   : > { %v907_v50 = vpop.xlane.xlu1 %906 }
 0x246   : > { %4424 = vset.pattern.permute.xlu2 %v6922_v5  ;;  %1844 = vmax.xlane.f32.xlu0 %v1843_v25  ;;  %v508_v25 = vmul.f32 1.442695, %v493_v47  ;;  %v881_v47 = vld [vmem:[#allocation2 + $0x8] sm:$0xff] }
 0x247   : > { %954 = vperm.xlu2 %4424, %v920_v4  }
 0x248   : > { %v528_v20 = vpop.permute.xlu2 %527 }
 0x249   : > { %v553_v21 = vsub.f32 %v4969_v0, %v528_v20  ;;  %758 = vst.msk [vmem:[#allocation2 + $0x18] sm:$0xff] %vm383_vm0, %v528_v20  ;;  %v506_v20 = vmul.f32 1.442695, %v492_v11  ;;  %v614_v11 = vld [vmem:[#allocation4] sm:$0xff] }
 0x24b   : > { %v564_v24 = vmul.f32 1.442695, %v553_v21  ;;  %v585_v21 = vsel %vm453_vm1, %v5114_v45, 0.0 }
 0x24d   : > { %4492 = vpow2.f32 %v564_v24 }
 0x24e   : > { %918 = vmax.xlane.f32.xlu0 %v917_v30  ;;  %4494 = vpow2.f32 %v508_v25  ;;  %v901_v30 = vpop.xlane.xlu0 %900 }
 0x24f   : > { %4496 = vpow2.f32 %v506_v20 }
 0x250   : > { %v533_v34 = vpop.permute.xlu2 %532  ;;  %v883_v25 = vld [vmem:[#allocation2 + $0x18] sm:$0xff] }
 0x251   : > { %759 = vst.msk [vmem:[#allocation2 + $0x20] sm:$0xff] %vm383_vm0, %v533_v34  ;;  %v923_v4 = vmax.f32 %v883_v25, %v907_v50 }
 0x253   : > { %v5164_v0 = vpop.eup %4492 }
 0x254   : > { %v671_v59 = vpack.c.bf16 %v5164_v0, %v5162_v41  ;;  %v5171_v23 = vpop.eup %4494 }
 0x255   : > { %915 = vmax.xlane.f32.xlu1 %v914_v51  ;;  %v5177_v24 = vpop.eup %4496  ;;  %v921_v51 = vmax.f32 %v881_v47, %v901_v30 }
 0x256   : > { %4296 = vmatmul.msk.bf16.gmra.mxu1 %vm453_vm1, %v671_v59  ;;  %v936_v59 = vmul.f32 1.442695, %v928_v60  ;;  %v662_v60 = vmul.f32 %v5098_v43, %v614_v11 }
 0x258   : > { %4498 = vpow2.f32 %v936_v59 }
 0x25a   : > { %v5188_v63 = vpop.permute.xlu1 %639 }
 0x25e   : > { %v5181_v52 = vpop.eup %4498 }
 0x262   : > { %659 = vperm.xlu0 %4422, %v5171_v23  }
 0x26a   : > { %4426 = vset.pattern.permute.xlu0 %v6922_v5 }
 0x26e   : > { %547 = vperm.xlu1 %4423, %v485_v8   ;;  %v582_v8 = vsel %vm453_vm1, %v5112_v3, 0.0  ;;  %v615_v3 = vld [vmem:[#allocation4 + $0x8] sm:$0xff] }
 0x26f   : > { %v663_v12 = vmul.f32 %v5134_v44, %v615_v3 }
 0x270   : > { %586 = vadd.xlane.f32.xlu2 %v585_v21  ;;  %v882_v21 = vld [vmem:[#allocation2 + $0x10] sm:$0xff] }
 0x271   : > { %v922_v30 = vmax.f32 %v882_v21, %v5138_v48 }
 0x273   : > { %v930_v40 = vsub.f32 %v882_v21, %v922_v30  ;;  %v635_v21 = vpop.permute.xlu0 %634 }
 0x275   : > { %v940_v43 = vmul.f32 1.442695, %v930_v40 }
 0x276   : > { %654 = vperm.xlu1 %4423, %v5177_v24  }
 0x277   : > { %4500 = vpow2.f32 %v940_v43 }
 0x27b   : > { %v5220_v3 = vpop.xlane.xlu0 %1835 }
 0x27e   : > { %4425 = vset.pattern.permute.xlu1 %v6922_v5 }
 0x27f   : > { %959 = vperm.xlu1 %4425, %v921_v51  }
 0x283   : > { %v910_v43 = vpop.xlane.xlu0 %909 }
 0x285   : > { %v5194_v59 = vpop.xlane.xlu1 %1838 }
 0x288   : > { %1066 = vperm.xlu2 %4424, %v5181_v52  }
 0x289   : > { %v5184_v45 = vpop.xlane.xlu2 %912 }
 0x28c   : > { %583 = vadd.xlane.f32.xlu0 %v582_v8  ;;  %v554_v8 = vsub.f32 %v4972_v2, %v533_v34  ;;  %v5208_v34 = vpop.eup %4500 }
 0x28e   : > { %v566_v11 = vmul.f32 1.442695, %v554_v8 }
 0x290   : > { %969 = vperm.xlu2 %4424, %v923_v4   ;;  %4502 = vpow2.f32 %v566_v11 }
 0x291   : > { %v5190_v20 = vpop.xlane.xlu2 %1841 }
 0x295   : > { %v719_v5 = vpop.f32.mrf.mxu1 }
 0x296   : > { %v739_v27 = vadd.f32 %v719_v5, %v662_v60  ;;  %v4503_v44 = vpop.eup %4502 }
 0x298   : > { %747 = vst.msk [vmem:[#allocation4] sm:$0xff] %vm383_vm0, %v739_v27 }
 0x299   : > { %v5198_v50 = vpop.permute.xlu2 %542 }
 0x29a   : > { %761 = vst.msk [vmem:[#allocation2 + $0x30] sm:$0xff] %vm383_vm0, %v5198_v50 }
 0x29d   : > { %v721_v48 = vpop.f32.mrf.mxu1  ;;  %v538_v57 = vpop.permute.xlu1 %537 }
 0x29e   : > { %v740_v26 = vadd.f32 %v721_v48, %v663_v12  ;;  %v555_v5 = vsub.f32 %v4979_v9, %v538_v57  ;;  %760 = vst.msk [vmem:[#allocation2 + $0x28] sm:$0xff] %vm383_vm0, %v538_v57  ;;  %v588_v9 = vsel %vm453_vm1, %v5162_v41, 0.0  ;;  %v929_v12 = vsub.f32 %v881_v47, %v921_v51  ;;  %v884_v48 = vld [vmem:[#allocation2 + $0x20] sm:$0xff]  ;;  %v616_v47 = vld [vmem:[#allocation4 + $0x10] sm:$0xff] }
 0x29f   : > { %v931_v41 = vsub.f32 %v883_v25, %v923_v4  ;;  %v617_v4 = vld [vmem:[#allocation4 + $0x18] sm:$0xff] }
 0x2a0   : > { %748 = vst.msk [vmem:[#allocation4 + $0x8] sm:$0xff] %vm383_vm0, %v740_v26  ;;  %v568_v2 = vmul.f32 1.442695, %v555_v5  ;;  %964 = vperm.xlu0 %4426, %v922_v30   ;;  %v938_v60 = vmul.f32 1.442695, %v929_v12  ;;  %v591_v30 = vsel %vm453_vm1, %v5164_v0, 0.0  ;;  %v924_v5 = vmax.f32 %v884_v48, %v910_v43 }
 0x2a1   : > { %v5206_v27 = vpop.permute.xlu2 %649  ;;  %v942_v11 = vmul.f32 1.442695, %v931_v41  ;;  %v594_v0 = vsel %vm453_vm1, %v4503_v44, 0.0  ;;  %v665_v41 = vmul.f32 %v5188_v63, %v617_v4 }
 0x2a2   : > { %4504 = vpow2.f32 %v568_v2  ;;  %v664_v2 = vmul.f32 %v635_v21, %v616_v47  ;;  %v932_v12 = vsub.f32 %v884_v48, %v924_v5 }
 0x2a3   : > { %4506 = vpow2.f32 %v938_v60 }
 0x2a4   : > { %4508 = vpow2.f32 %v942_v11  ;;  %v944_v43 = vmul.f32 1.442695, %v932_v12 }
 0x2a5   : > { %v885_v25 = vld [vmem:[#allocation2 + $0x28] sm:$0xff] }
 0x2a6   : > { %v925_v60 = vmax.f32 %v885_v25, %v5184_v45  ;;  %4510 = vpow2.f32 %v944_v43 }
 0x2a8   : > { %v5210_v40 = vpop.eup %4504  ;;  %1076 = vperm.xlu0 %4426, %v5208_v34  }
 0x2a9   : > { %v955_v57 = vpop.permute.xlu2 %954  ;;  %589 = vadd.xlane.f32.xlu1 %v588_v9  ;;  %v672_v26 = vpack.c.bf16 %v5210_v40, %v4503_v44  ;;  %v5222_v8 = vpop.eup %4506  ;;  %v556_v44 = vsub.f32 %v4982_v10, %v5198_v50 }
 0x2aa   : > { %1218 = vst.msk [vmem:[#allocation2] sm:$0xff] %vm1209_vm3, %v955_v57  ;;  %v5225_v51 = vpop.eup %4508  ;;  %v5242_v10 = vpop.permute.xlu0 %644  ;;  %v992_v4 = vsub.f32 %v5008_v19, %v955_v57 }
 0x2ab   : > { %4297 = vmatmul.msk.bf16.gmra.mxu1 %vm453_vm1, %v672_v26  ;;  %v570_v47 = vmul.f32 1.442695, %v556_v44 }
 0x2ac   : > { %v5239_v63 = vpop.eup %4510 }
 0x2ad   : > { %4512 = vpow2.f32 %v570_v47 }
 0x2b9   : > { %592 = vadd.xlane.f32.xlu2 %v591_v30  ;;  %v5250_v12 = vpop.xlane.xlu0 %1844 }
 0x2c1   : > { %v919_v19 = vpop.xlane.xlu0 %918 }
 0x2c2   : > { %1071 = vperm.xlu1 %4425, %v5222_v8  }
 0x2c8   : > { %v916_v30 = vpop.xlane.xlu1 %915 }
 0x2ca   : > { %974 = vperm.xlu1 %4425, %v924_v5   ;;  %v4513_v5 = vpop.eup %4512 }
 0x2d1   : > { %1081 = vperm.xlu2 %4424, %v5225_v51  }
 0x2d2   : > { %595 = vadd.xlane.f32.xlu0 %v594_v0 }
 0x2d3   : > { %v724_v9 = vpop.f32.mrf.mxu1 }
 0x2d4   : > { %v741_v26 = vadd.f32 %v724_v9, %v664_v2 }
 0x2d6   : > { %749 = vst.msk [vmem:[#allocation4 + $0x10] sm:$0xff] %vm383_vm0, %v741_v26 }
 0x2d9   : > { %979 = vperm.xlu2 %4424, %v925_v60  }
 0x2db   : > { %v726_v11 = vpop.f32.mrf.mxu1 }
 0x2dc   : > { %v742_v21 = vadd.f32 %v726_v11, %v665_v41  ;;  %v1000_v41 = vmul.f32 1.442695, %v992_v4 }
 0x2de   : > { %750 = vst.msk [vmem:[#allocation4 + $0x18] sm:$0xff] %vm383_vm0, %v742_v21  ;;  %v597_v21 = vsel %vm453_vm1, %v5210_v40, 0.0  ;;  %v600_v40 = vsel %vm453_vm1, %v4513_v5, 0.0 }
 0x2e0   : > { %v548_v0 = vpop.permute.xlu1 %547 }
 0x2e1   : > { %v557_v2 = vsub.f32 %v4988_v13, %v548_v0  ;;  %762 = vst.msk [vmem:[#allocation2 + $0x38] sm:$0xff] %vm383_vm0, %v548_v0 }
 0x2e3   : > { %v572_v45 = vmul.f32 1.442695, %v557_v2  ;;  %v5237_v48 = vpop.xlane.xlu2 %586  ;;  %v5267_v2 = vpop.permute.xlu0 %659 }
 0x2e5   : > { %4514 = vpow2.f32 %v572_v45  ;;  %v933_v45 = vsub.f32 %v885_v25, %v925_v60 }
 0x2e6   : > { %1086 = vperm.xlu0 %4426, %v5239_v63   ;;  %4516 = vpow2.f32 %v1000_v41 }
 0x2e7   : > { %v946_v4 = vmul.f32 1.442695, %v933_v45  ;;  %v6946_v45 = vmov 0  }
 0x2e8   : > { %v5244_v50 = vpop.permute.xlu1 %654 }
 0x2eb   : > { %v4515_v9 = vpop.eup %4514  ;;  %v5246_v26 = vpop.permute.xlu2 %1066 }
 0x2ec   : > { %v673_v13 = vpack.c.bf16 %v4515_v9, %v4513_v5  ;;  %v5257_v57 = vpop.eup %4516 }
 0x2ee   : > { %4298 = vmatmul.msk.bf16.gmra.mxu1 %vm453_vm1, %v673_v13  ;;  %v886_v13 = vld [vmem:[#allocation2 + $0x30] sm:$0xff] }
 0x2f1   : > { %v960_v43 = vpop.permute.xlu1 %959 }
 0x2f2   : > { %v993_v11 = vsub.f32 %v5056_v53, %v960_v43  ;;  %1219 = vst.msk [vmem:[#allocation2 + $0x8] sm:$0xff] %vm1209_vm3, %v960_v43  ;;  %v926_v43 = vmax.f32 %v886_v13, %v916_v30 }
 0x2f3   : > { %v970_v44 = vpop.permute.xlu2 %969 }
 0x2f4   : > { %v1002_v47 = vmul.f32 1.442695, %v993_v11  ;;  %1221 = vst.msk [vmem:[#allocation2 + $0x18] sm:$0xff] %vm1209_vm3, %v970_v44  ;;  %598 = vadd.xlane.f32.xlu1 %v597_v21  ;;  %v995_v11 = vsub.f32 %v5070_v62, %v970_v44  ;;  %v603_v21 = vsel %vm453_vm1, %v4515_v9, 0.0 }
 0x2f6   : > { %4518 = vpow2.f32 %v1002_v47  ;;  %v1006_v47 = vmul.f32 1.442695, %v995_v11  ;;  %v445_v11 = vld [vmem:[#allocation3] sm:$0xff] }
 0x2f7   : > { %4520 = vpow2.f32 %v946_v4 }
 0x2f8   : > { %4522 = vpow2.f32 %v1006_v47 }
 0x2fc   : > { %v5259_v0 = vpop.eup %4518 }
 0x2fd   : > { %v1112_v53 = vpack.c.bf16 %v5259_v0, %v5257_v57  ;;  %v5275_v60 = vpop.eup %4520 }
 0x2fe   : > { %4307 = vmatmul.msk.bf16.vlgmr.msrb.gmra.mxu1 %vm383_vm0, %v4942_v32  ;;  %v887_v32 = vld [vmem:[#allocation2 + $0x38] sm:$0xff]  ;;  %v5278_v9 = vpop.eup %4522 }
 0x2ff   : > { %4303 = vmatmul.msk.bf16.vlgmr.msra.gmra.mxu3 %vm453_vm1, %v1112_v53  ;;  %v584_v41 = vpop.xlane.xlu0 %583  ;;  %v927_v5 = vmax.f32 %v887_v32, %v919_v19 }
 0x301   : > { %v935_v62 = vsub.f32 %v887_v32, %v927_v5 }
 0x302   : > { %601 = vadd.xlane.f32.xlu2 %v600_v40  ;;  %v934_v40 = vsub.f32 %v886_v13, %v926_v43 }
 0x303   : > { %v950_v44 = vmul.f32 1.442695, %v935_v62 }
 0x30d   : > { %984 = vperm.xlu1 %4425, %v926_v43   ;;  %v618_v43 = vld [vmem:[#allocation4 + $0x20] sm:$0xff] }
 0x30e   : > { %4308 = vmatmul.msk.bf16.gmra.mxu1 %vm383_vm0, %v4940_v31  ;;  %v948_v31 = vmul.f32 1.442695, %v934_v40  ;;  %v666_v32 = vmul.f32 %v5242_v10, %v618_v43 }
 0x310   : > { %604 = vadd.xlane.f32.xlu0 %v603_v21  ;;  %v574_v21 = vmul.f32 %v5030_v28, %v445_v11 }
 0x312   : > { %v965_v53 = vpop.permute.xlu0 %964 }
 0x313   : > { %v994_v25 = vsub.f32 %v5060_v55, %v965_v53  ;;  %1220 = vst.msk [vmem:[#allocation2 + $0x10] sm:$0xff] %vm1209_vm3, %v965_v53  ;;  %v619_v53 = vld [vmem:[#allocation4 + $0x28] sm:$0xff] }
 0x314   : > { %v667_v10 = vmul.f32 %v5206_v27, %v619_v53  ;;  %v448_v53 = vld [vmem:[#allocation3 + $0x18] sm:$0xff] }
 0x315   : > { %v1004_v30 = vmul.f32 1.442695, %v994_v25  ;;  %1091 = vperm.xlu1 %4425, %v5275_v60  }
 0x317   : > { %4524 = vpow2.f32 %v1004_v30 }
 0x318   : > { %4526 = vpow2.f32 %v948_v31 }
 0x319   : > { %4528 = vpow2.f32 %v950_v44 }
 0x31a   : > { %989 = vperm.xlu2 %4424, %v927_v5  }
 0x31c   : > { %v590_v40 = vpop.xlane.xlu1 %589 }
 0x31d   : > { %v4525_v19 = vpop.eup %4524  ;;  %4428 = vset.pattern.permute.xlu1 %v6946_v45 }
 0x31e   : > { %4309 = vmatmul.msk.bf16.gmra.mxu1 %vm383_vm0, %v4949_v38  ;;  %v1113_v55 = vpack.c.bf16 %v5278_v9, %v4525_v19  ;;  %v5285_v13 = vpop.eup %4526  ;;  %v606_v38 = vadd.f32 %v584_v41, %v574_v21 }
 0x31f   : > { %v5288_v4 = vpop.eup %4528 }
 0x320   : > { %4304 = vmatmul.msk.bf16.gmra.mxu3 %vm453_vm1, %v1113_v55 }
 0x322   : > { %1096 = vperm.xlu2 %4424, %v5285_v13  }
 0x324   : > { %1101 = vperm.xlu0 %4426, %v5288_v4  }
 0x328   : > { %v729_v5 = vpop.f32.mrf.mxu1 }
 0x329   : > { %v743_v47 = vadd.f32 %v729_v5, %v666_v32 }
 0x32a   : > { %4427 = vset.pattern.permute.xlu2 %v6946_v45 }
 0x32b   : > { %751 = vst.msk [vmem:[#allocation4 + $0x20] sm:$0xff] %vm383_vm0, %v743_v47  ;;  %765 = vperm.xlu2 %4427, %v606_v38   ;;  %v447_v38 = vld [vmem:[#allocation3 + $0x10] sm:$0xff] }
 0x32c   : > { %v593_v25 = vpop.xlane.xlu2 %592  ;;  %4429 = vset.pattern.permute.xlu0 %v6946_v45  ;;  %v576_v47 = vmul.f32 %v5076_v7, %v447_v38  ;;  %v621_v7 = vld [vmem:[#allocation4 + $0x38] sm:$0xff] }
 0x32e   : > { %4310 = vmatmul.msk.bf16.gmra.mxu1 %vm383_vm0, %v4946_v35  ;;  %v1024_v35 = vsel %vm453_vm1, %v5257_v57, 0.0  ;;  %v1030_v57 = vsel %vm453_vm1, %v4525_v19, 0.0 }
 0x330   : > { %v731_v30 = vpop.f32.mrf.mxu1 }
 0x331   : > { %v744_v28 = vadd.f32 %v731_v30, %v667_v10  ;;  %v577_v10 = vmul.f32 %v5079_v15, %v448_v53 }
 0x333   : > { %752 = vst.msk [vmem:[#allocation4 + $0x28] sm:$0xff] %vm383_vm0, %v744_v28  ;;  %v609_v30 = vadd.f32 %v593_v25, %v577_v10  ;;  %v6947_v10 = vmov 4  }
 0x334   : > { %v5300_v41 = vpop.permute.xlu2 %1081  ;;  %v5302_v62 = vpop.permute.xlu1 %1071 }
 0x33c   : > { %v980_v31 = vpop.permute.xlu2 %979  ;;  %v975_v44 = vpop.permute.xlu1 %974 }
 0x33d   : > { %v997_v55 = vsub.f32 %v5110_v1, %v980_v31  ;;  %1223 = vst.msk [vmem:[#allocation2 + $0x28] sm:$0xff] %vm1209_vm3, %v980_v31  ;;  %v996_v45 = vsub.f32 %v5095_v37, %v975_v44  ;;  %v1027_v37 = vsel %vm453_vm1, %v5259_v0, 0.0  ;;  %v608_v0 = vadd.f32 %v590_v40, %v576_v47 }
 0x33e   : > { %1222 = vst.msk [vmem:[#allocation2 + $0x20] sm:$0xff] %vm1209_vm3, %v975_v44  ;;  %4323 = vmatmul.msk.bf16.vlgmr.msra.gmra.mxu1 %vm383_vm0, %v5043_v39  ;;  %v446_v39 = vld [vmem:[#allocation3 + $0x8] sm:$0xff] }
 0x33f   : > { %v1010_v27 = vmul.f32 1.442695, %v997_v55  ;;  %v1008_v43 = vmul.f32 1.442695, %v996_v45  ;;  %1025 = vadd.xlane.f32.xlu1 %v1024_v35  ;;  %v575_v21 = vmul.f32 %v5053_v49, %v446_v39 }
 0x341   : > { %4530 = vpow2.f32 %v1010_v27  ;;  %v607_v5 = vadd.f32 %v5237_v48, %v575_v21 }
 0x342   : > { %4532 = vpow2.f32 %v1008_v43 }
 0x347   : > { %v4531_v11 = vpop.eup %4530 }
 0x348   : > { %v4533_v32 = vpop.eup %4532  ;;  %v1039_v39 = vsel %vm453_vm1, %v4531_v11, 0.0 }
 0x349   : > { %v1114_v1 = vpack.c.bf16 %v4531_v11, %v4533_v32 }
 0x34b   : > { %4305 = vmatmul.msk.bf16.gmra.mxu3 %vm453_vm1, %v1114_v1 }
 0x34e   : > { %4324 = vmatmul.msk.bf16.gmra.mxu1 %vm383_vm0, %v5058_v54  ;;  %1028 = vadd.xlane.f32.xlu0 %v1027_v37  ;;  %v620_v54 = vld [vmem:[#allocation4 + $0x30] sm:$0xff] }
 0x34f   : > { %v668_v19 = vmul.f32 %v5244_v50, %v620_v54  ;;  %v451_v54 = vld [vmem:[#allocation3 + $0x30] sm:$0xff] }
 0x350   : > { %v580_v11 = vmul.f32 %v5177_v24, %v451_v54 }
 0x354   : > { %1031 = vadd.xlane.f32.xlu2 %v1030_v57 }
 0x358   : > { %770 = vperm.xlu1 %4428, %v607_v5  }
 0x35e   : > { %4325 = vmatmul.msk.bf16.gmra.mxu1 %vm383_vm0, %v4996_v16  ;;  %v669_v16 = vmul.f32 %v5267_v2, %v621_v7 }
 0x362   : > { %775 = vperm.xlu0 %4429, %v608_v0  }
 0x367   : > { %v599_v15 = vpop.xlane.xlu1 %598 }
 0x36b   : > { %v734_v49 = vpop.f32.mrf.mxu1 }
 0x36c   : > { %v745_v28 = vadd.f32 %v734_v49, %v668_v19  ;;  %780 = vperm.xlu2 %4427, %v609_v30  }
 0x36e   : > { %753 = vst.msk [vmem:[#allocation4 + $0x30] sm:$0xff] %vm383_vm0, %v745_v28  ;;  %4326 = vmatmul.msk.bf16.gmra.mxu1 %vm383_vm0, %v5049_v46  ;;  %v1033_v46 = vsel %vm453_vm1, %v5278_v9, 0.0  ;;  %v449_v9 = vld [vmem:[#allocation3 + $0x20] sm:$0xff] }
 0x36f   : > { %v578_v21 = vmul.f32 %v5125_v14, %v449_v9 }
 0x373   : > { %v736_v48 = vpop.f32.mrf.mxu1 }
 0x374   : > { %v746_v40 = vadd.f32 %v736_v48, %v669_v16 }
 0x375   : > { %v602_v31 = vpop.xlane.xlu2 %601 }
 0x376   : > { %754 = vst.msk [vmem:[#allocation4 + $0x38] sm:$0xff] %vm383_vm0, %v746_v40  ;;  %v612_v19 = vadd.f32 %v602_v31, %v580_v11 }
 0x37b   : > { %v5345_v5 = vpop.f32.mrf.mxu1 }
 0x37d   : > { %v990_v44 = vpop.permute.xlu2 %989 }
 0x37e   : > { %v999_v50 = vsub.f32 %v5156_v6, %v990_v44  ;;  %1225 = vst.msk [vmem:[#allocation2 + $0x38] sm:$0xff] %vm1209_vm3, %v990_v44  ;;  %v1036_v6 = vsel %vm453_vm1, %v4533_v32, 0.0  ;;  %v450_v32 = vld [vmem:[#allocation3 + $0x28] sm:$0xff] }
 0x37f   : > { %v985_v25 = vpop.permute.xlu1 %984  ;;  %v579_v47 = vmul.f32 %v5140_v56, %v450_v32 }
 0x380   : > { %v1014_v55 = vmul.f32 1.442695, %v999_v50  ;;  %v998_v45 = vsub.f32 %v5143_v18, %v985_v25  ;;  %1224 = vst.msk [vmem:[#allocation2 + $0x30] sm:$0xff] %vm1209_vm3, %v985_v25  ;;  %v5340_v18 = vpop.permute.xlu0 %1076 }
 0x381   : > { %v611_v0 = vadd.f32 %v599_v15, %v579_v47 }
 0x382   : > { %v1012_v2 = vmul.f32 1.442695, %v998_v45  ;;  %1034 = vadd.xlane.f32.xlu1 %v1033_v46  ;;  %4534 = vpow2.f32 %v1014_v55  ;;  %v1149_v54 = vpop.f32.mrf.mxu3 }
 0x383   : > { %v5348_v53 = vpop.f32.mrf.mxu1 }
 0x384   : > { %4536 = vpow2.f32 %v1012_v2  ;;  %v1362_v55 = vsel %vm453_vm1, %v5348_v53, -inf  ;;  %v1359_v2 = vsel %vm453_vm1, %v5345_v5, -inf }
 0x385   : > { %v5336_v35 = vpop.permute.xlu2 %1096 }
 0x387   : > { %v5359_v56 = vpop.permute.xlu1 %1091 }
 0x388   : > { %v4535_v27 = vpop.eup %4534  ;;  %v596_v57 = vpop.xlane.xlu0 %595 }
 0x389   : > { %v610_v38 = vadd.f32 %v596_v57, %v578_v21  ;;  %v1045_v31 = vsel %vm453_vm1, %v4535_v27, 0.0 }
 0x38a   : > { %v4537_v43 = vpop.eup %4536 }
 0x38b   : > { %v1115_v1 = vpack.c.bf16 %v4535_v27, %v4537_v43  ;;  %v5352_v30 = vpop.f32.mrf.mxu1  ;;  %v1042_v24 = vsel %vm453_vm1, %v4537_v43, 0.0  ;;  %v452_v27 = vld [vmem:[#allocation3 + $0x38] sm:$0xff] }
 0x38c   : > { %1037 = vadd.xlane.f32.xlu0 %v1036_v6  ;;  %v581_v6 = vmul.f32 %v5171_v23, %v452_v27 }
 0x38d   : > { %v766_v37 = vpop.permute.xlu2 %765  ;;  %4306 = vmatmul.msk.bf16.gmra.mxu3 %vm453_vm1, %v1115_v1 }
 0x38e   : > { %803 = vst.msk [vmem:[#allocation3] sm:$0xff] %vm383_vm0, %v766_v37 }
 0x390   : > { %v5354_v14 = vpop.permute.xlu0 %1086 }
 0x393   : > { %v5357_v49 = vpop.f32.mrf.mxu1 }
 0x394   : > { %v1368_v37 = vsel %vm453_vm1, %v5357_v49, -inf }
 0x395   : > { %1040 = vadd.xlane.f32.xlu2 %v1039_v39 }
 0x398   : > { %v605_v28 = vpop.xlane.xlu0 %604 }
 0x399   : > { %v613_v1 = vadd.f32 %v605_v28, %v581_v6 }
 0x39b   : > { %785 = vperm.xlu1 %4428, %v610_v38   ;;  %v5361_v7 = vpop.f32.mrf.mxu1 }
 0x39c   : > { %v1371_v43 = vsel %vm453_vm1, %v5361_v7, -inf }
 0x3a0   : > { %790 = vperm.xlu0 %4429, %v611_v0   ;;  %v5365_v48 = vpop.permute.xlu0 %1101 }
 0x3a3   : > { %v5369_v15 = vpop.f32.mrf.mxu1 }
 0x3a8   : > { %4432 = vset.pattern.permute.xlu0 %v6947_v10 }
 0x3ab   : > { %v5375_v45 = vpop.f32.mrf.mxu1 }
 0x3ac   : > { %v1377_v57 = vsel %vm453_vm1, %v5375_v45, -inf }
 0x3ad   : > { %795 = vperm.xlu2 %4427, %v612_v19   ;;  %v1365_v19 = vsel %vm453_vm1, %v5352_v30, -inf }
 0x3b2   : > { %v5363_v16 = vpop.xlane.xlu1 %1025 }
 0x3b3   : > { %v5385_v9 = vpop.f32.mrf.mxu1 }
 0x3b4   : > { %v1380_v39 = vsel %vm453_vm1, %v5385_v9, -inf }
 0x3b5   : > { %4431 = vset.pattern.permute.xlu2 %v6947_v10 }
 0x3c1   : > { %v1029_v50 = vpop.xlane.xlu0 %1028 }
 0x3c5   : > { %1043 = vadd.xlane.f32.xlu1 %v1042_v24 }
 0x3c7   : > { %v1032_v40 = vpop.xlane.xlu2 %1031 }
 0x3ca   : > { %1046 = vadd.xlane.f32.xlu0 %v1045_v31  ;;  %v771_v44 = vpop.permute.xlu1 %770 }
 0x3cb   : > { %804 = vst.msk [vmem:[#allocation3 + $0x8] sm:$0xff] %vm383_vm0, %v771_v44 }
 0x3cf   : > { %v781_v25 = vpop.permute.xlu2 %780 }
 0x3d0   : > { %806 = vst.msk [vmem:[#allocation3 + $0x18] sm:$0xff] %vm383_vm0, %v781_v25  ;;  %v5403_v25 = vpop.f32.mrf.mxu1 }
 0x3d2   : > { %1363 = vmax.xlane.f32.xlu0 %v1362_v55  ;;  %v889_v32 = vld [vmem:[#allocation3 + $0x8] sm:$0xff]  ;;  %v2285_v55 = vsel %vm453_vm1, %v5403_v25, -inf }
 0x3d3   : > { %v1017_v47 = vmul.f32 %v5222_v8, %v889_v32 }
 0x3d4   : > { %v776_v46 = vpop.permute.xlu0 %775 }
 0x3d5   : > { %805 = vst.msk [vmem:[#allocation3 + $0x10] sm:$0xff] %vm383_vm0, %v776_v46  ;;  %v1049_v0 = vadd.f32 %v1029_v50, %v1017_v47  ;;  %v888_v46 = vld [vmem:[#allocation3] sm:$0xff] }
 0x3d6   : > { %1360 = vmax.xlane.f32.xlu2 %v1359_v2  ;;  %v1016_v2 = vmul.f32 %v5181_v52, %v888_v46 }
 0x3d8   : > { %v1048_v27 = vadd.f32 %v5363_v16, %v1016_v2 }
 0x3da   : > { %1372 = vmax.xlane.f32.xlu0 %v1371_v43  ;;  %v891_v43 = vld [vmem:[#allocation3 + $0x18] sm:$0xff] }
 0x3db   : > { %v1019_v6 = vmul.f32 %v5225_v51, %v891_v43 }
 0x3dc   : > { %v890_v23 = vld [vmem:[#allocation3 + $0x10] sm:$0xff] }
 0x3dd   : > { %v1018_v21 = vmul.f32 %v5208_v34, %v890_v23  ;;  %v1374_v34 = vsel %vm453_vm1, %v5369_v15, -inf }
 0x3de   : > { %1369 = vmax.xlane.f32.xlu2 %v1368_v37  ;;  %800 = vperm.xlu1 %4428, %v613_v1  }
 0x3df   : > { %v1050_v38 = vadd.f32 %v1032_v40, %v1018_v21 }
 0x3e2   : > { %1381 = vmax.xlane.f32.xlu0 %v1380_v39  ;;  %v5411_v39 = vpop.f32.mrf.mxu1 }
 0x3e6   : > { %1378 = vmax.xlane.f32.xlu2 %v1377_v57  ;;  %4430 = vset.pattern.permute.xlu1 %v6947_v10 }
 0x3ea   : > { %v5414_v21 = vpop.f32.mrf.mxu1 }
 0x3eb   : > { %v2291_v16 = vsel %vm453_vm1, %v5414_v21, -inf }
 0x3f5   : > { %v1035_v11 = vpop.xlane.xlu1 %1034 }
 0x3f6   : > { %1238 = vperm.xlu0 %4432, %v1050_v38   ;;  %v1051_v1 = vadd.f32 %v1035_v11, %v1019_v6 }
 0x3fe   : > { %1233 = vperm.xlu2 %4431, %v1049_v0  }
 0x3ff   : > { %v1038_v10 = vpop.xlane.xlu0 %1037 }
 0x406   : > { %1177 = vrot.lane.b32.xlu2 %v1149_v54, %s4800_s30 }
 0x408   : > { %v1041_v28 = vpop.xlane.xlu2 %1040  ;;  %1366 = vmax.xlane.f32.xlu1 %v1365_v19 }
 0x40d   : > { %v786_v24 = vpop.permute.xlu1 %785 }
 0x40e   : > { %807 = vst.msk [vmem:[#allocation3 + $0x20] sm:$0xff] %vm383_vm0, %v786_v24 }
 0x410   : > { %v796_v8 = vpop.permute.xlu2 %795  ;;  %1375 = vmax.xlane.f32.xlu1 %v1374_v34 }
 0x411   : > { %809 = vst.msk [vmem:[#allocation3 + $0x30] sm:$0xff] %vm383_vm0, %v796_v8 }
 0x412   : > { %v791_v40 = vpop.permute.xlu0 %790 }
 0x413   : > { %808 = vst.msk [vmem:[#allocation3 + $0x28] sm:$0xff] %vm383_vm0, %v791_v40 }
 0x415   : > { %v892_v31 = vld [vmem:[#allocation3 + $0x20] sm:$0xff] }
 0x416   : > { %v1020_v44 = vmul.f32 %v5239_v63, %v892_v31  ;;  %v1151_v63 = vpop.f32.mrf.mxu3  ;;  %v5433_v31 = vpop.f32.mrf.mxu1 }
 0x418   : > { %v1052_v50 = vadd.f32 %v1038_v10, %v1020_v44  ;;  %v2294_v44 = vsel %vm453_vm1, %v5433_v31, -inf  ;;  %v894_v43 = vld [vmem:[#allocation3 + $0x30] sm:$0xff] }
 0x419   : > { %v1022_v6 = vmul.f32 %v5285_v13, %v894_v43  ;;  %v1346_v43 = vld [vmem:[#allocation2 + $0x18] sm:$0xff] }
 0x41a   : > { %1248 = vperm.xlu2 %4431, %v1052_v50   ;;  %v893_v37 = vld [vmem:[#allocation3 + $0x28] sm:$0xff]  ;;  %v1056_v50 = vld [vmem:[#allocation4] sm:$0xff] }
 0x41b   : > { %v1021_v57 = vmul.f32 %v5275_v60, %v893_v37 }
 0x41d   : > { %v1053_v23 = vadd.f32 %v1041_v28, %v1021_v57  ;;  %v2288_v28 = vsel %vm453_vm1, %v5411_v39, -inf }
 0x41e   : > { %v1154_v47 = vpop.f32.mrf.mxu3 }
 0x420   : > { %2286 = vmax.xlane.f32.xlu0 %v2285_v55  ;;  %v1104_v55 = vmul.f32 %v5246_v26, %v1056_v50  ;;  %v5445_v26 = vpop.f32.mrf.mxu1 }
 0x426   : > { %v1156_v19 = vpop.f32.mrf.mxu3 }
 0x428   : > { %v5447_v37 = vpop.f32.mrf.mxu1 }
 0x429   : > { %1228 = vperm.xlu1 %4430, %v1048_v27  }
 0x431   : > { %1243 = vperm.xlu1 %4430, %v1051_v1   ;;  %v1159_v1 = vpop.f32.mrf.mxu3 }
 0x434   : > { %1179 = vrot.lane.b32.xlu0 %v1151_v63, %s4800_s30 }
 0x438   : > { %v1044_v51 = vpop.xlane.xlu1 %1043 }
 0x439   : > { %v1054_v63 = vadd.f32 %v1044_v51, %v1022_v6 }
 0x43c   : > { %1253 = vperm.xlu0 %4432, %v1053_v23   ;;  %v6932_v23 = vmov 8  }
 0x43d   : > { %v1047_v52 = vpop.xlane.xlu0 %1046 }
 0x443   : > { %2292 = vmax.xlane.f32.xlu2 %v2291_v16  ;;  %v1161_v16 = vpop.f32.mrf.mxu3 }
 0x444   : > { %4435 = vset.pattern.permute.xlu0 %v6932_v23 }
 0x445   : > { %v5418_v32 = vpop.xlane.xlu0 %1363 }
 0x449   : > { %v1361_v38 = vpop.xlane.xlu2 %1360 }
 0x44d   : > { %v5423_v60 = vpop.xlane.xlu0 %1372 }
 0x450   : > { %v801_v0 = vpop.permute.xlu1 %800 }
 0x451   : > { %810 = vst.msk [vmem:[#allocation3 + $0x38] sm:$0xff] %vm383_vm0, %v801_v0  ;;  %v5421_v54 = vpop.xlane.xlu2 %1369  ;;  %v5459_v0 = vpop.f32.mrf.mxu1 }
 0x452   : > { %v1386_v6 = vmax.f32 %v1346_v43, %v5421_v54 }
 0x455   : > { %v5431_v34 = vpop.xlane.xlu0 %1381 }
 0x458   : > { %v895_v10 = vld [vmem:[#allocation3 + $0x38] sm:$0xff] }
 0x459   : > { %v5425_v11 = vpop.xlane.xlu2 %1378  ;;  %v1023_v24 = vmul.f32 %v5288_v4, %v895_v10  ;;  %v1164_v10 = vpop.f32.mrf.mxu3 }
 0x45b   : > { %2289 = vmax.xlane.f32.xlu1 %v2288_v28  ;;  %1183 = vrot.lane.b32.xlu2 %v1156_v19, %s4800_s30  ;;  %v1055_v40 = vadd.f32 %v1047_v52, %v1023_v24  ;;  %v2300_v52 = vsel %vm453_vm1, %v5447_v37, -inf  ;;  %v1343_v19 = vld [vmem:[#allocation2] sm:$0xff] }
 0x45c   : > { %v1383_v28 = vmax.f32 %v1343_v19, %v1361_v38 }
 0x45e   : > { %v1391_v50 = vsub.f32 %v1343_v19, %v1383_v28 }
 0x461   : > { %v1234_v8 = vpop.permute.xlu2 %1233 }
 0x462   : > { %1267 = vst.msk [vmem:[#allocation3 + $0x8] sm:$0xff] %vm1209_vm3, %v1234_v8  ;;  %v2303_v8 = vsel %vm453_vm1, %v5459_v0, -inf }
 0x463   : > { %1263 = vperm.xlu2 %4431, %v1055_v40   ;;  %v1057_v40 = vld [vmem:[#allocation4 + $0x8] sm:$0xff] }
 0x466   : > { %2295 = vmax.xlane.f32.xlu0 %v2294_v44  ;;  %v1105_v44 = vmul.f32 %v5302_v62, %v1057_v40  ;;  %v1347_v40 = vld [vmem:[#allocation2 + $0x20] sm:$0xff] }
 0x467   : > { %v5486_v54 = vmax.f32 %v1347_v40, %v5423_v60 }
 0x468   : > { %v1239_v46 = vpop.permute.xlu0 %1238 }
 0x469   : > { %1268 = vst.msk [vmem:[#allocation3 + $0x10] sm:$0xff] %vm1209_vm3, %v1239_v46  ;;  %v1178_v4 = vpop.permute.xlu2 %1177 }
 0x46a   : > { %v1201_v2 = vadd.f32 %v1178_v4, %v1104_v55  ;;  %v2297_v55 = vsel %vm453_vm1, %v5445_v26, -inf  ;;  %v5468_v4 = vld [vmem:[#allocation2 + $0x8] sm:$0xff] }
 0x46b   : > { %4434 = vset.pattern.permute.xlu2 %v6932_v23 }
 0x46c   : > { %1210 = vst.msk [vmem:[#allocation4] sm:$0xff] %vm1209_vm3, %v1201_v2  ;;  %v1399_v2 = vmul.f32 1.442695, %v1391_v50 }
 0x46e   : > { %4538 = vpow2.f32 %v1399_v2  ;;  %v1350_v2 = vld [vmem:[#allocation2 + $0x38] sm:$0xff] }
 0x46f   : > { %v1390_v60 = vmax.f32 %v1350_v2, %v5431_v34 }
 0x474   : > { %1181 = vrot.lane.b32.xlu1 %v1154_v47, %s4800_s30  ;;  %v1249_v27 = vpop.permute.xlu2 %1248 }
 0x475   : > { %1270 = vst.msk [vmem:[#allocation3 + $0x20] sm:$0xff] %vm1209_vm3, %v1249_v27  ;;  %v5473_v27 = vmax.f32 %v5468_v4, %v5418_v32  ;;  %v1166_v32 = vpop.f32.mrf.mxu3 }
 0x47a   : > { %1185 = vrot.lane.b32.xlu0 %v1159_v1, %s4800_s30  ;;  %v5478_v1 = vpop.eup %4538 }
 0x47b   : > { %v1367_v57 = vpop.xlane.xlu1 %1366 }
 0x47c   : > { %1258 = vperm.xlu1 %4430, %v1054_v63   ;;  %v1345_v63 = vld [vmem:[#allocation2 + $0x10] sm:$0xff] }
 0x483   : > { %v5454_v13 = vpop.xlane.xlu1 %1375 }
 0x484   : > { %4433 = vset.pattern.permute.xlu1 %v6932_v23 }
 0x48c   : > { %2301 = vmax.xlane.f32.xlu2 %v2300_v52  ;;  %v1394_v52 = vsub.f32 %v1346_v43, %v1386_v6 }
 0x493   : > { %v5457_v47 = vpop.xlane.xlu0 %2286 }
 0x49b   : > { %v1229_v51 = vpop.permute.xlu1 %1228 }
 0x49c   : > { %1266 = vst.msk [vmem:[#allocation3] sm:$0xff] %vm1209_vm3, %v1229_v51  ;;  %v1385_v51 = vmax.f32 %v1345_v63, %v1367_v57  ;;  %v1395_v57 = vsub.f32 %v1347_v40, %v5486_v54 }
 0x4a3   : > { %v1244_v24 = vpop.permute.xlu1 %1243 }
 0x4a4   : > { %1269 = vst.msk [vmem:[#allocation3 + $0x18] sm:$0xff] %vm1209_vm3, %v1244_v24  ;;  %2304 = vmax.xlane.f32.xlu0 %v2303_v8  ;;  %1189 = vrot.lane.b32.xlu2 %v1164_v10, %s4800_s30  ;;  %v1405_v10 = vmul.f32 1.442695, %v1394_v52  ;;  %v1393_v24 = vsub.f32 %v1345_v63, %v1385_v51  ;;  %v1059_v8 = vld [vmem:[#allocation4 + $0x18] sm:$0xff]  ;;  %v1348_v52 = vld [vmem:[#allocation2 + $0x28] sm:$0xff] }
 0x4a6   : > { %v1180_v46 = vpop.permute.xlu0 %1179  ;;  %2298 = vmax.xlane.f32.xlu1 %v2297_v55  ;;  %4540 = vpow2.f32 %v1405_v10  ;;  %v1403_v50 = vmul.f32 1.442695, %v1393_v24 }
 0x4a7   : > { %v1202_v38 = vadd.f32 %v1180_v46, %v1105_v44  ;;  %v1107_v44 = vmul.f32 %v5300_v41, %v1059_v8  ;;  %v1407_v41 = vmul.f32 1.442695, %v1395_v57 }
 0x4a8   : > { %4542 = vpow2.f32 %v1403_v50 }
 0x4a9   : > { %1211 = vst.msk [vmem:[#allocation4 + $0x8] sm:$0xff] %vm1209_vm3, %v1202_v38  ;;  %4544 = vpow2.f32 %v1407_v41  ;;  %v5517_v41 = vpop.f32.mrf.mxu1 }
 0x4ac   : > { %1422 = vperm.xlu2 %4434, %v5473_v27   ;;  %v5491_v38 = vpop.eup %4540 }
 0x4ae   : > { %v1254_v62 = vpop.permute.xlu0 %1253  ;;  %v5495_v43 = vpop.eup %4542 }
 0x4af   : > { %1271 = vst.msk [vmem:[#allocation3 + $0x28] sm:$0xff] %vm1209_vm3, %v1254_v62  ;;  %v5501_v34 = vpop.eup %4544 }
 0x4b4   : > { %1529 = vperm.xlu2 %4434, %v5478_v1  }
 0x4b6   : > { %v5481_v19 = vpop.xlane.xlu2 %2292 }
 0x4b8   : > { %1191 = vrot.lane.b32.xlu0 %v1166_v32, %s4800_s30 }
 0x4bc   : > { %1432 = vperm.xlu2 %4434, %v1386_v6   ;;  %v1398_v6 = vsub.f32 %v1350_v2, %v1390_v60 }
 0x4be   : > { %v1184_v55 = vpop.permute.xlu2 %1183  ;;  %v1413_v32 = vmul.f32 1.442695, %v1398_v6 }
 0x4bf   : > { %v1204_v46 = vadd.f32 %v1184_v55, %v1107_v44  ;;  %1187 = vrot.lane.b32.xlu1 %v1161_v16, %s4800_s30  ;;  %v1349_v16 = vld [vmem:[#allocation2 + $0x30] sm:$0xff] }
 0x4c0   : > { %1427 = vperm.xlu0 %4435, %v1385_v51   ;;  %v1389_v63 = vmax.f32 %v1349_v16, %v5425_v11  ;;  %v1388_v51 = vmax.f32 %v1348_v52, %v5454_v13  ;;  %4546 = vpow2.f32 %v1413_v32  ;;  %v1058_v13 = vld [vmem:[#allocation4 + $0x10] sm:$0xff] }
 0x4c1   : > { %1213 = vst.msk [vmem:[#allocation4 + $0x18] sm:$0xff] %vm1209_vm3, %v1204_v46  ;;  %v1106_v44 = vmul.f32 %v5340_v18, %v1058_v13  ;;  %v1060_v46 = vld [vmem:[#allocation4 + $0x20] sm:$0xff]  ;;  %v6930_v18 = vmov 12  }
 0x4c2   : > { %v1397_v10 = vsub.f32 %v1349_v16, %v1389_v63  ;;  %v1108_v57 = vmul.f32 %v5354_v14, %v1060_v46  ;;  %v2306_v16 = vsel %vm453_vm1, %v5517_v41, -inf  ;;  %v1392_v14 = vsub.f32 %v5468_v4, %v5473_v27 }
 0x4c3   : > { %v1396_v27 = vsub.f32 %v1348_v52, %v1388_v51 }
 0x4c4   : > { %1544 = vperm.xlu2 %4434, %v5491_v38   ;;  %v1411_v24 = vmul.f32 1.442695, %v1397_v10  ;;  %v1401_v6 = vmul.f32 1.442695, %v1392_v14  ;;  %v1062_v10 = vld [vmem:[#allocation4 + $0x30] sm:$0xff] }
 0x4c6   : > { %v1264_v62 = vpop.permute.xlu2 %1263  ;;  %4548 = vpow2.f32 %v1411_v24  ;;  %v1110_v24 = vmul.f32 %v5336_v35, %v1062_v10  ;;  %v1409_v35 = vmul.f32 1.442695, %v1396_v27 }
 0x4c7   : > { %1273 = vst.msk [vmem:[#allocation3 + $0x38] sm:$0xff] %vm1209_vm3, %v1264_v62  ;;  %1417 = vperm.xlu1 %4433, %v1383_v28   ;;  %v5504_v28 = vpop.eup %4546  ;;  %4550 = vpow2.f32 %v1401_v6 }
 0x4c8   : > { %1539 = vperm.xlu0 %4435, %v5495_v43  }
 0x4cc   : > { %1442 = vperm.xlu2 %4434, %v1388_v51   ;;  %v5507_v8 = vpop.eup %4548  ;;  %v1063_v51 = vld [vmem:[#allocation4 + $0x38] sm:$0xff] }
 0x4ce   : > { %v5510_v11 = vpop.xlane.xlu1 %2289 }
 0x4d0   : > { %1549 = vperm.xlu0 %4435, %v5501_v34  }
 0x4d4   : > { %1452 = vperm.xlu2 %4434, %v1390_v60  }
 0x4d8   : > { %1564 = vperm.xlu0 %4435, %v5504_v28  }
 0x4d9   : > { %v5512_v40 = vpop.xlane.xlu0 %2295 }
 0x4dc   : > { %1559 = vperm.xlu2 %4434, %v5507_v8  }
 0x4e0   : > { %4438 = vset.pattern.permute.xlu0 %v6930_v18 }
 0x4e4   : > { %4437 = vset.pattern.permute.xlu2 %v6930_v18 }
 0x4e6   : > { %v1182_v50 = vpop.permute.xlu1 %1181 }
 0x4e7   : > { %v1203_v55 = vadd.f32 %v1182_v50, %v1106_v44  ;;  %v5530_v50 = vpop.eup %4550 }
 0x4e9   : > { %1212 = vst.msk [vmem:[#allocation4 + $0x10] sm:$0xff] %vm1209_vm3, %v1203_v55 }
 0x4ec   : > { %v1186_v2 = vpop.permute.xlu0 %1185 }
 0x4ed   : > { %v1205_v60 = vadd.f32 %v1186_v2, %v1108_v57 }
 0x4ee   : > { %v1259_v62 = vpop.permute.xlu1 %1258 }
 0x4ef   : > { %1214 = vst.msk [vmem:[#allocation4 + $0x20] sm:$0xff] %vm1209_vm3, %v1205_v60 }
 0x4f0   : > { %1272 = vst.msk [vmem:[#allocation3 + $0x30] sm:$0xff] %vm1209_vm3, %v1259_v62 }
 0x4f1   : > { %2307 = vmax.xlane.f32.xlu1 %v2306_v16 }
 0x4ff   : > { %v5527_v32 = vpop.xlane.xlu2 %2301 }
 0x507   : > { %v1190_v13 = vpop.permute.xlu2 %1189 }
 0x508   : > { %v1207_v44 = vadd.f32 %v1190_v13, %v1110_v24  ;;  %v1061_v24 = vld [vmem:[#allocation4 + $0x28] sm:$0xff] }
 0x50a   : > { %1216 = vst.msk [vmem:[#allocation4 + $0x30] sm:$0xff] %vm1209_vm3, %v1207_v44  ;;  %1534 = vperm.xlu1 %4433, %v5530_v50   ;;  %v1109_v44 = vmul.f32 %v5359_v56, %v1061_v24 }
 0x50f   : > { %v1423_v55 = vpop.permute.xlu2 %1422 }
 0x510   : > { %v1456_v46 = vsub.f32 %v5348_v53, %v1423_v55  ;;  %1682 = vst.msk [vmem:[#allocation2 + $0x8] sm:$0xff] %vm1672_vm4, %v1423_v55 }
 0x512   : > { %v1465_v4 = vmul.f32 1.442695, %v1456_v46  ;;  %1437 = vperm.xlu1 %4433, %v5486_v54  }
 0x514   : > { %4552 = vpow2.f32 %v1465_v4 }
 0x515   : > { %4554 = vpow2.f32 %v1409_v35 }
 0x517   : > { %v5537_v57 = vpop.permute.xlu2 %1529  ;;  %v1807_v2 = vld [vmem:[#allocation2 + $0x8] sm:$0xff]  ;;  %v5544_v54 = vpop.xlane.xlu0 %2304 }
 0x518   : > { %v1847_v60 = vmax.f32 %v1807_v2, %v5093_v36  ;;  %v1111_v36 = vmul.f32 %v5365_v48, %v1063_v51 }
 0x51a   : > { %v4553_v62 = vpop.eup %4552  ;;  %1447 = vperm.xlu1 %4433, %v1389_v63   ;;  %1885 = vperm.xlu2 %4437, %v1847_v60   ;;  %v5550_v63 = vpop.xlane.xlu1 %2298 }
 0x51b   : > { %v1490_v16 = vsel %vm453_vm1, %v4553_v62, 0.0  ;;  %v5542_v14 = vpop.eup %4554 }
 0x51c   : > { %1491 = vadd.xlane.f32.xlu0 %v1490_v16 }
 0x51f   : > { %v1433_v53 = vpop.permute.xlu2 %1432 }
 0x520   : > { %1684 = vst.msk [vmem:[#allocation2 + $0x18] sm:$0xff] %vm1672_vm4, %v1433_v53 }
 0x522   : > { %1554 = vperm.xlu1 %4433, %v5542_v14  }
 0x527   : > { %v5547_v52 = vpop.permute.xlu2 %1544 }
 0x52a   : > { %v1192_v6 = vpop.permute.xlu0 %1191  ;;  %4436 = vset.pattern.permute.xlu1 %v6930_v18 }
 0x52b   : > { %v1208_v10 = vadd.f32 %v1192_v6, %v1111_v36 }
 0x52d   : > { %1217 = vst.msk [vmem:[#allocation4 + $0x38] sm:$0xff] %vm1209_vm3, %v1208_v10 }
 0x52f   : > { %v1443_v13 = vpop.permute.xlu2 %1442 }
 0x530   : > { %1686 = vst.msk [vmem:[#allocation2 + $0x28] sm:$0xff] %vm1672_vm4, %v1443_v13 }
 0x531   : > { %v1188_v55 = vpop.permute.xlu1 %1187 }
 0x532   : > { %v1206_v46 = vadd.f32 %v1188_v55, %v1109_v44  ;;  %v1428_v4 = vpop.permute.xlu0 %1427 }
 0x533   : > { %v1457_v27 = vsub.f32 %v5352_v30, %v1428_v4  ;;  %1683 = vst.msk [vmem:[#allocation2 + $0x10] sm:$0xff] %vm1672_vm4, %v1428_v4  ;;  %v1855_v4 = vsub.f32 %v1807_v2, %v1847_v60 }
 0x534   : > { %1215 = vst.msk [vmem:[#allocation4 + $0x28] sm:$0xff] %vm1209_vm3, %v1206_v46  ;;  %v1458_v46 = vsub.f32 %v5357_v49, %v1433_v53 }
 0x535   : > { %v1467_v48 = vmul.f32 1.442695, %v1457_v27  ;;  %v1864_v27 = vmul.f32 1.442695, %v1855_v4 }
 0x537   : > { %v1453_v35 = vpop.permute.xlu2 %1452  ;;  %4556 = vpow2.f32 %v1467_v48 }
 0x538   : > { %1688 = vst.msk [vmem:[#allocation2 + $0x38] sm:$0xff] %vm1672_vm4, %v1453_v35  ;;  %v1462_v4 = vsub.f32 %v5385_v9, %v1453_v35 }
 0x539   : > { %v1418_v16 = vpop.permute.xlu1 %1417 }
 0x53a   : > { %v1455_v51 = vsub.f32 %v5345_v5, %v1418_v16  ;;  %1681 = vst.msk [vmem:[#allocation2] sm:$0xff] %vm1672_vm4, %v1418_v16  ;;  %v5562_v56 = vld [vmem:[#allocation2 + $0x10] sm:$0xff] }
 0x53b   : > { %v5566_v36 = vmax.f32 %v5562_v56, %v5106_v58  ;;  %v1469_v58 = vmul.f32 1.442695, %v1458_v46 }
 0x53c   : > { %v1463_v30 = vmul.f32 1.442695, %v1455_v51 }
 0x53d   : > { %1890 = vperm.xlu0 %4438, %v5566_v36   ;;  %v4557_v6 = vpop.eup %4556 }
 0x53e   : > { %4558 = vpow2.f32 %v1463_v30  ;;  %v1493_v24 = vsel %vm453_vm1, %v4557_v6, 0.0 }
 0x53f   : > { %4560 = vpow2.f32 %v1469_v58 }
 0x540   : > { %4562 = vpow2.f32 %v1864_v27 }
 0x541   : > { %v1806_v10 = vld [vmem:[#allocation2] sm:$0xff] }
 0x542   : > { %v1846_v44 = vmax.f32 %v1806_v10, %v5082_v22 }
 0x543   : > { %1494 = vadd.xlane.f32.xlu2 %v1493_v24  ;;  %v6934_v24 = vmov 16  }
 0x544   : > { %v4559_v5 = vpop.eup %4558  ;;  %1880 = vperm.xlu1 %4436, %v1846_v44   ;;  %v1854_v53 = vsub.f32 %v1806_v10, %v1846_v44  ;;  %v5598_v44 = vpop.permute.xlu0 %1539 }
 0x545   : > { %v1575_v55 = vpack.c.bf16 %v4553_v62, %v4559_v5  ;;  %v5573_v48 = vpop.eup %4560  ;;  %v5580_v62 = vpop.permute.xlu2 %1559  ;;  %v1487_v49 = vsel %vm453_vm1, %v4559_v5, 0.0  ;;  %4442 = vset.pattern.permute.xlu0 %v6934_v24 }
 0x546   : > { %v1576_v16 = vpack.c.bf16 %v5573_v48, %v4557_v6  ;;  %v5577_v22 = vpop.eup %4562  ;;  %v1862_v51 = vmul.f32 1.442695, %v1854_v53  ;;  %v1460_v6 = vsub.f32 %v5369_v15, %v1443_v13  ;;  %v5596_v15 = vld [vmem:[#allocation2 + $0x18] sm:$0xff]  ;;  %v1477_v13 = vmul.f32 1.442695, %v1462_v4 }
 0x547   : > { %4311 = vmatmul.msk.bf16.vlgmr.msrb.gmra.mxu3 %vm453_vm1, %v1575_v55 }
 0x548   : > { %4564 = vpow2.f32 %v1862_v51  ;;  %v1473_v55 = vmul.f32 1.442695, %v1460_v6 }
 0x54a   : > { %4566 = vpow2.f32 %v1473_v55 }
 0x54e   : > { %v5592_v58 = vpop.eup %4564 }
 0x550   : > { %v4567_v35 = vpop.eup %4566 }
 0x557   : > { %4312 = vmatmul.msk.bf16.gmra.mxu3 %vm453_vm1, %v1576_v16 }
 0x55b   : > { %1997 = vperm.xlu2 %4437, %v5577_v22  }
 0x564   : > { %v5583_v2 = vpop.xlane.xlu1 %2307 }
 0x56e   : > { %1488 = vadd.xlane.f32.xlu1 %v1487_v49 }
 0x574   : > { %v1886_v60 = vpop.permute.xlu2 %1885 }
 0x575   : > { %2145 = vst.msk [vmem:[#allocation2 + $0x8] sm:$0xff] %vm2135_vm5, %v1886_v60 }
 0x57c   : > { %v5586_v30 = vpop.permute.xlu1 %1534 }
 0x584   : > { %v1438_v46 = vpop.permute.xlu1 %1437 }
 0x585   : > { %v1459_v5 = vsub.f32 %v5361_v7, %v1438_v46  ;;  %1685 = vst.msk [vmem:[#allocation2 + $0x20] sm:$0xff] %vm1672_vm4, %v1438_v46  ;;  %v5603_v7 = vmax.f32 %v5596_v15, %v5145_v17  ;;  %v5610_v17 = vpop.permute.xlu0 %1549 }
 0x587   : > { %v1471_v10 = vmul.f32 1.442695, %v1459_v5  ;;  %1992 = vperm.xlu1 %4436, %v5592_v58  }
 0x589   : > { %4568 = vpow2.f32 %v1471_v10 }
 0x58a   : > { %4570 = vpow2.f32 %v1477_v13  ;;  %v5621_v13 = vld [vmem:[#allocation2 + $0x8] sm:$0xff] }
 0x58c   : > { %v1448_v27 = vpop.permute.xlu1 %1447  ;;  %v1810_v16 = vld [vmem:[#allocation2 + $0x20] sm:$0xff] }
 0x58d   : > { %1687 = vst.msk [vmem:[#allocation2 + $0x30] sm:$0xff] %vm1672_vm4, %v1448_v27  ;;  %v1850_v9 = vmax.f32 %v1810_v16, %v5220_v3  ;;  %v1461_v53 = vsub.f32 %v5375_v45, %v1448_v27  ;;  %v5615_v45 = vpop.permute.xlu0 %1564  ;;  %v5625_v27 = vmax.f32 %v5621_v13, %v5510_v11  ;;  %v1502_v11 = vsel %vm453_vm1, %v4567_v35, 0.0 }
 0x58f   : > { %v4569_v49 = vpop.eup %4568  ;;  %1895 = vperm.xlu1 %4436, %v5603_v7   ;;  %1900 = vperm.xlu2 %4437, %v1850_v9   ;;  %v1475_v55 = vmul.f32 1.442695, %v1461_v53 }
 0x590   : > { %v1499_v51 = vsel %vm453_vm1, %v4569_v49, 0.0  ;;  %v1577_v6 = vpack.c.bf16 %v4567_v35, %v4569_v49  ;;  %v4571_v46 = vpop.eup %4570 }
 0x591   : > { %1500 = vadd.xlane.f32.xlu0 %v1499_v51  ;;  %4572 = vpow2.f32 %v1475_v55  ;;  %v1508_v3 = vsel %vm453_vm1, %v4571_v46, 0.0  ;;  %v1919_v51 = vsub.f32 %v5039_v33, %v1886_v60 }
 0x592   : > { %4313 = vmatmul.msk.bf16.gmra.mxu3 %vm453_vm1, %v1577_v6 }
 0x593   : > { %v1928_v6 = vmul.f32 1.442695, %v1919_v51 }
 0x594   : > { %v5628_v49 = vpop.permute.xlu1 %1554  ;;  %v5640_v24 = vld [vmem:[#allocation2 + $0x30] sm:$0xff] }
 0x595   : > { %v5619_v10 = vpop.xlane.xlu0 %1491  ;;  %4574 = vpow2.f32 %v1928_v6 }
 0x597   : > { %v5613_v5 = vpop.eup %4572 }
 0x598   : > { %v1578_v4 = vpack.c.bf16 %v4571_v46, %v5613_v5 }
 0x599   : > { %1509 = vadd.xlane.f32.xlu0 %v1508_v3  ;;  %v1496_v3 = vsel %vm453_vm1, %v5573_v48, 0.0  ;;  %v5644_v48 = vmax.f32 %v5640_v24, %v5190_v20 }
 0x59b   : > { %v4575_v18 = vpop.eup %4574 }
 0x59c   : > { %v1953_v6 = vsel %vm453_vm1, %v4575_v18, 0.0 }
 0x5a2   : > { %4314 = vmatmul.msk.bf16.gmra.mxu3 %vm453_vm1, %v1578_v4 }
 0x5ad   : > { %2348 = vperm.xlu0 %4442, %v5625_v27  }
 0x5af   : > { %v1891_v53 = vpop.permute.xlu0 %1890 }
 0x5b0   : > { %2146 = vst.msk [vmem:[#allocation2 + $0x10] sm:$0xff] %vm2135_vm5, %v1891_v53 }
 0x5b5   : > { %4443 = vset.pattern.permute.xlu0 %v6932_v23  ;;  %v1811_v23 = vld [vmem:[#allocation2 + $0x28] sm:$0xff] }
 0x5b6   : > { %v1881_v55 = vpop.permute.xlu1 %1880 }
 0x5b7   : > { %v1918_v46 = vsub.f32 %v5035_v29, %v1881_v55  ;;  %2144 = vst.msk [vmem:[#allocation2] sm:$0xff] %vm2135_vm5, %v1881_v55  ;;  %v1851_v29 = vmax.f32 %v1811_v23, %v5194_v59  ;;  %v1858_v55 = vsub.f32 %v1810_v16, %v1850_v9  ;;  %v1495_v59 = vpop.xlane.xlu2 %1494  ;;  %v6950_v9 = vmov 16  }
 0x5b8   : > { %1503 = vadd.xlane.f32.xlu2 %v1502_v11 }
 0x5b9   : > { %v1926_v4 = vmul.f32 1.442695, %v1918_v46  ;;  %1497 = vadd.xlane.f32.xlu1 %v1496_v3  ;;  %v1859_v51 = vsub.f32 %v1811_v23, %v1851_v29  ;;  %v1870_v46 = vmul.f32 1.442695, %v1858_v55  ;;  %v6951_v55 = vmov 8  }
 0x5bb   : > { %4576 = vpow2.f32 %v1926_v4  ;;  %v1872_v35 = vmul.f32 1.442695, %v1859_v51 }
 0x5bd   : > { %4578 = vpow2.f32 %v1872_v35 }
 0x5be   : > { %4580 = vpow2.f32 %v1870_v46  ;;  %v5654_v20 = vld [vmem:[#allocation2] sm:$0xff] }
 0x5bf   : > { %6948 = vst [vmem:[#allocation9_spill] sm:$0xff] %v5654_v20  ;;  %v5658_v16 = vmax.f32 %v5654_v20, %v5457_v47  ;;  %v5661_v3 = vpop.permute.xlu2 %1997 }
 0x5c1   : > { %v4577_v33 = vpop.eup %4576  ;;  %6949 = vst [vmem:[#allocation10_spill] sm:$0xff] %v5658_v16 }
 0x5c2   : > { %v2038_v60 = vpack.c.bf16 %v4575_v18, %v4577_v33  ;;  %v1353_v18 = vld [vmem:[#allocation3 + $0x10] sm:$0xff] }
 0x5c3   : > { %v5648_v11 = vpop.eup %4578  ;;  %v1481_v4 = vmul.f32 %v5495_v43, %v1353_v18 }
 0x5c4   : > { %4319 = vmatmul.msk.bf16.vlgmr.msrb.gmra.mxu2 %vm453_vm1, %v2038_v60  ;;  %v5651_v23 = vpop.eup %4580 }
 0x5ca   : > { %v1612_v60 = vpop.f32.mrf.mxu3 }
 0x5d0   : > { %1910 = vperm.xlu2 %4437, %v5644_v48  }
 0x5d2   : > { %1905 = vperm.xlu1 %4436, %v1851_v29   ;;  %v1513_v29 = vadd.f32 %v1495_v59, %v1481_v4  ;;  %v1614_v47 = vpop.f32.mrf.mxu3  ;;  %v1505_v59 = vsel %vm453_vm1, %v5613_v5, 0.0  ;;  %v1950_v4 = vsel %vm453_vm1, %v4577_v33, 0.0  ;;  %v1813_v5 = vld [vmem:[#allocation2 + $0x38] sm:$0xff] }
 0x5d7   : > { %1954 = vadd.xlane.f32.xlu0 %v1953_v6  ;;  %v1920_v6 = vsub.f32 %v5045_v42, %v1891_v53 }
 0x5d8   : > { %2017 = vperm.xlu2 %4437, %v5648_v11  }
 0x5d9   : > { %v1930_v20 = vmul.f32 1.442695, %v1920_v6 }
 0x5da   : > { %2012 = vperm.xlu1 %4436, %v5651_v23  }
 0x5db   : > { %4582 = vpow2.f32 %v1930_v20  ;;  %v1853_v20 = vmax.f32 %v1813_v5, %v5250_v12 }
 0x5dd   : > { %v1861_v33 = vsub.f32 %v1813_v5, %v1853_v20  ;;  %v1351_v5 = vld [vmem:[#allocation3] sm:$0xff] }
 0x5e0   : > { %4440 = vset.pattern.permute.xlu2 %v6950_v9 }
 0x5e1   : > { %2343 = vperm.xlu2 %4440, %v5658_v16   ;;  %v1489_v35 = vpop.xlane.xlu1 %1488 }
 0x5e9   : > { %v1901_v51 = vpop.permute.xlu2 %1900  ;;  %4441 = vset.pattern.permute.xlu2 %v6951_v55 }
 0x5ea   : > { %2148 = vst.msk [vmem:[#allocation2 + $0x20] sm:$0xff] %vm2135_vm5, %v1901_v51 }
 0x5eb   : > { %1701 = vperm.xlu0 %4443, %v1513_v29   ;;  %v5676_v29 = vpop.eup %4582 }
 0x5f3   : > { %1642 = vrot.lane.b32.xlu0 %v1614_v47, %s4804_s4  ;;  %v6952_v47 = vld [vmem:[#allocation5_spill] sm:$0xff] }
 0x5f4   : > { %v1922_v42 = vsub.f32 %v6952_v47, %v1901_v51  ;;  %v1876_v51 = vmul.f32 1.442695, %v1861_v33  ;;  %v1479_v33 = vmul.f32 %v5478_v1, %v1351_v5  ;;  %v5713_v1 = vld [vmem:[#allocation2 + $0x10] sm:$0xff] }
 0x5f9   : > { %v5668_v46 = vpop.permute.xlu1 %1992 }
 0x601   : > { %v1896_v16 = vpop.permute.xlu1 %1895 }
 0x602   : > { %v1921_v43 = vsub.f32 %v5068_v61, %v1896_v16  ;;  %2147 = vst.msk [vmem:[#allocation2 + $0x18] sm:$0xff] %vm2135_vm5, %v1896_v16  ;;  %v1934_v16 = vmul.f32 1.442695, %v1922_v42 }
 0x604   : > { %v1932_v18 = vmul.f32 1.442695, %v1921_v43  ;;  %1506 = vadd.xlane.f32.xlu1 %v1505_v59  ;;  %v5681_v6 = vpop.xlane.xlu0 %1500 }
 0x606   : > { %4584 = vpow2.f32 %v1932_v18  ;;  %v1352_v18 = vld [vmem:[#allocation3 + $0x8] sm:$0xff] }
 0x607   : > { %4586 = vpow2.f32 %v1934_v16  ;;  %v1480_v47 = vmul.f32 %v5530_v50, %v1352_v18  ;;  %v5699_v16 = vpop.f32.mrf.mxu3 }
 0x608   : > { %4588 = vpow2.f32 %v1876_v51  ;;  %v1511_v51 = vadd.f32 %v1489_v35, %v1479_v33 }
 0x609   : > { %v1512_v12 = vadd.f32 %v5619_v10, %v1480_v47  ;;  %v5706_v18 = vld [vmem:[#allocation2 + $0x18] sm:$0xff] }
 0x60a   : > { %1951 = vadd.xlane.f32.xlu2 %v1950_v4  ;;  %6953 = vst [vmem:[#allocation5_spill] sm:$0xff] %v5706_v18 }
 0x60c   : > { %v5679_v53 = vpop.eup %4584  ;;  %v5687_v43 = vpop.xlane.xlu0 %1509 }
 0x60d   : > { %v2039_v61 = vpack.c.bf16 %v5679_v53, %v5676_v29  ;;  %v5689_v59 = vpop.eup %4586 }
 0x60e   : > { %v1962_v4 = vsel %vm453_vm1, %v5689_v59, 0.0 }
 0x60f   : > { %4320 = vmatmul.msk.bf16.gmra.mxu2 %vm453_vm1, %v2039_v61  ;;  %v5696_v61 = vpop.eup %4588  ;;  %v1619_v47 = vpop.f32.mrf.mxu3 }
 0x61d   : > { %1963 = vadd.xlane.f32.xlu0 %v1962_v4  ;;  %1915 = vperm.xlu1 %4436, %v1853_v20   ;;  %v1356_v20 = vld [vmem:[#allocation3 + $0x28] sm:$0xff] }
 0x61e   : > { %v1484_v10 = vmul.f32 %v5542_v14, %v1356_v20  ;;  %v5721_v14 = vmax.f32 %v5713_v1, %v5481_v19 }
 0x61f   : > { %v2349_v42 = vpop.permute.xlu0 %2348 }
 0x620   : > { %2608 = vst.msk [vmem:[#allocation2 + $0x8] sm:$0xff] %vm2598_vm6, %v2349_v42  ;;  %v2382_v33 = vsub.f32 %v5411_v39, %v2349_v42 }
 0x622   : > { %1696 = vperm.xlu2 %4441, %v1512_v12   ;;  %v5710_v12 = vmax.f32 %v5706_v18, %v5512_v40  ;;  %v1622_v40 = vpop.f32.mrf.mxu3  ;;  %v2391_v19 = vmul.f32 1.442695, %v2382_v33 }
 0x624   : > { %6954 = vst [vmem:[#allocation11_spill] sm:$0xff] %v5710_v12  ;;  %4590 = vpow2.f32 %v2391_v19  ;;  %v1959_v19 = vsel %vm453_vm1, %v5679_v53, 0.0 }
 0x625   : > { %2027 = vperm.xlu1 %4436, %v5696_v61  }
 0x62a   : > { %1640 = vrot.lane.b32.xlu2 %v1612_v60, %s4804_s4 }
 0x62b   : > { %v1504_v50 = vpop.xlane.xlu2 %1503  ;;  %4446 = vset.pattern.permute.xlu2 %v6950_v9 }
 0x62c   : > { %v1516_v4 = vadd.f32 %v1504_v50, %v1484_v10  ;;  %v1498_v5 = vpop.xlane.xlu1 %1497  ;;  %v6956_v10 = vld [vmem:[#allocation6_spill] sm:$0xff] }
 0x62d   : > { %4439 = vset.pattern.permute.xlu1 %v6951_v55 }
 0x62e   : > { %1691 = vperm.xlu1 %4439, %v1511_v51  }
 0x631   : > { %1716 = vperm.xlu0 %4443, %v1516_v4  }
 0x632   : > { %2358 = vperm.xlu2 %4446, %v5710_v12  }
 0x633   : > { %v5715_v60 = vpop.permute.xlu2 %1910 }
 0x634   : > { %2150 = vst.msk [vmem:[#allocation2 + $0x30] sm:$0xff] %vm2135_vm5, %v5715_v60 }
 0x636   : > { %4444 = vset.pattern.permute.xlu1 %v6950_v9 }
 0x637   : > { %2353 = vperm.xlu1 %4444, %v5721_v14  }
 0x639   : > { %1648 = vrot.lane.b32.xlu0 %v1622_v40, %s4804_s4 }
 0x63a   : > { %4447 = vset.pattern.permute.xlu2 %v6951_v55  ;;  %4452 = vset.pattern.permute.xlu0 %v6950_v9 }
 0x63b   : > { %v5728_v35 = vpop.permute.xlu2 %2017 }
 0x63c   : > { %6955 = vst [vmem:[#allocation12_spill] sm:$0xff] %v5728_v35  ;;  %v5736_v35 = vpop.eup %4590 }
 0x63f   : > { %4445 = vset.pattern.permute.xlu1 %v6951_v55 }
 0x643   : > { %v2344_v20 = vpop.permute.xlu2 %2343 }
 0x644   : > { %v2381_v50 = vsub.f32 %v5403_v25, %v2344_v20  ;;  %2607 = vst.msk [vmem:[#allocation2] sm:$0xff] %vm2598_vm6, %v2344_v20  ;;  %v1906_v51 = vpop.permute.xlu1 %1905  ;;  %v2273_v25 = vld [vmem:[#allocation2 + $0x20] sm:$0xff] }
 0x645   : > { %v1923_v4 = vsub.f32 %v6956_v10, %v1906_v51  ;;  %2149 = vst.msk [vmem:[#allocation2 + $0x28] sm:$0xff] %vm2135_vm5, %v1906_v51  ;;  %v1520_v51 = vld [vmem:[#allocation4 + $0x8] sm:$0xff] }
 0x646   : > { %v2389_v40 = vmul.f32 1.442695, %v2381_v50  ;;  %v1956_v50 = vsel %vm453_vm1, %v5676_v29, 0.0  ;;  %v1568_v10 = vmul.f32 %v5586_v30, %v1520_v51  ;;  %v2313_v29 = vmax.f32 %v2273_v25, %v5550_v63 }
 0x647   : > { %v1936_v18 = vmul.f32 1.442695, %v1923_v4 }
 0x648   : > { %4592 = vpow2.f32 %v2389_v40  ;;  %v1355_v40 = vld [vmem:[#allocation3 + $0x20] sm:$0xff] }
 0x649   : > { %4594 = vpow2.f32 %v1936_v18 }
 0x64a   : > { %v5747_v20 = vpop.xlane.xlu0 %1954 }
 0x64e   : > { %v5738_v39 = vpop.eup %4592 }
 0x64f   : > { %v5740_v42 = vpop.eup %4594 }
 0x650   : > { %v2040_v33 = vpack.c.bf16 %v5740_v42, %v5689_v59 }
 0x652   : > { %4321 = vmatmul.msk.bf16.gmra.mxu2 %vm453_vm1, %v2040_v33  ;;  %v1483_v33 = vmul.f32 %v5501_v34, %v1355_v40  ;;  %v6958_v40 = vld [vmem:[#allocation8_spill] sm:$0xff] }
 0x654   : > { %v1515_v53 = vadd.f32 %v5681_v6, %v1483_v33  ;;  %v5771_v6 = vld [vmem:[#allocation2 + $0x30] sm:$0xff] }
 0x655   : > { %v5775_v63 = vmax.f32 %v5771_v6, %v5544_v54 }
 0x65b   : > { %1960 = vadd.xlane.f32.xlu2 %v1959_v19  ;;  %v1354_v19 = vld [vmem:[#allocation3 + $0x18] sm:$0xff] }
 0x65d   : > { %v1702_v18 = vpop.permute.xlu0 %1701 }
 0x65e   : > { %1731 = vst.msk [vmem:[#allocation3 + $0x10] sm:$0xff] %vm1672_vm4, %v1702_v18  ;;  %v1482_v18 = vmul.f32 %v5491_v38, %v1354_v19 }
 0x660   : > { %v1514_v12 = vadd.f32 %v1498_v5, %v1482_v18  ;;  %v6957_v5 = vld [vmem:[#allocation7_spill] sm:$0xff] }
 0x661   : > { %1957 = vadd.xlane.f32.xlu1 %v1956_v50  ;;  %v5763_v50 = vpop.permute.xlu1 %2012  ;;  %v1924_v51 = vsub.f32 %v6957_v5, %v5715_v60 }
 0x665   : > { %v1643_v4 = vpop.permute.xlu0 %1642 }
 0x666   : > { %v1665_v59 = vadd.f32 %v1643_v4, %v1568_v10  ;;  %v1938_v4 = vmul.f32 1.442695, %v1924_v51  ;;  %v2319_v51 = vsub.f32 %v5713_v1, %v5721_v14  ;;  %v1965_v14 = vsel %vm453_vm1, %v5740_v42, 0.0 }
 0x668   : > { %1674 = vst.msk [vmem:[#allocation4 + $0x8] sm:$0xff] %vm1672_vm4, %v1665_v59  ;;  %4596 = vpow2.f32 %v1938_v4  ;;  %v2321_v4 = vsub.f32 %v2273_v25, %v2313_v29 }
 0x673   : > { %1711 = vperm.xlu2 %4447, %v1515_v53   ;;  %v4597_v53 = vpop.eup %4596 }
 0x674   : > { %v1968_v42 = vsel %vm453_vm1, %v4597_v53, 0.0 }
 0x677   : > { %v5769_v38 = vpop.xlane.xlu1 %1506 }
 0x67a   : > { %1706 = vperm.xlu1 %4445, %v1514_v12   ;;  %v1519_v12 = vld [vmem:[#allocation4] sm:$0xff] }
 0x67b   : > { %4448 = vset.pattern.permute.xlu2 %v6950_v9  ;;  %v1567_v10 = vmul.f32 %v5537_v57, %v1519_v12 }
 0x67c   : > { %2363 = vperm.xlu2 %4448, %v2313_v29  }
 0x67d   : > { %v5761_v30 = vpop.xlane.xlu2 %1951 }
 0x682   : > { %1644 = vrot.lane.b32.xlu1 %v5699_v16, %s4804_s4 }
 0x684   : > { %1646 = vrot.lane.b32.xlu2 %v1619_v47, %s4804_s4 }
 0x685   : > { %v1697_v34 = vpop.permute.xlu2 %1696 }
 0x686   : > { %1730 = vst.msk [vmem:[#allocation3 + $0x8] sm:$0xff] %vm1672_vm4, %v1697_v34 }
 0x68c   : > { %2373 = vperm.xlu2 %4448, %v5775_v63  }
 0x68d   : > { %v1641_v16 = vpop.permute.xlu2 %1640 }
 0x68e   : > { %v1664_v47 = vadd.f32 %v1641_v16, %v1567_v10  ;;  %v2329_v10 = vmul.f32 1.442695, %v2319_v51  ;;  %v1857_v51 = vsub.f32 %v5596_v15, %v5603_v7  ;;  %v5827_v15 = vld [vmem:[#allocation2 + $0x28] sm:$0xff]  ;;  %v1860_v7 = vsub.f32 %v5640_v24, %v5644_v48 }
 0x68f   : > { %v1916_v59 = vpop.permute.xlu1 %1915 }
 0x690   : > { %1673 = vst.msk [vmem:[#allocation4] sm:$0xff] %vm1672_vm4, %v1664_v47  ;;  %v1925_v33 = vsub.f32 %v6958_v40, %v1916_v59  ;;  %v5788_v18 = vpop.xlane.xlu0 %1963  ;;  %v1523_v47 = vld [vmem:[#allocation4 + $0x20] sm:$0xff] }
 0x691   : > { %2151 = vst.msk [vmem:[#allocation2 + $0x38] sm:$0xff] %vm2135_vm5, %v1916_v59 }
 0x692   : > { %v1940_v54 = vmul.f32 1.442695, %v1925_v33  ;;  %v1571_v33 = vmul.f32 %v5610_v17, %v1523_v47 }
 0x694   : > { %4598 = vpow2.f32 %v1940_v54  ;;  %4450 = vset.pattern.permute.xlu2 %v6951_v55 }
 0x695   : > { %v2359_v60 = vpop.permute.xlu2 %2358  ;;  %4600 = vpow2.f32 %v2329_v10 }
 0x696   : > { %2610 = vst.msk [vmem:[#allocation2 + $0x18] sm:$0xff] %vm2598_vm6, %v2359_v60  ;;  %v2384_v16 = vsub.f32 %v5433_v31, %v2359_v60 }
 0x697   : > { %v5786_v57 = vpop.permute.xlu1 %2027 }
 0x698   : > { %v2395_v59 = vmul.f32 1.442695, %v2384_v16  ;;  %v6959_v16 = vmov 12  }
 0x69a   : > { %v4599_v19 = vpop.eup %4598  ;;  %4602 = vpow2.f32 %v2395_v59 }
 0x69b   : > { %v1971_v34 = vsel %vm453_vm1, %v4599_v19, 0.0  ;;  %v2041_v12 = vpack.c.bf16 %v4599_v19, %v4597_v53  ;;  %v5803_v31 = vpop.eup %4600 }
 0x69c   : > { %1972 = vadd.xlane.f32.xlu0 %v1971_v34 }
 0x69d   : > { %4322 = vmatmul.msk.bf16.gmra.mxu2 %vm453_vm1, %v2041_v12  ;;  %v2333_v12 = vmul.f32 1.442695, %v2321_v4  ;;  %v1358_v4 = vld [vmem:[#allocation3 + $0x38] sm:$0xff] }
 0x6a0   : > { %v1692_v5 = vpop.permute.xlu1 %1691  ;;  %v5808_v17 = vpop.eup %4602 }
 0x6a1   : > { %1729 = vst.msk [vmem:[#allocation3] sm:$0xff] %vm1672_vm4, %v1692_v5 }
 0x6a3   : > { %v1717_v55 = vpop.permute.xlu0 %1716 }
 0x6a4   : > { %1734 = vst.msk [vmem:[#allocation3 + $0x28] sm:$0xff] %vm1672_vm4, %v1717_v55  ;;  %v1357_v55 = vld [vmem:[#allocation3 + $0x30] sm:$0xff] }
 0x6a5   : > { %v1485_v53 = vmul.f32 %v5507_v8, %v1357_v55 }
 0x6a7   : > { %v1517_v47 = vadd.f32 %v5769_v38, %v1485_v53  ;;  %v2318_v38 = vsub.f32 %v5621_v13, %v5625_v27  ;;  %v5850_v27 = vld [vmem:[#allocation2 + $0x38] sm:$0xff] }
 0x6a9   : > { %v2354_v40 = vpop.permute.xlu1 %2353  ;;  %v2327_v24 = vmul.f32 1.442695, %v2318_v38 }
 0x6aa   : > { %v2383_v54 = vsub.f32 %v5414_v21, %v2354_v40  ;;  %2609 = vst.msk [vmem:[#allocation2 + $0x10] sm:$0xff] %vm2598_vm6, %v2354_v40  ;;  %v1856_v21 = vsub.f32 %v5562_v56, %v5566_v36  ;;  %v1624_v56 = vpop.f32.mrf.mxu3  ;;  %v1868_v36 = vmul.f32 1.442695, %v1857_v51  ;;  %v1522_v51 = vld [vmem:[#allocation4 + $0x18] sm:$0xff] }
 0x6ab   : > { %v1649_v1 = vpop.permute.xlu0 %1648 }
 0x6ac   : > { %v2393_v19 = vmul.f32 1.442695, %v2383_v54  ;;  %v1668_v34 = vadd.f32 %v1649_v1, %v1571_v33  ;;  %1966 = vadd.xlane.f32.xlu1 %v1965_v14  ;;  %v1866_v60 = vmul.f32 1.442695, %v1856_v21  ;;  %v1486_v33 = vmul.f32 %v5504_v28, %v1358_v4 }
 0x6ad   : > { %v5834_v54 = vmax.f32 %v5827_v15, %v5527_v32  ;;  %v1874_v28 = vmul.f32 1.442695, %v1860_v7 }
 0x6ae   : > { %4604 = vpow2.f32 %v2393_v19  ;;  %1677 = vst.msk [vmem:[#allocation4 + $0x20] sm:$0xff] %vm1672_vm4, %v1668_v34  ;;  %v1518_v8 = vadd.f32 %v5687_v43, %v1486_v33  ;;  %v5856_v43 = vmax.f32 %v5850_v27, %v5583_v2  ;;  %v1814_v19 = vld [vmem:[#allocation3] sm:$0xff]  ;;  %v1570_v2 = vmul.f32 %v5547_v52, %v1522_v51  ;;  %v1521_v52 = vld [vmem:[#allocation4 + $0x10] sm:$0xff]  ;;  %v1815_v33 = vld [vmem:[#allocation3 + $0x8] sm:$0xff] }
 0x6af   : > { %4606 = vpow2.f32 %v2333_v12  ;;  %v1816_v12 = vld [vmem:[#allocation3 + $0x10] sm:$0xff]  ;;  %v1942_v21 = vmul.f32 %v5592_v58, %v1814_v19  ;;  %v1819_v51 = vld [vmem:[#allocation3 + $0x28] sm:$0xff] }
 0x6b0   : > { %2465 = vperm.xlu0 %4452, %v5803_v31   ;;  %4608 = vpow2.f32 %v1866_v60 }
 0x6b1   : > { %4610 = vpow2.f32 %v1868_v36 }
 0x6b2   : > { %v1627_v59 = vpop.f32.mrf.mxu3  ;;  %4612 = vpow2.f32 %v1874_v28  ;;  %v2075_v28 = vpop.f32.mrf.mxu2 }
 0x6b3   : > { %4614 = vpow2.f32 %v2327_v24 }
 0x6b4   : > { %v5810_v25 = vpop.eup %4604 }
 0x6b5   : > { %1969 = vadd.xlane.f32.xlu2 %v1968_v42  ;;  %v2502_v29 = vpack.c.bf16 %v5808_v17, %v5810_v25  ;;  %v5815_v5 = vpop.eup %4606  ;;  %v2419_v7 = vsel %vm453_vm1, %v5810_v25, 0.0 }
 0x6b6   : > { %v4609_v10 = vpop.eup %4608 }
 0x6b7   : > { %v5823_v40 = vpop.eup %4610  ;;  %v1944_v60 = vmul.f32 %v4609_v10, %v1816_v12 }
 0x6b8   : > { %2475 = vperm.xlu0 %4452, %v5815_v5   ;;  %v5847_v13 = vpop.eup %4612 }
 0x6b9   : > { %v5852_v48 = vpop.eup %4614 }
 0x6ba   : > { %v1629_v14 = vpop.f32.mrf.mxu3 }
 0x6c0   : > { %4453 = vset.pattern.permute.xlu0 %v6959_v16 }
 0x6c1   : > { %2002 = vperm.xlu0 %4453, %v4609_v10  }
 0x6c5   : > { %1721 = vperm.xlu1 %4445, %v1517_v47  }
 0x6c9   : > { %2007 = vperm.xlu0 %4453, %v5823_v40  }
 0x6cd   : > { %1726 = vperm.xlu2 %4450, %v1518_v8   ;;  %4449 = vset.pattern.permute.xlu1 %v6950_v9  ;;  %v1943_v8 = vmul.f32 %v5577_v22, %v1815_v33 }
 0x6ce   : > { %v5839_v1 = vpop.xlane.xlu2 %1960  ;;  %2368 = vperm.xlu1 %4449, %v5834_v54  }
 0x6d1   : > { %1654 = vrot.lane.b32.xlu0 %v1629_v14, %s4804_s4 }
 0x6d4   : > { %v1958_v42 = vpop.xlane.xlu1 %1957 }
 0x6d5   : > { %1652 = vrot.lane.b32.xlu2 %v1627_v59, %s4804_s4  ;;  %v1976_v36 = vadd.f32 %v1958_v42, %v1944_v60  ;;  %v2416_v59 = vsel %vm453_vm1, %v5736_v35, 0.0  ;;  %v2077_v42 = vpop.f32.mrf.mxu2 }
 0x6d6   : > { %v1712_v32 = vpop.permute.xlu2 %1711  ;;  %1650 = vrot.lane.b32.xlu1 %v1624_v56, %s4804_s4  ;;  %4451 = vset.pattern.permute.xlu2 %v6950_v9  ;;  %v1974_v56 = vadd.f32 %v5761_v30, %v1942_v21  ;;  %v1569_v30 = vmul.f32 %v5598_v44, %v1521_v52  ;;  %v1975_v44 = vadd.f32 %v5747_v20, %v1943_v8 }
 0x6d7   : > { %1733 = vst.msk [vmem:[#allocation3 + $0x20] sm:$0xff] %vm1672_vm4, %v1712_v32 }
 0x6d9   : > { %2022 = vperm.xlu0 %4453, %v5847_v13  }
 0x6dd   : > { %2460 = vperm.xlu2 %4451, %v5852_v48  }
 0x6de   : > { %v5859_v34 = vpop.permute.xlu2 %2363  ;;  %2378 = vperm.xlu1 %4449, %v5856_v43   ;;  %v1818_v14 = vld [vmem:[#allocation3 + $0x20] sm:$0xff] }
 0x6df   : > { %2611 = vst.msk [vmem:[#allocation2 + $0x20] sm:$0xff] %vm2598_vm6, %v5859_v34  ;;  %v1946_v32 = vmul.f32 %v5651_v23, %v1818_v14  ;;  %v1947_v23 = vmul.f32 %v5648_v11, %v1819_v51  ;;  %v2385_v52 = vsub.f32 %v5445_v26, %v5859_v34 }
 0x6e1   : > { %v1978_v21 = vadd.f32 %v5788_v18, %v1946_v32 }
 0x6e5   : > { %4454 = vset.pattern.permute.xlu2 %v6959_v16 }
 0x6e6   : > { %v1647_v55 = vpop.permute.xlu2 %1646  ;;  %4455 = vset.pattern.permute.xlu1 %v6959_v16  ;;  %2154 = vperm.xlu2 %4454, %v1974_v56   ;;  %v2413_v16 = vsel %vm453_vm1, %v5738_v39, 0.0 }
 0x6e7   : > { %v1667_v53 = vadd.f32 %v1647_v55, %v1570_v2  ;;  %2164 = vperm.xlu1 %4455, %v1976_v36  }
 0x6e9   : > { %1676 = vst.msk [vmem:[#allocation4 + $0x18] sm:$0xff] %vm1672_vm4, %v1667_v53 }
 0x6ec   : > { %v1707_v47 = vpop.permute.xlu1 %1706 }
 0x6ed   : > { %1732 = vst.msk [vmem:[#allocation3 + $0x18] sm:$0xff] %vm1672_vm4, %v1707_v47 }
 0x6ee   : > { %v5871_v58 = vpop.permute.xlu2 %2373 }
 0x6ef   : > { %2613 = vst.msk [vmem:[#allocation2 + $0x30] sm:$0xff] %vm2598_vm6, %v5871_v58 }
 0x6f4   : > { %v1645_v10 = vpop.permute.xlu1 %1644  ;;  %v1817_v24 = vld [vmem:[#allocation3 + $0x18] sm:$0xff] }
 0x6f5   : > { %v1666_v4 = vadd.f32 %v1645_v10, %v1569_v30  ;;  %v1945_v19 = vmul.f32 %v5823_v40, %v1817_v24  ;;  %v2422_v24 = vsel %vm453_vm1, %v5808_v17, 0.0 }
 0x6f7   : > { %1675 = vst.msk [vmem:[#allocation4 + $0x10] sm:$0xff] %vm1672_vm4, %v1666_v4  ;;  %v1977_v22 = vadd.f32 %v5839_v1, %v1945_v19  ;;  %v1525_v1 = vld [vmem:[#allocation4 + $0x30] sm:$0xff]  ;;  %v1526_v4 = vld [vmem:[#allocation4 + $0x38] sm:$0xff] }
 0x6f8   : > { %v1573_v36 = vmul.f32 %v5580_v62, %v1525_v1  ;;  %v1574_v62 = vmul.f32 %v5615_v45, %v1526_v4 }
 0x703   : > { %2414 = vadd.xlane.f32.xlu0 %v2413_v16  ;;  %v2397_v16 = vmul.f32 1.442695, %v2385_v52 }
 0x705   : > { %4616 = vpow2.f32 %v2397_v16 }
 0x70b   : > { %v5920_v14 = vpop.eup %4616 }
 0x70f   : > { %2417 = vadd.xlane.f32.xlu2 %v2416_v59  ;;  %v5885_v38 = vpop.xlane.xlu0 %1972 }
 0x711   : > { %2420 = vadd.xlane.f32.xlu1 %v2419_v7  ;;  %v1524_v7 = vld [vmem:[#allocation4 + $0x28] sm:$0xff] }
 0x712   : > { %v1572_v8 = vmul.f32 %v5628_v49, %v1524_v7  ;;  %v2425_v49 = vsel %vm453_vm1, %v5920_v14, 0.0 }
 0x717   : > { %2159 = vperm.xlu0 %4453, %v1975_v44  }
 0x71f   : > { %2103 = vrot.lane.b32.xlu0 %v2075_v28, %s4805_s5  ;;  %v1967_v56 = vpop.xlane.xlu1 %1966 }
 0x720   : > { %v1979_v40 = vadd.f32 %v1967_v56, %v1947_v23 }
 0x722   : > { %v5890_v12 = vpop.permute.xlu0 %2465 }
 0x727   : > { %2174 = vperm.xlu0 %4453, %v1978_v21   ;;  %2169 = vperm.xlu2 %4454, %v1977_v22   ;;  %v2080_v21 = vpop.f32.mrf.mxu2 }
 0x728   : > { %v5894_v20 = vpop.xlane.xlu2 %1969 }
 0x72a   : > { %v5896_v60 = vpop.permute.xlu0 %2475  ;;  %2105 = vrot.lane.b32.xlu1 %v2077_v42, %s4805_s5 }
 0x72f   : > { %v2082_v42 = vpop.f32.mrf.mxu2 }
 0x730   : > { %v1727_v2 = vpop.permute.xlu2 %1726 }
 0x731   : > { %1736 = vst.msk [vmem:[#allocation3 + $0x38] sm:$0xff] %vm1672_vm4, %v1727_v2 }
 0x732   : > { %2179 = vperm.xlu1 %4455, %v1979_v40  }
 0x733   : > { %v5901_v18 = vpop.permute.xlu0 %2002 }
 0x737   : > { %v1722_v55 = vpop.permute.xlu1 %1721 }
 0x738   : > { %1735 = vst.msk [vmem:[#allocation3 + $0x30] sm:$0xff] %vm1672_vm4, %v1722_v55  ;;  %v1653_v53 = vpop.permute.xlu2 %1652  ;;  %v1821_v51 = vld [vmem:[#allocation3 + $0x38] sm:$0xff]  ;;  %v5944_v55 = vld [vmem:[%s4872_s22 + $0x8] sm:$0xff] }
 0x739   : > { %v1670_v47 = vadd.f32 %v1653_v53, %v1573_v36  ;;  %v1949_v56 = vmul.f32 %v5696_v61, %v1821_v51  ;;  %v2085_v36 = vpop.f32.mrf.mxu2 }
 0x73a   : > { %4458 = vset.pattern.permute.xlu1 %v6950_v9 }
 0x73b   : > { %1679 = vst.msk [vmem:[#allocation4 + $0x30] sm:$0xff] %vm1672_vm4, %v1670_v47  ;;  %v5907_v11 = vpop.permute.xlu0 %2007  ;;  %v1981_v2 = vadd.f32 %v5885_v38, %v1949_v56  ;;  %v4747_v47 = vld [vmem:[%s4860_s19 + $0x10] sm:$0xff]  ;;  %v6002_v56 = vld [vmem:[%s4860_s19] sm:$0xff] }
 0x73f   : > { %v1820_v23 = vld [vmem:[#allocation3 + $0x30] sm:$0xff] }
 0x740   : > { %v5911_v30 = vpop.permute.xlu2 %2460  ;;  %v2369_v10 = vpop.permute.xlu1 %2368  ;;  %v1948_v40 = vmul.f32 %v5847_v13, %v1820_v23  ;;  %v1984_v23 = vld [vmem:[#allocation4 + $0x10] sm:$0xff] }
 0x741   : > { %2612 = vst.msk [vmem:[#allocation2 + $0x28] sm:$0xff] %vm2598_vm6, %v2369_v10  ;;  %v2386_v34 = vsub.f32 %v5447_v37, %v2369_v10  ;;  %v2087_v38 = vpop.f32.mrf.mxu2 }
 0x742   : > { %v1980_v1 = vadd.f32 %v5894_v20, %v1948_v40  ;;  %v6007_v40 = vld [vmem:[%s4872_s22 + $0x18] sm:$0xff] }
 0x743   : > { %v1655_v59 = vpop.permute.xlu0 %1654  ;;  %v2399_v45 = vmul.f32 1.442695, %v2386_v34 }
 0x744   : > { %v1671_v33 = vadd.f32 %v1655_v59, %v1574_v62  ;;  %v5960_v59 = vld [vmem:[%s4884_s26 + $0x8] sm:$0xff] }
 0x745   : > { %4618 = vpow2.f32 %v2399_v45 }
 0x746   : > { %1680 = vst.msk [vmem:[#allocation4 + $0x38] sm:$0xff] %vm1672_vm4, %v1671_v33 }
 0x748   : > { %v2155_v44 = vpop.permute.xlu2 %2154  ;;  %v1651_v28 = vpop.permute.xlu1 %1650 }
 0x749   : > { %2192 = vst.msk [vmem:[#allocation3] sm:$0xff] %vm2135_vm5, %v2155_v44  ;;  %v1669_v26 = vadd.f32 %v1651_v28, %v1572_v8  ;;  %v2090_v4 = vpop.f32.mrf.mxu2 }
 0x74b   : > { %1678 = vst.msk [vmem:[#allocation4 + $0x28] sm:$0xff] %vm1672_vm4, %v1669_v26  ;;  %v5927_v19 = vpop.eup %4618  ;;  %v5941_v61 = vpop.permute.xlu0 %2022 }
 0x74c   : > { %v2428_v22 = vsel %vm453_vm1, %v5927_v19, 0.0 }
 0x750   : > { %2423 = vadd.xlane.f32.xlu2 %v2422_v24  ;;  %v2379_v32 = vpop.permute.xlu1 %2378 }
 0x751   : > { %2614 = vst.msk [vmem:[#allocation2 + $0x38] sm:$0xff] %vm2598_vm6, %v2379_v32  ;;  %2426 = vadd.xlane.f32.xlu0 %v2425_v49  ;;  %v2388_v53 = vsub.f32 %v5517_v41, %v2379_v32  ;;  %v1982_v41 = vld [vmem:[#allocation4] sm:$0xff]  ;;  %v2092_v8 = vpop.f32.mrf.mxu2 }
 0x752   : > { %v2030_v33 = vmul.f32 %v5668_v46, %v1982_v41  ;;  %v1983_v46 = vld [vmem:[#allocation4 + $0x8] sm:$0xff] }
 0x753   : > { %v2403_v52 = vmul.f32 1.442695, %v2388_v53  ;;  %v2031_v24 = vmul.f32 %v5661_v3, %v1983_v46  ;;  %v6962_v46 = vld [vmem:[#allocation11_spill] sm:$0xff] }
 0x755   : > { %4620 = vpow2.f32 %v2403_v52  ;;  %v6026_v52 = vld [vmem:[%s4884_s26 + $0x10] sm:$0xff] }
 0x759   : > { %v2165_v37 = vpop.permute.xlu1 %2164 }
 0x75a   : > { %2194 = vst.msk [vmem:[#allocation3 + $0x10] sm:$0xff] %vm2135_vm5, %v2165_v37  ;;  %v2324_v37 = vsub.f32 %v5850_v27, %v5856_v43  ;;  %v5992_v43 = vld [vmem:[%s4872_s22 + $0x10] sm:$0xff] }
 0x75b   : > { %v5965_v7 = vpop.eup %4620 }
 0x75c   : > { %2429 = vadd.xlane.f32.xlu1 %v2428_v22  ;;  %v2434_v26 = vsel %vm453_vm1, %v5965_v7, 0.0  ;;  %v2339_v22 = vmul.f32 1.442695, %v2324_v37  ;;  %v1986_v37 = vld [vmem:[#allocation4 + $0x20] sm:$0xff] }
 0x765   : > { %2109 = vrot.lane.b32.xlu0 %v2082_v42, %s4805_s5  ;;  %v2322_v42 = vsub.f32 %v5827_v15, %v5834_v54  ;;  %v5997_v15 = vld [vmem:[%s4872_s22] sm:$0xff] }
 0x767   : > { %v2335_v3 = vmul.f32 1.442695, %v2322_v42  ;;  %v2034_v42 = vmul.f32 %v5763_v50, %v1986_v37 }
 0x768   : > { %2107 = vrot.lane.b32.xlu2 %v2080_v21, %s4805_s5 }
 0x76d   : > { %2189 = vperm.xlu0 %4453, %v1981_v2   ;;  %v2032_v2 = vmul.f32 %v5901_v18, %v1984_v23  ;;  %v2279_v18 = vld [vmem:[#allocation3 + $0x10] sm:$0xff] }
 0x770   : > { %2184 = vperm.xlu2 %4454, %v1980_v1  }
 0x775   : > { %2111 = vrot.lane.b32.xlu1 %v2085_v36, %s4805_s5  ;;  %4457 = vset.pattern.permute.xlu0 %v6950_v9  ;;  %v6013_v36 = vld [vmem:[%s4860_s19 + $0x18] sm:$0xff] }
 0x776   : > { %v5948_v13 = vpop.xlane.xlu0 %2414 }
 0x778   : > { %4456 = vset.pattern.permute.xlu2 %v6950_v9  ;;  %v2387_v9 = vsub.f32 %v5459_v0, %v5871_v58 }
 0x77a   : > { %v2401_v16 = vmul.f32 1.442695, %v2387_v9 }
 0x77c   : > { %4622 = vpow2.f32 %v2401_v16 }
 0x77d   : > { %2507 = vrot.lane.b32.xlu1 %v5944_v55, %s4795_s29  ;;  %4624 = vpow2.f32 %v2339_v22 }
 0x77e   : > { %4626 = vpow2.f32 %v2335_v3 }
 0x782   : > { %v5950_v20 = vpop.xlane.xlu2 %2417  ;;  %v5968_v28 = vpop.eup %4622 }
 0x783   : > { %v2431_v34 = vsel %vm453_vm1, %v5968_v28, 0.0  ;;  %v5985_v51 = vpop.eup %4624  ;;  %v2504_v25 = vpack.c.bf16 %v5965_v7, %v5968_v28 }
 0x784   : > { %v2421_v44 = vpop.xlane.xlu1 %2420  ;;  %v5988_v27 = vpop.eup %4626 }
 0x785   : > { %2667 = vrot.lane.b32.xlu1 %v4747_v47, %s4806_s6  ;;  %v6021_v47 = vld [vmem:[%s4860_s19 + $0x8] sm:$0xff] }
 0x789   : > { %v2160_v10 = vpop.permute.xlu0 %2159 }
 0x78a   : > { %2193 = vst.msk [vmem:[#allocation3 + $0x8] sm:$0xff] %vm2135_vm5, %v2160_v10  ;;  %v2170_v62 = vpop.permute.xlu2 %2169  ;;  %v1985_v10 = vld [vmem:[#allocation4 + $0x18] sm:$0xff] }
 0x78b   : > { %2195 = vst.msk [vmem:[#allocation3 + $0x18] sm:$0xff] %vm2135_vm5, %v2170_v62  ;;  %v6961_v62 = vld [vmem:[#allocation9_spill] sm:$0xff]  ;;  %v2033_v41 = vmul.f32 %v5907_v11, %v1985_v10 }
 0x78d   : > { %2673 = vrot.lane.b32.xlu1 %v5960_v59, %s4806_s6 }
 0x791   : > { %v2104_v0 = vpop.permute.xlu0 %2103 }
 0x792   : > { %v2127_v58 = vadd.f32 %v2104_v0, %v2030_v33  ;;  %v2407_v33 = vmul.f32 %v5803_v31, %v2279_v18  ;;  %v6047_v31 = vld [vmem:[%s4884_s26 + $0x18] sm:$0xff] }
 0x794   : > { %2136 = vst.msk [vmem:[#allocation4] sm:$0xff] %vm2135_vm5, %v2127_v58 }
 0x795   : > { %2117 = vrot.lane.b32.xlu1 %v2092_v8, %s4805_s5  ;;  %v2439_v8 = vadd.f32 %v2421_v44, %v2407_v33 }
 0x797   : > { %2435 = vadd.xlane.f32.xlu0 %v2434_v26  ;;  %v6036_v26 = vld [vmem:[%s4884_s26] sm:$0xff] }
 0x799   : > { %v2175_v45 = vpop.permute.xlu0 %2174  ;;  %2432 = vadd.xlane.f32.xlu2 %v2431_v34 }
 0x79a   : > { %2196 = vst.msk [vmem:[#allocation3 + $0x20] sm:$0xff] %vm2135_vm5, %v2175_v45  ;;  %v6963_v45 = vld [vmem:[#allocation5_spill] sm:$0xff] }
 0x79c   : > { %v2106_v32 = vpop.permute.xlu1 %2105 }
 0x79d   : > { %v2128_v49 = vadd.f32 %v2106_v32, %v2031_v24  ;;  %v2320_v24 = vsub.f32 %v6963_v45, %v6962_v46  ;;  %v1988_v45 = vld [vmem:[#allocation4 + $0x30] sm:$0xff] }
 0x79f   : > { %2137 = vst.msk [vmem:[#allocation4 + $0x8] sm:$0xff] %vm2135_vm5, %v2128_v49  ;;  %v2331_v44 = vmul.f32 1.442695, %v2320_v24  ;;  %v2277_v49 = vld [vmem:[#allocation3] sm:$0xff]  ;;  %v2036_v24 = vmul.f32 %v5941_v61, %v1988_v45  ;;  %v6965_v61 = vpack.c.bf16 %v5736_v35, %v5738_v39 }
 0x7a4   : > { %v2180_v21 = vpop.permute.xlu1 %2179 }
 0x7a5   : > { %2197 = vst.msk [vmem:[#allocation3 + $0x28] sm:$0xff] %vm2135_vm5, %v2180_v21 }
 0x7ab   : > { %2115 = vrot.lane.b32.xlu0 %v2090_v4, %s4805_s5  ;;  %v6960_v4 = vld [vmem:[#allocation10_spill] sm:$0xff] }
 0x7ac   : > { %v2317_v16 = vsub.f32 %v6961_v62, %v6960_v4 }
 0x7ae   : > { %v2325_v34 = vmul.f32 1.442695, %v2317_v16  ;;  %v1989_v16 = vld [vmem:[#allocation4 + $0x38] sm:$0xff] }
 0x7af   : > { %v2037_v50 = vmul.f32 %v5786_v57, %v1989_v16 }
 0x7b0   : > { %4628 = vpow2.f32 %v2325_v34 }
 0x7b1   : > { %2113 = vrot.lane.b32.xlu2 %v2087_v38, %s4805_s5  ;;  %4630 = vpow2.f32 %v2331_v44 }
 0x7b3   : > { %2490 = vperm.xlu0 %4457, %v5985_v51  }
 0x7b6   : > { %v6051_v21 = vpop.eup %4628 }
 0x7b7   : > { %v2405_v22 = vmul.f32 %v6051_v21, %v2277_v49 }
 0x7b9   : > { %2480 = vperm.xlu2 %4456, %v5988_v27   ;;  %v2437_v3 = vadd.f32 %v5948_v13, %v2405_v22 }
 0x7bb   : > { %2509 = vrot.lane.b32.xlu0 %v5992_v43, %s4795_s29 }
 0x7c1   : > { %2505 = vrot.lane.b32.xlu2 %v5997_v15, %s4795_s29 }
 0x7c3   : > { %v2424_v54 = vpop.xlane.xlu2 %2423  ;;  %2663 = vrot.lane.b32.xlu0 %v6002_v56, %s4806_s6 }
 0x7c4   : > { %v6018_v53 = vpop.xlane.xlu0 %2426 }
 0x7c9   : > { %2511 = vrot.lane.b32.xlu2 %v6007_v40, %s4795_s29 }
 0x7cb   : > { %v2108_v1 = vpop.permute.xlu2 %2107  ;;  %2669 = vrot.lane.b32.xlu0 %v6013_v36, %s4806_s6 }
 0x7cc   : > { %v2129_v38 = vadd.f32 %v2108_v1, %v2032_v2  ;;  %v2280_v1 = vld [vmem:[#allocation3 + $0x18] sm:$0xff] }
 0x7ce   : > { %2138 = vst.msk [vmem:[#allocation4 + $0x10] sm:$0xff] %vm2135_vm5, %v2129_v38  ;;  %v6057_v38 = vpop.eup %4630 }
 0x7cf   : > { %v6043_v32 = vpop.xlane.xlu1 %2429 }
 0x7d1   : > { %2665 = vrot.lane.b32.xlu2 %v6021_v47, %s4806_s6 }
 0x7d3   : > { %v2185_v9 = vpop.permute.xlu2 %2184  ;;  %2675 = vrot.lane.b32.xlu0 %v6026_v52, %s4806_s6 }
 0x7d4   : > { %2198 = vst.msk [vmem:[#allocation3 + $0x30] sm:$0xff] %vm2135_vm5, %v2185_v9  ;;  %v2408_v9 = vmul.f32 %v6057_v38, %v2280_v1 }
 0x7d6   : > { %v2440_v18 = vadd.f32 %v2424_v54, %v2408_v9 }
 0x7d7   : > { %v2110_v0 = vpop.permute.xlu0 %2109 }
 0x7d8   : > { %v2130_v58 = vadd.f32 %v2110_v0, %v2033_v41  ;;  %v1987_v0 = vld [vmem:[#allocation4 + $0x28] sm:$0xff] }
 0x7d9   : > { %2671 = vrot.lane.b32.xlu2 %v6036_v26, %s4806_s6 }
 0x7da   : > { %2139 = vst.msk [vmem:[#allocation4 + $0x18] sm:$0xff] %vm2135_vm5, %v2130_v58  ;;  %v6964_v58 = vld [vmem:[#allocation12_spill] sm:$0xff] }
 0x7db   : > { %2627 = vperm.xlu0 %4457, %v2439_v8   ;;  %v2035_v8 = vmul.f32 %v6964_v58, %v1987_v0  ;;  %v2282_v0 = vld [vmem:[#allocation3 + $0x28] sm:$0xff] }
 0x7dc   : > { %v2410_v7 = vmul.f32 %v5988_v27, %v2282_v0 }
 0x7de   : > { %v2442_v28 = vadd.f32 %v6043_v32, %v2410_v7  ;;  %v6155_v7 = vld [vmem:[#allocation2] sm:$0xff] }
 0x7df   : > { %v2190_v11 = vpop.permute.xlu0 %2189 }
 0x7e0   : > { %2199 = vst.msk [vmem:[#allocation3 + $0x38] sm:$0xff] %vm2135_vm5, %v2190_v11 }
 0x7e1   : > { %2677 = vrot.lane.b32.xlu2 %v6047_v31, %s4806_s6 }
 0x7e7   : > { %v2112_v23 = vpop.permute.xlu1 %2111 }
 0x7e8   : > { %v2131_v2 = vadd.f32 %v2112_v23, %v2034_v42 }
 0x7e9   : > { %2617 = vperm.xlu2 %4456, %v2437_v3  }
 0x7ea   : > { %2140 = vst.msk [vmem:[#allocation4 + $0x20] sm:$0xff] %vm2135_vm5, %v2131_v2 }
 0x7ef   : > { %v2508_v10 = vpop.permute.xlu1 %2507 }
 0x7f1   : > { %2632 = vperm.xlu2 %4456, %v2440_v18  }
 0x7f7   : > { %v2668_v4 = vpop.permute.xlu1 %2667 }
 0x7ff   : > { %v2674_v62 = vpop.permute.xlu1 %2673 }
 0x800   : > { %v2695_v35 = vsel %vm383_vm0, %v2674_v62, 0 }
 0x807   : > { %v2118_v41 = vpop.permute.xlu1 %2117 }
 0x808   : > { %v2134_v13 = vadd.f32 %v2118_v41, %v2037_v50 }
 0x80a   : > { %2143 = vst.msk [vmem:[#allocation4 + $0x38] sm:$0xff] %vm2135_vm5, %v2134_v13  ;;  %v6065_v46 = vpop.xlane.xlu0 %2435  ;;  %v2503_v13 = vpack.c.bf16 %v5927_v19, %v5920_v14  ;;  %v2323_v14 = vsub.f32 %v5771_v6, %v5775_v63 }
 0x80c   : > { %v6062_v33 = vpop.xlane.xlu2 %2432  ;;  %v2337_v62 = vmul.f32 1.442695, %v2323_v14 }
 0x80e   : > { %4632 = vpow2.f32 %v2337_v62 }
 0x814   : > { %v2114_v34 = vpop.permute.xlu2 %2113 }
 0x815   : > { %v2132_v54 = vadd.f32 %v2114_v34, %v2035_v8  ;;  %v4633_v8 = vpop.eup %4632 }
 0x817   : > { %2141 = vst.msk [vmem:[#allocation4 + $0x28] sm:$0xff] %vm2135_vm5, %v2132_v54 }
 0x81c   : > { %v6069_v11 = vpop.permute.xlu2 %2480 }
 0x81d   : > { %v2116_v57 = vpop.permute.xlu0 %2115 }
 0x81e   : > { %v2133_v44 = vadd.f32 %v2116_v57, %v2036_v24 }
 0x820   : > { %2142 = vst.msk [vmem:[#allocation4 + $0x30] sm:$0xff] %vm2135_vm5, %v2133_v44 }
 0x824   : > { %v2506_v49 = vpop.permute.xlu2 %2505 }
 0x825   : > { %v6072_v37 = vpop.permute.xlu0 %2490 }
 0x82c   : > { %v2512_v22 = vpop.permute.xlu2 %2511 }
 0x82d   : > { %2533 = vmatpush.bf16.msra.mxu3 %v2512_v22  ;;  %v2510_v42 = vpop.permute.xlu0 %2509 }
 0x831   : > { %2534 = vmatpush.bf16.msra.mxu3 %v2510_v42  ;;  %v2278_v42 = vld [vmem:[#allocation3 + $0x8] sm:$0xff] }
 0x834   : > { %v2666_v3 = vpop.permute.xlu2 %2665 }
 0x835   : > { %v2664_v23 = vpop.permute.xlu0 %2663  ;;  %2535 = vmatpush.bf16.msra.mxu3 %v2508_v10 }
 0x839   : > { %2536 = vmatpush.bf16.msra.mxu3 %v2506_v49 }
 0x83c   : > { %v2672_v2 = vpop.permute.xlu2 %2671  ;;  %4327 = vmatmul.msk.bf16.vlgmr.msra.gmra.mxu3 %vm453_vm1, %v6965_v61 }
 0x83d   : > { %v2670_v1 = vpop.permute.xlu0 %2669  ;;  %v2692_v17 = vsel %vm383_vm0, %v2672_v2, 0  ;;  %v2281_v2 = vld [vmem:[#allocation3 + $0x20] sm:$0xff] }
 0x83e   : > { %v2409_v61 = vmul.f32 %v5815_v5, %v2281_v2 }
 0x844   : > { %v2678_v9 = vpop.permute.xlu2 %2677 }
 0x845   : > { %v2701_v18 = vsel %vm383_vm0, %v2678_v9, 0  ;;  %v2676_v16 = vpop.permute.xlu0 %2675  ;;  %v2447_v9 = vld [vmem:[#allocation4 + $0x10] sm:$0xff] }
 0x846   : > { %2707 = vmatpush.bf16.xpose.msra.mxu0 %v2701_v18  ;;  %v2698_v50 = vsel %vm383_vm0, %v2676_v16, 0  ;;  %v2495_v18 = vmul.f32 %v5890_v12, %v2447_v9 }
 0x84c   : > { %v2618_v41 = vpop.permute.xlu2 %2617  ;;  %4328 = vmatmul.msk.bf16.gmra.mxu3 %vm453_vm1, %v2502_v29 }
 0x84d   : > { %2655 = vst.msk [vmem:[#allocation3] sm:$0xff] %vm2598_vm6, %v2618_v41  ;;  %v2628_v10 = vpop.permute.xlu0 %2627 }
 0x84e   : > { %2657 = vst.msk [vmem:[#allocation3 + $0x10] sm:$0xff] %vm2598_vm6, %v2628_v10  ;;  %2708 = vmatpush.bf16.xpose.msra.mxu0 %v2698_v50 }
 0x854   : > { %v2633_v39 = vpop.permute.xlu2 %2632 }
 0x855   : > { %2658 = vst.msk [vmem:[#allocation3 + $0x18] sm:$0xff] %vm2598_vm6, %v2633_v39 }
 0x856   : > { %2709 = vmatpush.bf16.xpose.msra.mxu0 %v2695_v35 }
 0x85c   : > { %4329 = vmatmul.msk.bf16.gmra.mxu3 %vm453_vm1, %v2503_v13  ;;  %v4808_v13 = vmov 20  }
 0x85e   : > { %2710 = vmatpush.bf16.xpose.msra.mxu0 %v2692_v17 }
 0x865   : > { %4331 = vmatmul.msk.bf16.vlgmr.msra.gmra.mxu0 %vm383_vm0, %v2664_v23 }
 0x86c   : > { %4330 = vmatmul.msk.bf16.gmra.mxu3 %vm453_vm1, %v2504_v25 }
 0x875   : > { %4332 = vmatmul.msk.bf16.gmra.mxu0 %vm383_vm0, %v2666_v3 }
 0x885   : > { %4333 = vmatmul.msk.bf16.gmra.mxu0 %vm383_vm0, %v2668_v4  ;;  %v2283_v4 = vld [vmem:[#allocation3 + $0x30] sm:$0xff] }
 0x886   : > { %v2411_v34 = vmul.f32 %v4633_v8, %v2283_v4 }
 0x888   : > { %v2443_v6 = vadd.f32 %v6062_v33, %v2411_v34 }
 0x895   : > { %4334 = vmatmul.msk.bf16.gmra.mxu0 %vm383_vm0, %v2670_v1  ;;  %v2441_v1 = vadd.f32 %v6018_v53, %v2409_v61  ;;  %v2446_v53 = vld [vmem:[#allocation4 + $0x8] sm:$0xff] }
 0x896   : > { %v2494_v35 = vmul.f32 %v5911_v30, %v2446_v53  ;;  %v6180_v53 = vld [vmem:[#allocation2 + $0x8] sm:$0xff] }
 0x8bf   : > { %v2538_v29 = vpop.f32.mrf.mxu3 }
 0x8c7   : > { %v2540_v19 = vpop.f32.mrf.mxu3 }
 0x8c8   : > { %2568 = vrot.lane.b32.xlu0 %v2540_v19, %s4807_s7 }
 0x8cf   : > { %v2543_v58 = vpop.f32.mrf.mxu3 }
 0x8d0   : > { %2642 = vperm.xlu0 %4457, %v2442_v28   ;;  %2570 = vrot.lane.b32.xlu2 %v2543_v58, %s4807_s7 }
 0x8d7   : > { %v2545_v63 = vpop.f32.mrf.mxu3 }
 0x8d8   : > { %2647 = vperm.xlu2 %4456, %v2443_v6   ;;  %4461 = vset.pattern.permute.xlu0 %v4808_v13  ;;  %v2449_v6 = vld [vmem:[#allocation4 + $0x20] sm:$0xff] }
 0x8df   : > { %v2548_v54 = vpop.f32.mrf.mxu3 }
 0x8e0   : > { %4459 = vset.pattern.permute.xlu2 %v4808_v13 }
 0x8e2   : > { %v6106_v45 = vpop.f32.mrf.mxu0 }
 0x8e3   : > { %v2748_v27 = vsel %vm453_vm1, %v6106_v45, -inf }
 0x8e4   : > { %2749 = vmax.xlane.f32.xlu1 %v2748_v27 }
 0x8e7   : > { %v2550_v24 = vpop.f32.mrf.mxu3 }
 0x8e8   : > { %2576 = vrot.lane.b32.xlu2 %v2550_v24, %s4807_s7 }
 0x8ea   : > { %v6111_v32 = vpop.f32.mrf.mxu0 }
 0x8eb   : > { %v2751_v44 = vsel %vm453_vm1, %v6111_v32, -inf }
 0x8ef   : > { %v2553_v62 = vpop.f32.mrf.mxu3 }
 0x8f2   : > { %v6113_v57 = vpop.f32.mrf.mxu0 }
 0x8f3   : > { %v2754_v22 = vsel %vm453_vm1, %v6113_v57, -inf }
 0x8f7   : > { %v2555_v0 = vpop.f32.mrf.mxu3 }
 0x8fa   : > { %2752 = vmax.xlane.f32.xlu0 %v2751_v44  ;;  %v6118_v33 = vpop.f32.mrf.mxu0  ;;  %v6166_v44 = vld [vmem:[#allocation2 + $0x10] sm:$0xff] }
 0x8fd   : > { %2455 = vperm.xlu1 %4458, %v6051_v21   ;;  %v2406_v21 = vmul.f32 %v5852_v48, %v2278_v42  ;;  %v2284_v48 = vld [vmem:[#allocation3 + $0x38] sm:$0xff]  ;;  %v2445_v42 = vld [vmem:[#allocation4] sm:$0xff] }
 0x8fe   : > { %v2412_v41 = vmul.f32 %v5985_v51, %v2284_v48 }
 0x900   : > { %v2444_v5 = vadd.f32 %v6065_v46, %v2412_v41  ;;  %v2450_v46 = vld [vmem:[#allocation4 + $0x28] sm:$0xff] }
 0x902   : > { %v6121_v49 = vpop.f32.mrf.mxu0 }
 0x903   : > { %v2760_v12 = vsel %vm453_vm1, %v6121_v49, -inf }
 0x905   : > { %2470 = vperm.xlu1 %4458, %v6057_v38   ;;  %v2438_v38 = vadd.f32 %v5950_v20, %v2406_v21 }
 0x90a   : > { %v6126_v3 = vpop.f32.mrf.mxu0 }
 0x90b   : > { %v2763_v23 = vsel %vm453_vm1, %v6126_v3, -inf }
 0x90d   : > { %2485 = vperm.xlu1 %4458, %v4633_v8  }
 0x90e   : > { %2574 = vrot.lane.b32.xlu0 %v2548_v54, %s4807_s7  ;;  %v2497_v54 = vmul.f32 %v5896_v60, %v2449_v6 }
 0x911   : > { %2755 = vmax.xlane.f32.xlu2 %v2754_v22 }
 0x912   : > { %v6139_v20 = vpop.f32.mrf.mxu0 }
 0x915   : > { %2566 = vrot.lane.b32.xlu1 %v2538_v29, %s4807_s7  ;;  %v2498_v29 = vmul.f32 %v6069_v11, %v2450_v46  ;;  %v2757_v11 = vsel %vm453_vm1, %v6118_v33, -inf }
 0x919   : > { %2764 = vmax.xlane.f32.xlu2 %v2763_v23 }
 0x91a   : > { %v6146_v17 = vpop.f32.mrf.mxu0 }
 0x91b   : > { %v2769_v25 = vsel %vm453_vm1, %v6146_v17, -inf }
 0x91d   : > { %2622 = vperm.xlu1 %4458, %v2438_v38  }
 0x925   : > { %2637 = vperm.xlu1 %4458, %v2441_v1   ;;  %v2448_v1 = vld [vmem:[#allocation4 + $0x18] sm:$0xff] }
 0x92a   : > { %v2571_v16 = vpop.permute.xlu2 %2570 }
 0x92b   : > { %v2592_v50 = vadd.f32 %v2571_v16, %v2495_v18 }
 0x92d   : > { %2601 = vst.msk [vmem:[#allocation4 + $0x10] sm:$0xff] %vm2598_vm6, %v2592_v50  ;;  %2572 = vrot.lane.b32.xlu1 %v2545_v63, %s4807_s7  ;;  %v2766_v50 = vsel %vm453_vm1, %v6139_v20, -inf }
 0x932   : > { %v2648_v10 = vpop.permute.xlu2 %2647 }
 0x933   : > { %2661 = vst.msk [vmem:[#allocation3 + $0x30] sm:$0xff] %vm2598_vm6, %v2648_v10 }
 0x935   : > { %2652 = vperm.xlu1 %4458, %v2444_v5  }
 0x938   : > { %2761 = vmax.xlane.f32.xlu0 %v2760_v12 }
 0x93a   : > { %v2569_v39 = vpop.permute.xlu0 %2568 }
 0x93b   : > { %v2591_v51 = vadd.f32 %v2569_v39, %v2494_v35  ;;  %v6188_v39 = vld [vmem:[#allocation2 + $0x20] sm:$0xff] }
 0x93d   : > { %2600 = vst.msk [vmem:[#allocation4 + $0x8] sm:$0xff] %vm2598_vm6, %v2591_v51  ;;  %4460 = vset.pattern.permute.xlu1 %v4808_v13  ;;  %v2452_v51 = vld [vmem:[#allocation4 + $0x38] sm:$0xff] }
 0x93e   : > { %v2500_v46 = vmul.f32 %v6072_v37, %v2452_v51  ;;  %v2451_v37 = vld [vmem:[#allocation4 + $0x30] sm:$0xff] }
 0x940   : > { %2770 = vmax.xlane.f32.xlu0 %v2769_v25 }
 0x942   : > { %v2643_v14 = vpop.permute.xlu0 %2642  ;;  %v2577_v19 = vpop.permute.xlu2 %2576 }
 0x943   : > { %2660 = vst.msk [vmem:[#allocation3 + $0x28] sm:$0xff] %vm2598_vm6, %v2643_v14  ;;  %v2595_v30 = vadd.f32 %v2577_v19, %v2498_v29  ;;  %v6196_v14 = vld [vmem:[#allocation2 + $0x18] sm:$0xff] }
 0x945   : > { %2604 = vst.msk [vmem:[#allocation4 + $0x28] sm:$0xff] %vm2598_vm6, %v2595_v30 }
 0x954   : > { %2580 = vrot.lane.b32.xlu0 %v2555_v0, %s4807_s7 }
 0x957   : > { %v2750_v28 = vpop.xlane.xlu1 %2749 }
 0x958   : > { %v6158_v58 = vmax.f32 %v6155_v7, %v2750_v28 }
 0x95a   : > { %2806 = vperm.xlu2 %4459, %v6158_v58  }
 0x95f   : > { %2758 = vmax.xlane.f32.xlu1 %v2757_v11 }
 0x96d   : > { %v2753_v34 = vpop.xlane.xlu0 %2752 }
 0x96e   : > { %v6183_v12 = vmax.f32 %v6180_v53, %v2753_v34 }
 0x96f   : > { %v2456_v4 = vpop.permute.xlu1 %2455 }
 0x970   : > { %v2493_v23 = vmul.f32 %v2456_v4, %v2445_v42 }
 0x977   : > { %v2471_v8 = vpop.permute.xlu1 %2470 }
 0x978   : > { %2578 = vrot.lane.b32.xlu1 %v2553_v62, %s4807_s7  ;;  %v2496_v9 = vmul.f32 %v2471_v8, %v2448_v1  ;;  %v6202_v62 = vld [vmem:[#allocation2 + $0x28] sm:$0xff] }
 0x97f   : > { %v2486_v63 = vpop.permute.xlu1 %2485 }
 0x980   : > { %v2575_v27 = vpop.permute.xlu0 %2574  ;;  %v2499_v28 = vmul.f32 %v2486_v63, %v2451_v37  ;;  %v2780_v37 = vsub.f32 %v6155_v7, %v6158_v58 }
 0x981   : > { %v2594_v24 = vadd.f32 %v2575_v27, %v2497_v54 }
 0x983   : > { %2603 = vst.msk [vmem:[#allocation4 + $0x20] sm:$0xff] %vm2598_vm6, %v2594_v24  ;;  %v2738_v24 = vld [vmem:[#allocation2 + $0x30] sm:$0xff] }
 0x984   : > { %v2756_v22 = vpop.xlane.xlu2 %2755 }
 0x985   : > { %v6169_v21 = vmax.f32 %v6166_v44, %v2756_v22 }
 0x987   : > { %2816 = vperm.xlu0 %4461, %v6169_v21   ;;  %v2567_v38 = vpop.permute.xlu1 %2566 }
 0x988   : > { %v2590_v2 = vadd.f32 %v2567_v38, %v2493_v23 }
 0x98a   : > { %2599 = vst.msk [vmem:[#allocation4] sm:$0xff] %vm2598_vm6, %v2590_v2 }
 0x98c   : > { %v2765_v41 = vpop.xlane.xlu2 %2764 }
 0x98d   : > { %v6205_v0 = vmax.f32 %v6202_v62, %v2765_v41 }
 0x98f   : > { %v2623_v61 = vpop.permute.xlu1 %2622 }
 0x990   : > { %2656 = vst.msk [vmem:[#allocation3 + $0x8] sm:$0xff] %vm2598_vm6, %v2623_v61 }
 0x997   : > { %v2638_v60 = vpop.permute.xlu1 %2637 }
 0x998   : > { %2659 = vst.msk [vmem:[#allocation3 + $0x20] sm:$0xff] %vm2598_vm6, %v2638_v60 }
 0x99f   : > { %v2573_v18 = vpop.permute.xlu1 %2572 }
 0x9a0   : > { %v2593_v16 = vadd.f32 %v2573_v18, %v2496_v9 }
 0x9a2   : > { %2602 = vst.msk [vmem:[#allocation4 + $0x18] sm:$0xff] %vm2598_vm6, %v2593_v16  ;;  %2767 = vmax.xlane.f32.xlu1 %v2766_v50 }
 0x9a7   : > { %v2653_v48 = vpop.permute.xlu1 %2652 }
 0x9a8   : > { %2662 = vst.msk [vmem:[#allocation3 + $0x38] sm:$0xff] %vm2598_vm6, %v2653_v48 }
 0x9ab   : > { %v2762_v10 = vpop.xlane.xlu0 %2761 }
 0x9ac   : > { %v6191_v13 = vmax.f32 %v6188_v39, %v2762_v10 }
 0x9b3   : > { %v6186_v35 = vpop.xlane.xlu0 %2770 }
 0x9b4   : > { %v2807_v5 = vpop.permute.xlu2 %2806 }
 0x9b5   : > { %3070 = vst.msk [vmem:[#allocation2] sm:$0xff] %vm3061_vm7, %v2807_v5  ;;  %v2844_v38 = vsub.f32 %v6106_v45, %v2807_v5 }
 0x9b7   : > { %v2852_v1 = vmul.f32 1.442695, %v2844_v38 }
 0x9bb   : > { %2811 = vperm.xlu1 %4460, %v6183_v12  }
 0x9c3   : > { %2826 = vperm.xlu1 %4460, %v6191_v13  }
 0x9c6   : > { %v2581_v25 = vpop.permute.xlu0 %2580 }
 0x9c7   : > { %v2597_v29 = vadd.f32 %v2581_v25, %v2500_v46 }
 0x9c9   : > { %2606 = vst.msk [vmem:[#allocation4 + $0x38] sm:$0xff] %vm2598_vm6, %v2597_v29 }
 0x9d2   : > { %v2759_v19 = vpop.xlane.xlu1 %2758 }
 0x9d3   : > { %v6199_v30 = vmax.f32 %v6196_v14, %v2759_v19 }
 0x9d5   : > { %2821 = vperm.xlu2 %4459, %v6199_v30  }
 0x9dd   : > { %2831 = vperm.xlu2 %4459, %v6205_v0  }
 0x9ea   : > { %v2579_v11 = vpop.permute.xlu1 %2578 }
 0x9eb   : > { %v2596_v4 = vadd.f32 %v2579_v11, %v2499_v28  ;;  %v2788_v28 = vmul.f32 1.442695, %v2780_v37  ;;  %v2739_v11 = vld [vmem:[#allocation2 + $0x38] sm:$0xff] }
 0x9ed   : > { %2605 = vst.msk [vmem:[#allocation4 + $0x30] sm:$0xff] %vm2598_vm6, %v2596_v4  ;;  %v2779_v4 = vmax.f32 %v2739_v11, %v6186_v35 }
 0x9f9   : > { %v2817_v8 = vpop.permute.xlu0 %2816 }
 0x9fa   : > { %v2846_v34 = vsub.f32 %v6113_v57, %v2817_v8  ;;  %3072 = vst.msk [vmem:[#allocation2 + $0x10] sm:$0xff] %vm3061_vm7, %v2817_v8  ;;  %v2783_v8 = vsub.f32 %v6196_v14, %v6199_v30 }
 0x9fc   : > { %v2856_v6 = vmul.f32 1.442695, %v2846_v34  ;;  %v2794_v34 = vmul.f32 1.442695, %v2783_v8 }
 0x9fe   : > { %4634 = vpow2.f32 %v2856_v6 }
 0xa04   : > { %v6211_v54 = vpop.eup %4634 }
 0xa05   : > { %v2882_v27 = vsel %vm453_vm1, %v6211_v54, 0.0 }
 0xa06   : > { %2883 = vadd.xlane.f32.xlu2 %v2882_v27 }
 0xa15   : > { %v2768_v22 = vpop.xlane.xlu1 %2767 }
 0xa16   : > { %v2778_v63 = vmax.f32 %v2738_v24, %v2768_v22 }
 0xa18   : > { %2836 = vperm.xlu1 %4460, %v2778_v63   ;;  %v2786_v27 = vsub.f32 %v2738_v24, %v2778_v63  ;;  %v2781_v63 = vsub.f32 %v6180_v53, %v6183_v12 }
 0xa1a   : > { %v2800_v22 = vmul.f32 1.442695, %v2786_v27 }
 0xa2d   : > { %v2812_v42 = vpop.permute.xlu1 %2811 }
 0xa2e   : > { %v2845_v23 = vsub.f32 %v6111_v32, %v2812_v42  ;;  %3071 = vst.msk [vmem:[#allocation2 + $0x8] sm:$0xff] %vm3061_vm7, %v2812_v42 }
 0xa2f   : > { %v2822_v57 = vpop.permute.xlu2 %2821 }
 0xa30   : > { %v2854_v2 = vmul.f32 1.442695, %v2845_v23  ;;  %v2847_v61 = vsub.f32 %v6118_v33, %v2822_v57  ;;  %3073 = vst.msk [vmem:[#allocation2 + $0x18] sm:$0xff] %vm3061_vm7, %v2822_v57  ;;  %v2790_v23 = vmul.f32 1.442695, %v2781_v63 }
 0xa32   : > { %4636 = vpow2.f32 %v2854_v2  ;;  %v2858_v60 = vmul.f32 1.442695, %v2847_v61 }
 0xa34   : > { %4638 = vpow2.f32 %v2858_v60 }
 0xa35   : > { %v2827_v9 = vpop.permute.xlu1 %2826  ;;  %4640 = vpow2.f32 %v2852_v1 }
 0xa36   : > { %v2848_v18 = vsub.f32 %v6121_v49, %v2827_v9  ;;  %3074 = vst.msk [vmem:[#allocation2 + $0x20] sm:$0xff] %vm3061_vm7, %v2827_v9  ;;  %v2782_v9 = vsub.f32 %v6166_v44, %v6169_v21 }
 0xa37   : > { %v2832_v32 = vpop.permute.xlu2 %2831 }
 0xa38   : > { %v6222_v16 = vpop.eup %4636  ;;  %v2860_v50 = vmul.f32 1.442695, %v2848_v18  ;;  %v2849_v45 = vsub.f32 %v6126_v3, %v2832_v32  ;;  %3075 = vst.msk [vmem:[#allocation2 + $0x28] sm:$0xff] %vm3061_vm7, %v2832_v32  ;;  %v2784_v18 = vsub.f32 %v6188_v39, %v6191_v13 }
 0xa39   : > { %v2879_v33 = vsel %vm453_vm1, %v6222_v16, 0.0 }
 0xa3a   : > { %v6228_v48 = vpop.eup %4638  ;;  %4642 = vpow2.f32 %v2860_v50  ;;  %v2862_v41 = vmul.f32 1.442695, %v2849_v45  ;;  %2880 = vadd.xlane.f32.xlu0 %v2879_v33 }
 0xa3b   : > { %v2965_v49 = vpack.c.bf16 %v6228_v48, %v6211_v54  ;;  %v6232_v10 = vpop.eup %4640  ;;  %v2885_v19 = vsel %vm453_vm1, %v6228_v48, 0.0  ;;  %v2740_v48 = vld [vmem:[#allocation3] sm:$0xff] }
 0xa3c   : > { %4644 = vpow2.f32 %v2862_v41  ;;  %v2876_v3 = vsel %vm453_vm1, %v6232_v10, 0.0 }
 0xa3d   : > { %4646 = vpow2.f32 %v2788_v28 }
 0xa3e   : > { %4648 = vpow2.f32 %v2794_v34 }
 0xa3f   : > { %4650 = vpow2.f32 %v2800_v22 }
 0xa40   : > { %v6234_v5 = vpop.eup %4642 }
 0xa41   : > { %v2888_v51 = vsel %vm453_vm1, %v6234_v5, 0.0 }
 0xa42   : > { %v6240_v46 = vpop.eup %4644  ;;  %2877 = vadd.xlane.f32.xlu1 %v2876_v3  ;;  %2889 = vadd.xlane.f32.xlu0 %v2888_v51 }
 0xa43   : > { %v2891_v25 = vsel %vm453_vm1, %v6240_v46, 0.0  ;;  %v2966_v29 = vpack.c.bf16 %v6240_v46, %v6234_v5  ;;  %v6253_v6 = vpop.eup %4646 }
 0xa44   : > { %2892 = vadd.xlane.f32.xlu2 %v2891_v25  ;;  %v6256_v42 = vpop.eup %4648 }
 0xa45   : > { %v6259_v7 = vpop.eup %4650 }
 0xa4a   : > { %2886 = vadd.xlane.f32.xlu1 %v2885_v19 }
 0xa5c   : > { %2841 = vperm.xlu2 %4459, %v2779_v4  }
 0xa64   : > { %2918 = vperm.xlu2 %4459, %v6253_v6  }
 0xa6c   : > { %2933 = vperm.xlu2 %4459, %v6256_v42  }
 0xa74   : > { %2948 = vperm.xlu2 %4459, %v6259_v7  }
 0xa79   : > { %v6276_v38 = vpop.xlane.xlu2 %2883 }
 0xa7c   : > { %2970 = vrot.lane.b32.xlu2 %v5944_v55, %s4806_s6  ;;  %v2785_v55 = vsub.f32 %v6202_v62, %v6205_v0 }
 0xa7e   : > { %v2798_v57 = vmul.f32 1.442695, %v2785_v55 }
 0xa8a   : > { %v2837_v58 = vpop.permute.xlu1 %2836 }
 0xa8b   : > { %v2850_v35 = vsub.f32 %v6139_v20, %v2837_v58  ;;  %3076 = vst.msk [vmem:[#allocation2 + $0x30] sm:$0xff] %vm3061_vm7, %v2837_v58  ;;  %v2964_v58 = vpack.c.bf16 %v6222_v16, %v6232_v10 }
 0xa8d   : > { %v2864_v14 = vmul.f32 1.442695, %v2850_v35 }
 0xa8f   : > { %4652 = vpow2.f32 %v2864_v14 }
 0xa90   : > { %4654 = vpow2.f32 %v2790_v23 }
 0xa91   : > { %4656 = vpow2.f32 %v2798_v57 }
 0xa95   : > { %v6266_v30 = vpop.eup %4652 }
 0xa96   : > { %v2894_v24 = vsel %vm453_vm1, %v6266_v30, 0.0  ;;  %v6274_v20 = vpop.eup %4654 }
 0xa97   : > { %2895 = vadd.xlane.f32.xlu1 %v2894_v24  ;;  %v6279_v2 = vpop.eup %4656  ;;  %v2743_v24 = vld [vmem:[#allocation3 + $0x18] sm:$0xff] }
 0xa98   : > { %v2871_v23 = vmul.f32 %v6256_v42, %v2743_v24  ;;  %v2745_v42 = vld [vmem:[#allocation3 + $0x28] sm:$0xff] }
 0xaad   : > { %v2881_v3 = vpop.xlane.xlu0 %2880 }
 0xab0   : > { %2923 = vperm.xlu1 %4460, %v6274_v20  }
 0xab5   : > { %v2878_v44 = vpop.xlane.xlu1 %2877  ;;  %v2890_v25 = vpop.xlane.xlu0 %2889 }
 0xab7   : > { %v6281_v61 = vpop.xlane.xlu2 %2892 }
 0xab8   : > { %2943 = vperm.xlu1 %4460, %v6279_v2  }
 0xabd   : > { %v2887_v21 = vpop.xlane.xlu1 %2886 }
 0xabe   : > { %v2903_v57 = vadd.f32 %v2887_v21, %v2871_v23 }
 0xabf   : > { %v2842_v53 = vpop.permute.xlu2 %2841 }
 0xac0   : > { %v2851_v12 = vsub.f32 %v6146_v17, %v2842_v53  ;;  %3077 = vst.msk [vmem:[#allocation2 + $0x38] sm:$0xff] %vm3061_vm7, %v2842_v53  ;;  %2968 = vrot.lane.b32.xlu1 %v5997_v15, %s4806_s6  ;;  %v2792_v17 = vmul.f32 1.442695, %v2782_v9  ;;  %v2796_v15 = vmul.f32 1.442695, %v2784_v18  ;;  %v2873_v18 = vmul.f32 %v6279_v2, %v2745_v42  ;;  %v2908_v2 = vld [vmem:[#allocation4] sm:$0xff] }
 0xac2   : > { %v2866_v62 = vmul.f32 1.442695, %v2851_v12  ;;  %v2744_v12 = vld [vmem:[#allocation3 + $0x20] sm:$0xff] }
 0xac4   : > { %4658 = vpow2.f32 %v2866_v62  ;;  %v2746_v62 = vld [vmem:[#allocation3 + $0x30] sm:$0xff] }
 0xac5   : > { %4660 = vpow2.f32 %v2792_v17 }
 0xac6   : > { %4662 = vpow2.f32 %v2796_v15  ;;  %v2905_v15 = vadd.f32 %v6281_v61, %v2873_v18 }
 0xac7   : > { %v6313_v28 = vpop.permute.xlu2 %2918 }
 0xac8   : > { %2974 = vrot.lane.b32.xlu1 %v6007_v40, %s4806_s6  ;;  %v2787_v40 = vsub.f32 %v2739_v11, %v2779_v4  ;;  %v2956_v61 = vmul.f32 %v6313_v28, %v2908_v2  ;;  %v4762_v2 = vld [vmem:[%s4860_s19] sm:$0xff] }
 0xaca   : > { %v4659_v0 = vpop.eup %4658  ;;  %v2802_v50 = vmul.f32 1.442695, %v2787_v40 }
 0xacb   : > { %v2897_v60 = vsel %vm453_vm1, %v4659_v0, 0.0  ;;  %v2967_v1 = vpack.c.bf16 %v4659_v0, %v6266_v30  ;;  %v6296_v32 = vpop.eup %4660  ;;  %v2742_v0 = vld [vmem:[#allocation3 + $0x10] sm:$0xff] }
 0xacc   : > { %2898 = vadd.xlane.f32.xlu0 %v2897_v60  ;;  %v6299_v45 = vpop.eup %4662  ;;  %4664 = vpow2.f32 %v2802_v50  ;;  %v2874_v60 = vmul.f32 %v6259_v7, %v2746_v62  ;;  %v2747_v7 = vld [vmem:[#allocation3 + $0x38] sm:$0xff] }
 0xacf   : > { %v6317_v4 = vpop.permute.xlu2 %2933 }
 0xad2   : > { %v6302_v33 = vpop.eup %4664 }
 0xad7   : > { %v6323_v34 = vpop.permute.xlu2 %2948 }
 0xadf   : > { %v2971_v22 = vpop.permute.xlu2 %2970 }
 0xae0   : > { %2928 = vperm.xlu0 %4461, %v6296_v32  }
 0xae8   : > { %2938 = vperm.xlu0 %4461, %v6299_v45  }
 0xaf0   : > { %2953 = vperm.xlu0 %4461, %v6302_v33  }
 0xaf8   : > { %2972 = vrot.lane.b32.xlu0 %v5992_v43, %s4806_s6 }
 0xb0a   : > { %v2896_v39 = vpop.xlane.xlu1 %2895 }
 0xb0b   : > { %v2906_v17 = vadd.f32 %v2896_v39, %v2874_v60  ;;  %v2910_v39 = vld [vmem:[#allocation4 + $0x10] sm:$0xff] }
 0xb22   : > { %v6307_v13 = vpop.permute.xlu1 %2923 }
 0xb2a   : > { %v6309_v41 = vpop.permute.xlu1 %2943 }
 0xb32   : > { %v2969_v51 = vpop.permute.xlu1 %2968 }
 0xb3a   : > { %v2975_v19 = vpop.permute.xlu1 %2974 }
 0xb3b   : > { %2996 = vmatpush.bf16.msra.mxu2 %v2975_v19  ;;  %v2914_v19 = vld [vmem:[#allocation4 + $0x30] sm:$0xff] }
 0xb3f   : > { %v6311_v37 = vpop.xlane.xlu0 %2898 }
 0xb52   : > { %v6315_v11 = vpop.permute.xlu0 %2928 }
 0xb5a   : > { %v6319_v43 = vpop.permute.xlu0 %2938 }
 0xb62   : > { %v6321_v8 = vpop.permute.xlu0 %2953 }
 0xb6a   : > { %v2973_v27 = vpop.permute.xlu0 %2972 }
 0xb6b   : > { %2997 = vmatpush.bf16.msra.mxu2 %v2973_v27 }
 0xb6f   : > { %2998 = vmatpush.bf16.msra.mxu2 %v2971_v22 }
 0xb73   : > { %2999 = vmatpush.bf16.msra.mxu2 %v2969_v51 }
 0xb76   : > { %4335 = vmatmul.msk.bf16.vlgmr.msra.gmra.mxu2 %vm453_vm1, %v2964_v58 }
 0xb86   : > { %4336 = vmatmul.msk.bf16.gmra.mxu2 %vm453_vm1, %v2965_v49  ;;  %v2868_v49 = vmul.f32 %v6253_v6, %v2740_v48  ;;  %v2872_v6 = vmul.f32 %v6299_v45, %v2744_v12 }
 0xb88   : > { %v2900_v5 = vadd.f32 %v2878_v44, %v2868_v49  ;;  %v2904_v9 = vadd.f32 %v2890_v25, %v2872_v6 }
 0xb96   : > { %4337 = vmatmul.msk.bf16.gmra.mxu2 %vm453_vm1, %v2966_v29  ;;  %v2741_v29 = vld [vmem:[#allocation3 + $0x8] sm:$0xff] }
 0xb97   : > { %v2869_v63 = vmul.f32 %v6274_v20, %v2741_v29 }
 0xb99   : > { %v2901_v55 = vadd.f32 %v2881_v3, %v2869_v63  ;;  %v2958_v3 = vmul.f32 %v6315_v11, %v2910_v39  ;;  %v4812_v39 = vmov 24  }
 0xba6   : > { %4338 = vmatmul.msk.bf16.gmra.mxu2 %vm453_vm1, %v2967_v1  ;;  %v2870_v1 = vmul.f32 %v6296_v32, %v2742_v0 }
 0xba8   : > { %v2902_v20 = vadd.f32 %v6276_v38, %v2870_v1  ;;  %v2875_v38 = vmul.f32 %v6302_v33, %v2747_v7  ;;  %v4759_v7 = vld [vmem:[%s4884_s26 + $0x8] sm:$0xff] }
 0xbaa   : > { %v2907_v32 = vadd.f32 %v6311_v37, %v2875_v38  ;;  %v2962_v37 = vmul.f32 %v6323_v34, %v2914_v19  ;;  %v4760_v38 = vld [vmem:[%s4884_s26] sm:$0xff] }
 0xbf9   : > { %v3001_v35 = vpop.f32.mrf.mxu2 }
 0xbfa   : > { %3029 = vrot.lane.b32.xlu2 %v3001_v35, %s4809_s8 }
 0xc01   : > { %v3003_v14 = vpop.f32.mrf.mxu2 }
 0xc02   : > { %3031 = vrot.lane.b32.xlu0 %v3003_v14, %s4809_s8 }
 0xc09   : > { %v3006_v16 = vpop.f32.mrf.mxu2 }
 0xc0a   : > { %3033 = vrot.lane.b32.xlu1 %v3006_v16, %s4809_s8 }
 0xc11   : > { %v3008_v10 = vpop.f32.mrf.mxu2 }
 0xc12   : > { %3035 = vrot.lane.b32.xlu2 %v3008_v10, %s4809_s8 }
 0xc19   : > { %v3011_v30 = vpop.f32.mrf.mxu2 }
 0xc1a   : > { %3037 = vrot.lane.b32.xlu0 %v3011_v30, %s4809_s8  ;;  %v2915_v30 = vld [vmem:[#allocation4 + $0x38] sm:$0xff] }
 0xc21   : > { %v3013_v54 = vpop.f32.mrf.mxu2 }
 0xc22   : > { %3039 = vrot.lane.b32.xlu1 %v3013_v54, %s4809_s8  ;;  %v2963_v54 = vmul.f32 %v6321_v8, %v2915_v30 }
 0xc29   : > { %v3016_v46 = vpop.f32.mrf.mxu2 }
 0xc2a   : > { %3080 = vperm.xlu1 %4460, %v2900_v5   ;;  %3041 = vrot.lane.b32.xlu2 %v3016_v46, %s4809_s8 }
 0xc31   : > { %v3018_v53 = vpop.f32.mrf.mxu2 }
 0xc32   : > { %3095 = vperm.xlu1 %4460, %v2903_v57   ;;  %3085 = vperm.xlu2 %4459, %v2901_v55  }
 0xc33   : > { %3043 = vrot.lane.b32.xlu0 %v3018_v53, %s4809_s8 }
 0xc3a   : > { %3110 = vperm.xlu1 %4460, %v2906_v17   ;;  %3100 = vperm.xlu2 %4459, %v2904_v9  }
 0xc3b   : > { %3090 = vperm.xlu0 %4461, %v2902_v20  }
 0xc42   : > { %3138 = vrot.lane.b32.xlu1 %v6026_v52, %s4810_s9  ;;  %3140 = vrot.lane.b32.xlu2 %v6047_v31, %s4810_s9 }
 0xc43   : > { %3105 = vperm.xlu0 %4461, %v2905_v15   ;;  %4462 = vset.pattern.permute.xlu2 %v4812_v39 }
 0xc44   : > { %4464 = vset.pattern.permute.xlu1 %v4812_v39 }
 0xc4a   : > { %3136 = vrot.lane.b32.xlu2 %v5960_v59, %s4810_s9  ;;  %3128 = vrot.lane.b32.xlu1 %v6021_v47, %s4810_s9  ;;  %v6365_v59 = vld [vmem:[%s4860_s19 + $0x10] sm:$0xff]  ;;  %v2911_v47 = vld [vmem:[#allocation4 + $0x18] sm:$0xff] }
 0xc4b   : > { %3115 = vperm.xlu0 %4461, %v2907_v32   ;;  %v4761_v32 = vld [vmem:[%s4860_s19 + $0x8] sm:$0xff] }
 0xc52   : > { %3134 = vrot.lane.b32.xlu2 %v6036_v26, %s4810_s9  ;;  %3132 = vrot.lane.b32.xlu1 %v6013_v36, %s4810_s9  ;;  %v2959_v26 = vmul.f32 %v6317_v4, %v2911_v47  ;;  %v2909_v36 = vld [vmem:[#allocation4 + $0x8] sm:$0xff]  ;;  %v2912_v4 = vld [vmem:[#allocation4 + $0x20] sm:$0xff] }
 0xc53   : > { %3126 = vrot.lane.b32.xlu0 %v6002_v56, %s4810_s9  ;;  %v2957_v44 = vmul.f32 %v6307_v13, %v2909_v36  ;;  %v2960_v11 = vmul.f32 %v6319_v43, %v2912_v4 }
 0xc54   : > { %v3030_v40 = vpop.permute.xlu2 %3029  ;;  %4463 = vset.pattern.permute.xlu0 %v4812_v39 }
 0xc55   : > { %v3053_v50 = vadd.f32 %v3030_v40, %v2956_v61  ;;  %v4763_v61 = vld [vmem:[%s4860_s19 + $0x18] sm:$0xff]  ;;  %s6884_s19 = scalar_lea.vmem %s6921_s3, %s4854_s16 }
 0xc57   : > { %3062 = vst.msk [vmem:[#allocation4] sm:$0xff] %vm3061_vm7, %v3053_v50 }
 0xc5a   : > { %3603 = vrot.lane.b32.xlu1 %v6047_v31, %s4811_s10  ;;  %v2913_v31 = vld [vmem:[#allocation4 + $0x28] sm:$0xff] }
 0xc5b   : > { %3130 = vrot.lane.b32.xlu0 %v6365_v59, %s4810_s9  ;;  %v2961_v34 = vmul.f32 %v6309_v41, %v2913_v31  ;;  %v6471_v31 = vld [vmem:[#allocation2 + $0x18] sm:$0xff] }
 0xc62   : > { %3601 = vrot.lane.b32.xlu1 %v6026_v52, %s4811_s10 }
 0xc6c   : > { %v3036_v45 = vpop.permute.xlu2 %3035 }
 0xc6d   : > { %v3056_v33 = vadd.f32 %v3036_v45, %v2959_v26 }
 0xc6f   : > { %3065 = vst.msk [vmem:[#allocation4 + $0x18] sm:$0xff] %vm3061_vm7, %v3056_v33 }
 0xc74   : > { %v3032_v56 = vpop.permute.xlu0 %3031 }
 0xc75   : > { %v3054_v21 = vadd.f32 %v3032_v56, %v2957_v44 }
 0xc77   : > { %3063 = vst.msk [vmem:[#allocation4 + $0x8] sm:$0xff] %vm3061_vm7, %v3054_v21 }
 0xc7c   : > { %v3034_v51 = vpop.permute.xlu1 %3033 }
 0xc7d   : > { %v3055_v25 = vadd.f32 %v3034_v51, %v2958_v3  ;;  %v6452_v51 = vld [vmem:[#allocation2] sm:$0xff] }
 0xc7f   : > { %3064 = vst.msk [vmem:[#allocation4 + $0x10] sm:$0xff] %vm3061_vm7, %v3055_v25 }
 0xc84   : > { %v3042_v28 = vpop.permute.xlu2 %3041 }
 0xc85   : > { %v3059_v13 = vadd.f32 %v3042_v28, %v2962_v37  ;;  %v6458_v28 = vld [vmem:[#allocation2 + $0x8] sm:$0xff] }
 0xc87   : > { %3068 = vst.msk [vmem:[#allocation4 + $0x30] sm:$0xff] %vm3061_vm7, %v3059_v13 }
 0xc8c   : > { %v3038_v27 = vpop.permute.xlu0 %3037  ;;  %v3086_v22 = vpop.permute.xlu2 %3085 }
 0xc8d   : > { %v3057_v58 = vadd.f32 %v3038_v27, %v2960_v11  ;;  %3119 = vst.msk [vmem:[#allocation3 + $0x8] sm:$0xff] %vm3061_vm7, %v3086_v22  ;;  %v6465_v27 = vld [vmem:[#allocation2 + $0x10] sm:$0xff] }
 0xc8f   : > { %3066 = vst.msk [vmem:[#allocation4 + $0x20] sm:$0xff] %vm3061_vm7, %v3057_v58 }
 0xc94   : > { %v3040_v35 = vpop.permute.xlu1 %3039  ;;  %v3101_v14 = vpop.permute.xlu2 %3100 }
 0xc95   : > { %v3058_v16 = vadd.f32 %v3040_v35, %v2961_v34  ;;  %3122 = vst.msk [vmem:[#allocation3 + $0x20] sm:$0xff] %vm3061_vm7, %v3101_v14 }
 0xc97   : > { %3067 = vst.msk [vmem:[#allocation4 + $0x28] sm:$0xff] %vm3061_vm7, %v3058_v16 }
 0xc9c   : > { %v3081_v52 = vpop.permute.xlu1 %3080  ;;  %v3141_v10 = vpop.permute.xlu2 %3140 }
 0xc9d   : > { %3118 = vst.msk [vmem:[#allocation3] sm:$0xff] %vm3061_vm7, %v3081_v52  ;;  %v3164_v43 = vsel %vm383_vm0, %v3141_v10, 0 }
 0xc9e   : > { %3170 = vmatpush.bf16.xpose.msrb.mxu1 %v3164_v43 }
 0xca4   : > { %v3096_v48 = vpop.permute.xlu1 %3095  ;;  %v3137_v8 = vpop.permute.xlu2 %3136 }
 0xca5   : > { %3121 = vst.msk [vmem:[#allocation3 + $0x18] sm:$0xff] %vm3061_vm7, %v3096_v48  ;;  %v3044_v41 = vpop.permute.xlu0 %3043  ;;  %v3158_v23 = vsel %vm383_vm0, %v3137_v8, 0 }
 0xca6   : > { %v3060_v49 = vadd.f32 %v3044_v41, %v2963_v54  ;;  %v6481_v54 = vld [vmem:[#allocation2 + $0x20] sm:$0xff] }
 0xca8   : > { %3069 = vst.msk [vmem:[#allocation4 + $0x38] sm:$0xff] %vm3061_vm7, %v3060_v49 }
 0xcac   : > { %v3111_v5 = vpop.permute.xlu1 %3110  ;;  %v3135_v57 = vpop.permute.xlu2 %3134 }
 0xcad   : > { %3124 = vst.msk [vmem:[#allocation3 + $0x30] sm:$0xff] %vm3061_vm7, %v3111_v5  ;;  %v3091_v46 = vpop.permute.xlu0 %3090  ;;  %v3155_v53 = vsel %vm383_vm0, %v3135_v57, 0  ;;  %v6488_v5 = vld [vmem:[#allocation2 + $0x28] sm:$0xff] }
 0xcae   : > { %3120 = vst.msk [vmem:[#allocation3 + $0x10] sm:$0xff] %vm3061_vm7, %v3091_v46 }
 0xcb4   : > { %v3139_v29 = vpop.permute.xlu1 %3138 }
 0xcb5   : > { %v3161_v24 = vsel %vm383_vm0, %v3139_v29, 0  ;;  %v3106_v63 = vpop.permute.xlu0 %3105  ;;  %v6494_v29 = vld [vmem:[#allocation2 + $0x30] sm:$0xff] }
 0xcb6   : > { %3123 = vst.msk [vmem:[#allocation3 + $0x28] sm:$0xff] %vm3061_vm7, %v3106_v63  ;;  %3171 = vmatpush.bf16.xpose.msrb.mxu1 %v3161_v24 }
 0xcbc   : > { %v3129_v62 = vpop.permute.xlu1 %3128 }
 0xcbd   : > { %v3116_v55 = vpop.permute.xlu0 %3115 }
 0xcbe   : > { %3125 = vst.msk [vmem:[#allocation3 + $0x38] sm:$0xff] %vm3061_vm7, %v3116_v55  ;;  %3172 = vmatpush.bf16.xpose.msrb.mxu1 %v3158_v23 }
 0xcc4   : > { %v3133_v6 = vpop.permute.xlu1 %3132 }
 0xcc5   : > { %v3127_v12 = vpop.permute.xlu0 %3126 }
 0xcc6   : > { %3173 = vmatpush.bf16.xpose.msrb.mxu1 %v3155_v53 }
 0xccc   : > { %v3604_v50 = vpop.permute.xlu1 %3603 }
 0xccd   : > { %4339 = vmatmul.msk.bf16.vlgmr.msrb.gmra.mxu1 %vm383_vm0, %v3127_v12  ;;  %v3131_v0 = vpop.permute.xlu0 %3130  ;;  %v3627_v26 = vsel %vm383_vm0, %v3604_v50, 0 }
 0xcce   : > { %3633 = vmatpush.bf16.xpose.msrb.mxu0 %v3627_v26 }
 0xcd4   : > { %v3602_v45 = vpop.permute.xlu1 %3601 }
 0xcd5   : > { %v3624_v33 = vsel %vm383_vm0, %v3602_v45, 0 }
 0xcd6   : > { %3634 = vmatpush.bf16.xpose.msrb.mxu0 %v3624_v33 }
 0xcdd   : > { %4340 = vmatmul.msk.bf16.gmra.mxu1 %vm383_vm0, %v3129_v62 }
 0xced   : > { %4341 = vmatmul.msk.bf16.gmra.mxu1 %vm383_vm0, %v3131_v0 }
 0xcfd   : > { %4342 = vmatmul.msk.bf16.gmra.mxu1 %vm383_vm0, %v3133_v6 }
 0xd4a   : > { %v6403_v60 = vpop.f32.mrf.mxu1 }
 0xd4b   : > { %v3211_v1 = vsel %vm453_vm1, %v6403_v60, -inf }
 0xd4c   : > { %3212 = vmax.xlane.f32.xlu2 %v3211_v1 }
 0xd52   : > { %v6407_v9 = vpop.f32.mrf.mxu1 }
 0xd53   : > { %v3214_v17 = vsel %vm453_vm1, %v6407_v9, -inf }
 0xd54   : > { %3215 = vmax.xlane.f32.xlu0 %v3214_v17 }
 0xd5a   : > { %v6411_v20 = vpop.f32.mrf.mxu1 }
 0xd5b   : > { %v3217_v42 = vsel %vm453_vm1, %v6411_v20, -inf }
 0xd5c   : > { %3218 = vmax.xlane.f32.xlu1 %v3217_v42 }
 0xd62   : > { %v6415_v18 = vpop.f32.mrf.mxu1 }
 0xd63   : > { %v3220_v15 = vsel %vm453_vm1, %v6415_v18, -inf }
 0xd64   : > { %3599 = vrot.lane.b32.xlu2 %v4759_v7, %s4811_s10  ;;  %3221 = vmax.xlane.f32.xlu1 %v3220_v15 }
 0xd68   : > { %3597 = vrot.lane.b32.xlu0 %v4760_v38, %s4811_s10 }
 0xd6a   : > { %v6431_v40 = vpop.f32.mrf.mxu1 }
 0xd6b   : > { %v3223_v44 = vsel %vm453_vm1, %v6431_v40, -inf }
 0xd6c   : > { %3591 = vrot.lane.b32.xlu2 %v4761_v32, %s4811_s10 }
 0xd70   : > { %3589 = vrot.lane.b32.xlu0 %v4762_v2, %s4811_s10 }
 0xd72   : > { %v6433_v47 = vpop.f32.mrf.mxu1 }
 0xd74   : > { %3595 = vrot.lane.b32.xlu2 %v4763_v61, %s4811_s10 }
 0xd7a   : > { %v6437_v36 = vpop.f32.mrf.mxu1 }
 0xd7b   : > { %v3229_v3 = vsel %vm453_vm1, %v6437_v36, -inf }
 0xd7d   : > { %3593 = vrot.lane.b32.xlu1 %v6365_v59, %s4811_s10  ;;  %v3226_v59 = vsel %vm453_vm1, %v6433_v47, -inf }
 0xd82   : > { %v6443_v56 = vpop.f32.mrf.mxu1 }
 0xd83   : > { %v3232_v21 = vsel %vm453_vm1, %v6443_v56, -inf }
 0xd9a   : > { %3224 = vmax.xlane.f32.xlu0 %v3223_v44 }
 0xd9d   : > { %3227 = vmax.xlane.f32.xlu2 %v3226_v59 }
 0xda2   : > { %3233 = vmax.xlane.f32.xlu0 %v3232_v21 }
 0xda7   : > { %3230 = vmax.xlane.f32.xlu1 %v3229_v3 }
 0xdbf   : > { %v3213_v25 = vpop.xlane.xlu2 %3212 }
 0xdc0   : > { %v6455_v19 = vmax.f32 %v6452_v51, %v3213_v25 }
 0xdc2   : > { %3269 = vperm.xlu2 %4462, %v6455_v19  }
 0xdc7   : > { %v3600_v37 = vpop.permute.xlu2 %3599  ;;  %v3216_v13 = vpop.xlane.xlu0 %3215 }
 0xdc8   : > { %v3621_v4 = vsel %vm383_vm0, %v3600_v37, 0  ;;  %v6462_v11 = vmax.f32 %v6458_v28, %v3216_v13 }
 0xdc9   : > { %3635 = vmatpush.bf16.xpose.msrb.mxu0 %v3621_v4 }
 0xdca   : > { %3274 = vperm.xlu0 %4463, %v6462_v11  }
 0xdcf   : > { %v3219_v22 = vpop.xlane.xlu1 %3218  ;;  %v3592_v10 = vpop.permute.xlu2 %3591 }
 0xdd0   : > { %v6468_v58 = vmax.f32 %v6465_v27, %v3219_v22  ;;  %v3243_v22 = vsub.f32 %v6452_v51, %v6455_v19 }
 0xdd2   : > { %3279 = vperm.xlu1 %4464, %v6468_v58  }
 0xdd7   : > { %v3222_v34 = vpop.xlane.xlu1 %3221  ;;  %v3596_v30 = vpop.permute.xlu2 %3595 }
 0xdd8   : > { %v6474_v35 = vmax.f32 %v6471_v31, %v3222_v34 }
 0xdda   : > { %3284 = vperm.xlu2 %4462, %v6474_v35   ;;  %v3598_v14 = vpop.permute.xlu0 %3597 }
 0xddb   : > { %v3618_v16 = vsel %vm383_vm0, %v3598_v14, 0 }
 0xddc   : > { %3636 = vmatpush.bf16.xpose.msrb.mxu0 %v3618_v16  ;;  %v3251_v16 = vmul.f32 1.442695, %v3243_v22 }
 0xde2   : > { %v3590_v52 = vpop.permute.xlu0 %3589 }
 0xde3   : > { %4347 = vmatmul.msk.bf16.vlgmr.msrb.gmra.mxu0 %vm383_vm0, %v3590_v52  ;;  %v6548_v52 = vld [vmem:[#allocation2 + $0x38] sm:$0xff] }
 0xdef   : > { %v3594_v43 = vpop.permute.xlu1 %3593 }
 0xdf3   : > { %4348 = vmatmul.msk.bf16.gmra.mxu0 %vm383_vm0, %v3592_v10 }
 0xe03   : > { %4349 = vmatmul.msk.bf16.gmra.mxu0 %vm383_vm0, %v3594_v43 }
 0xe0d   : > { %v3225_v48 = vpop.xlane.xlu0 %3224 }
 0xe0e   : > { %v6484_v41 = vmax.f32 %v6481_v54, %v3225_v48 }
 0xe10   : > { %3289 = vperm.xlu2 %4462, %v6484_v41   ;;  %v3228_v49 = vpop.xlane.xlu2 %3227 }
 0xe11   : > { %v6491_v46 = vmax.f32 %v6488_v5, %v3228_v49  ;;  %v4764_v49 = vld [vmem:[%s4872_s22 + $0x10] sm:$0xff] }
 0xe13   : > { %4350 = vmatmul.msk.bf16.gmra.mxu0 %vm383_vm0, %v3596_v30 }
 0xe15   : > { %v3234_v57 = vpop.xlane.xlu0 %3233 }
 0xe16   : > { %v6551_v10 = vmax.f32 %v6548_v52, %v3234_v57 }
 0xe18   : > { %3294 = vperm.xlu2 %4462, %v6491_v46  }
 0xe1a   : > { %v3231_v24 = vpop.xlane.xlu1 %3230 }
 0xe1b   : > { %v6497_v63 = vmax.f32 %v6494_v29, %v3231_v24 }
 0xe1c   : > { %v3270_v8 = vpop.permute.xlu2 %3269 }
 0xe1d   : > { %3533 = vst.msk [vmem:[#allocation2] sm:$0xff] %vm3524_vm8, %v3270_v8  ;;  %3299 = vperm.xlu0 %4463, %v6497_v63   ;;  %v3307_v23 = vsub.f32 %v6403_v60, %v3270_v8  ;;  %v3244_v8 = vsub.f32 %v6458_v28, %v6462_v11  ;;  %v4767_v28 = vld [vmem:[%s4872_s22 + $0x18] sm:$0xff] }
 0xe1f   : > { %v3315_v55 = vmul.f32 1.442695, %v3307_v23  ;;  %v3253_v23 = vmul.f32 1.442695, %v3244_v8 }
 0xe21   : > { %4666 = vpow2.f32 %v3315_v55 }
 0xe27   : > { %v6504_v6 = vpop.eup %4666 }
 0xe28   : > { %v3339_v60 = vsel %vm453_vm1, %v6504_v6, 0.0 }
 0xe34   : > { %v3285_v53 = vpop.permute.xlu2 %3284 }
 0xe35   : > { %3536 = vst.msk [vmem:[#allocation2 + $0x18] sm:$0xff] %vm3524_vm8, %v3285_v53  ;;  %v3310_v12 = vsub.f32 %v6415_v18, %v3285_v53  ;;  %v4765_v53 = vld [vmem:[%s4872_s22 + $0x8] sm:$0xff] }
 0xe37   : > { %v3321_v62 = vmul.f32 1.442695, %v3310_v12 }
 0xe39   : > { %4668 = vpow2.f32 %v3321_v62 }
 0xe3c   : > { %v3275_v0 = vpop.permute.xlu0 %3274 }
 0xe3d   : > { %v3308_v1 = vsub.f32 %v6407_v9, %v3275_v0  ;;  %3534 = vst.msk [vmem:[#allocation2 + $0x8] sm:$0xff] %vm3524_vm8, %v3275_v0  ;;  %v6585_v0 = vld [vmem:[%s4872_s22] sm:$0xff] }
 0xe3f   : > { %v3317_v17 = vmul.f32 1.442695, %v3308_v1  ;;  %v6510_v15 = vpop.eup %4668  ;;  %v6940_v1 = vmov 28  }
 0xe40   : > { %v3348_v32 = vsel %vm453_vm1, %v6510_v15, 0.0  ;;  %4467 = vset.pattern.permute.xlu0 %v6940_v1 }
 0xe41   : > { %4670 = vpow2.f32 %v3317_v17  ;;  %3340 = vadd.xlane.f32.xlu2 %v3339_v60 }
 0xe44   : > { %v3280_v42 = vpop.permute.xlu1 %3279 }
 0xe45   : > { %v3309_v18 = vsub.f32 %v6411_v20, %v3280_v42  ;;  %3535 = vst.msk [vmem:[#allocation2 + $0x10] sm:$0xff] %vm3524_vm8, %v3280_v42 }
 0xe47   : > { %v6514_v7 = vpop.eup %4670  ;;  %v3319_v38 = vmul.f32 1.442695, %v3309_v18 }
 0xe48   : > { %v3427_v9 = vpack.c.bf16 %v6514_v7, %v6504_v6  ;;  %v3342_v2 = vsel %vm453_vm1, %v6514_v7, 0.0  ;;  %v3245_v6 = vsub.f32 %v6465_v27, %v6468_v58 }
 0xe49   : > { %4672 = vpow2.f32 %v3319_v38  ;;  %3349 = vadd.xlane.f32.xlu2 %v3348_v32  ;;  %3343 = vadd.xlane.f32.xlu0 %v3342_v2 }
 0xe4f   : > { %v6522_v61 = vpop.eup %4672 }
 0xe50   : > { %v3345_v20 = vsel %vm453_vm1, %v6522_v61, 0.0  ;;  %v3428_v50 = vpack.c.bf16 %v6510_v15, %v6522_v61  ;;  %v3247_v15 = vsub.f32 %v6481_v54, %v6484_v41  ;;  %v3249_v61 = vsub.f32 %v6494_v29, %v6497_v63 }
 0xe51   : > { %3346 = vadd.xlane.f32.xlu1 %v3345_v20  ;;  %v3248_v54 = vsub.f32 %v6488_v5, %v6491_v46 }
 0xe52   : > { %v3259_v27 = vmul.f32 1.442695, %v3247_v15 }
 0xe53   : > { %v3261_v41 = vmul.f32 1.442695, %v3248_v54 }
 0xe60   : > { %v6546_v14 = vpop.f32.mrf.mxu0 }
 0xe61   : > { %v3674_v30 = vsel %vm453_vm1, %v6546_v14, -inf }
 0xe68   : > { %v6558_v51 = vpop.f32.mrf.mxu0 }
 0xe6a   : > { %v3290_v26 = vpop.permute.xlu2 %3289 }
 0xe6b   : > { %v3311_v45 = vsub.f32 %v6431_v40, %v3290_v26  ;;  %3537 = vst.msk [vmem:[#allocation2 + $0x20] sm:$0xff] %vm3524_vm8, %v3290_v26 }
 0xe6d   : > { %v3323_v33 = vmul.f32 1.442695, %v3311_v45  ;;  %v6610_v45 = vld [vmem:[#allocation2] sm:$0xff] }
 0xe6f   : > { %4674 = vpow2.f32 %v3323_v33 }
 0xe70   : > { %v6565_v48 = vpop.f32.mrf.mxu0 }
 0xe71   : > { %v3680_v24 = vsel %vm453_vm1, %v6565_v48, -inf }
 0xe72   : > { %v3295_v44 = vpop.permute.xlu2 %3294 }
 0xe73   : > { %v3312_v59 = vsub.f32 %v6433_v47, %v3295_v44  ;;  %3538 = vst.msk [vmem:[#allocation2 + $0x28] sm:$0xff] %vm3524_vm8, %v3295_v44 }
 0xe75   : > { %v6532_v21 = vpop.eup %4674  ;;  %v3325_v3 = vmul.f32 1.442695, %v3312_v59 }
 0xe76   : > { %v3351_v25 = vsel %vm453_vm1, %v6532_v21, 0.0 }
 0xe77   : > { %4676 = vpow2.f32 %v3325_v3  ;;  %3352 = vadd.xlane.f32.xlu0 %v3351_v25 }
 0xe78   : > { %v6576_v57 = vpop.f32.mrf.mxu0 }
 0xe79   : > { %v3683_v3 = vsel %vm453_vm1, %v6576_v57, -inf }
 0xe7a   : > { %v6702_v7 = vld [vmem:[#allocation2 + $0x28] sm:$0xff] }
 0xe7d   : > { %v6536_v37 = vpop.eup %4676 }
 0xe7e   : > { %v3354_v40 = vsel %vm453_vm1, %v6536_v37, 0.0  ;;  %v3429_v13 = vpack.c.bf16 %v6536_v37, %v6532_v21 }
 0xe7f   : > { %3355 = vadd.xlane.f32.xlu1 %v3354_v40 }
 0xe80   : > { %v6580_v12 = vpop.f32.mrf.mxu0 }
 0xe81   : > { %v3686_v62 = vsel %vm453_vm1, %v6580_v12, -inf }
 0xe8f   : > { %v3300_v47 = vpop.permute.xlu0 %3299 }
 0xe90   : > { %v3313_v4 = vsub.f32 %v6437_v36, %v3300_v47  ;;  %3539 = vst.msk [vmem:[#allocation2 + $0x30] sm:$0xff] %vm3524_vm8, %v3300_v47  ;;  %v6623_v47 = vpop.f32.mrf.mxu0 }
 0xe92   : > { %v3327_v34 = vmul.f32 1.442695, %v3313_v4 }
 0xe94   : > { %4678 = vpow2.f32 %v3327_v34 }
 0xe95   : > { %4680 = vpow2.f32 %v3251_v16 }
 0xe96   : > { %4682 = vpow2.f32 %v3253_v23 }
 0xe97   : > { %v6716_v58 = vld [vmem:[#allocation2 + $0x30] sm:$0xff] }
 0xe98   : > { %3304 = vperm.xlu1 %4464, %v6551_v10   ;;  %v6626_v22 = vpop.f32.mrf.mxu0 }
 0xe9a   : > { %v6554_v36 = vpop.eup %4678 }
 0xe9b   : > { %v3357_v43 = vsel %vm453_vm1, %v6554_v36, 0.0  ;;  %v6560_v19 = vpop.eup %4680 }
 0xe9c   : > { %3358 = vadd.xlane.f32.xlu2 %v3357_v43  ;;  %v6573_v55 = vpop.eup %4682 }
 0xea0   : > { %3381 = vperm.xlu1 %4464, %v6560_v19   ;;  %v6628_v16 = vpop.f32.mrf.mxu0 }
 0xea1   : > { %v3695_v43 = vsel %vm453_vm1, %v6628_v16, -inf }
 0xea4   : > { %3675 = vmax.xlane.f32.xlu2 %v3674_v30  ;;  %v3689_v30 = vsel %vm453_vm1, %v6623_v47, -inf }
 0xea8   : > { %3435 = vrot.lane.b32.xlu1 %v4764_v49, %s4810_s9 }
 0xea9   : > { %4466 = vset.pattern.permute.xlu1 %v6940_v1 }
 0xeac   : > { %3681 = vmax.xlane.f32.xlu2 %v3680_v24 }
 0xeb4   : > { %v6596_v17 = vpop.xlane.xlu2 %3340 }
 0xebc   : > { %v6600_v42 = vpop.xlane.xlu2 %3349  ;;  %v6640_v8 = vpop.xlane.xlu0 %3343 }
 0xec4   : > { %3386 = vperm.xlu2 %4462, %v6573_v55   ;;  %v6591_v11 = vpop.xlane.xlu1 %3346 }
 0xecc   : > { %3433 = vrot.lane.b32.xlu2 %v4765_v53, %s4810_s9 }
 0xecd   : > { %4465 = vset.pattern.permute.xlu2 %v6940_v1 }
 0xed2   : > { %3687 = vmax.xlane.f32.xlu1 %v3686_v62 }
 0xed4   : > { %3431 = vrot.lane.b32.xlu2 %v6585_v0, %s4810_s9 }
 0xedc   : > { %3900 = vrot.lane.b32.xlu2 %v4767_v28, %s4811_s10 }
 0xeea   : > { %v6643_v23 = vpop.xlane.xlu0 %3352 }
 0xef2   : > { %v6598_v60 = vpop.xlane.xlu1 %3355 }
 0xf0a   : > { %v3305_v18 = vpop.permute.xlu1 %3304 }
 0xf0b   : > { %v3314_v38 = vsub.f32 %v6443_v56, %v3305_v18  ;;  %3540 = vst.msk [vmem:[#allocation2 + $0x38] sm:$0xff] %vm3524_vm8, %v3305_v18  ;;  %v3677_v56 = vsel %vm453_vm1, %v6558_v51, -inf }
 0xf0d   : > { %v3329_v32 = vmul.f32 1.442695, %v3314_v38 }
 0xf0f   : > { %4684 = vpow2.f32 %v3329_v32  ;;  %v6604_v2 = vpop.xlane.xlu2 %3358 }
 0xf15   : > { %v6606_v20 = vpop.eup %4684 }
 0xf16   : > { %v3360_v26 = vsel %vm453_vm1, %v6606_v20, 0.0  ;;  %v3430_v21 = vpack.c.bf16 %v6606_v20, %v6554_v36 }
 0xf17   : > { %3361 = vadd.xlane.f32.xlu0 %v3360_v26  ;;  %v3676_v33 = vpop.xlane.xlu2 %3675  ;;  %v6653_v26 = vpop.permute.xlu1 %3381 }
 0xf18   : > { %v6613_v44 = vmax.f32 %v6610_v45, %v3676_v33  ;;  %v6655_v33 = vld [vmem:[#allocation2 + $0x18] sm:$0xff] }
 0xf1a   : > { %3732 = vperm.xlu2 %4465, %v6613_v44  }
 0xf1f   : > { %3678 = vmax.xlane.f32.xlu0 %v3677_v56  ;;  %v3682_v59 = vpop.xlane.xlu2 %3681 }
 0xf22   : > { %3898 = vrot.lane.b32.xlu2 %v4764_v49, %s4811_s10  ;;  %v3692_v49 = vsel %vm453_vm1, %v6626_v22, -inf }
 0xf27   : > { %3684 = vmax.xlane.f32.xlu0 %v3683_v3  ;;  %v6621_v25 = vpop.permute.xlu2 %3386  ;;  %v3436_v3 = vpop.permute.xlu1 %3435 }
 0xf2f   : > { %v3434_v40 = vpop.permute.xlu2 %3433 }
 0xf37   : > { %v3432_v4 = vpop.permute.xlu2 %3431 }
 0xf3b   : > { %3437 = vrot.lane.b32.xlu0 %v4767_v28, %s4810_s9  ;;  %v6647_v28 = vld [vmem:[#allocation2 + $0x8] sm:$0xff] }
 0xf3f   : > { %v3901_v34 = vpop.permute.xlu2 %3900 }
 0xf40   : > { %3922 = vmatpush.bf16.msrb.mxu2 %v3901_v34  ;;  %v6663_v34 = vld [vmem:[#allocation2 + $0x10] sm:$0xff] }
 0xf4b   : > { %3696 = vmax.xlane.f32.xlu2 %v3695_v43  ;;  %v6666_v43 = vmax.f32 %v6663_v34, %v3682_v59  ;;  %v6681_v59 = vld [vmem:[#allocation2 + $0x38] sm:$0xff] }
 0xf65   : > { %3690 = vmax.xlane.f32.xlu0 %v3689_v30  ;;  %v3688_v30 = vpop.xlane.xlu1 %3687 }
 0xf6d   : > { %3693 = vmax.xlane.f32.xlu0 %v3692_v49  ;;  %v6669_v49 = vld [vmem:[#allocation2 + $0x20] sm:$0xff] }
 0xf74   : > { %v6636_v24 = vpop.permute.xlu2 %3732 }
 0xf75   : > { %3996 = vst.msk [vmem:[#allocation2] sm:$0xff] %vm3987_vm9, %v6636_v24  ;;  %v3770_v46 = vsub.f32 %v6546_v14, %v6636_v24 }
 0xf7c   : > { %v3899_v38 = vpop.permute.xlu2 %3898 }
 0xf7d   : > { %3923 = vmatpush.bf16.msrb.mxu2 %v3899_v38 }
 0xf81   : > { %3896 = vrot.lane.b32.xlu0 %v4765_v53, %s4811_s10 }
 0xf8a   : > { %v6645_v62 = vpop.xlane.xlu0 %3361 }
 0xf92   : > { %v3679_v18 = vpop.xlane.xlu0 %3678 }
 0xf93   : > { %v6650_v32 = vmax.f32 %v6647_v28, %v3679_v18  ;;  %v6672_v18 = vmax.f32 %v6669_v49, %v3688_v30 }
 0xf95   : > { %3737 = vperm.xlu1 %4466, %v6650_v32  }
 0xf9a   : > { %v3685_v56 = vpop.xlane.xlu0 %3684 }
 0xf9b   : > { %v6658_v53 = vmax.f32 %v6655_v33, %v3685_v56 }
 0xf9d   : > { %3894 = vrot.lane.b32.xlu1 %v6585_v0, %s4811_s10  ;;  %3747 = vperm.xlu0 %4467, %v6658_v53   ;;  %v3246_v0 = vsub.f32 %v6471_v31, %v6474_v35 }
 0xf9f   : > { %v3257_v30 = vmul.f32 1.442695, %v3246_v0 }
 0xfa1   : > { %4686 = vpow2.f32 %v3257_v30 }
 0xfa5   : > { %3742 = vperm.xlu1 %4466, %v6666_v43  }
 0xfa7   : > { %v6689_v31 = vpop.eup %4686 }
 0xfad   : > { %3752 = vperm.xlu1 %4466, %v6672_v18   ;;  %v3438_v38 = vpop.permute.xlu0 %3437 }
 0xfae   : > { %3459 = vmatpush.bf16.msrb.mxu3 %v3438_v38 }
 0xfb2   : > { %3460 = vmatpush.bf16.msrb.mxu3 %v3436_v3  ;;  %v3263_v3 = vmul.f32 1.442695, %v3249_v61 }
 0xfb6   : > { %3461 = vmatpush.bf16.msrb.mxu3 %v3434_v40  ;;  %v3250_v40 = vsub.f32 %v6548_v52, %v6551_v10  ;;  %v3255_v52 = vmul.f32 1.442695, %v3245_v6 }
 0xfba   : > { %3462 = vmatpush.bf16.msrb.mxu3 %v3432_v4  ;;  %v3265_v4 = vmul.f32 1.442695, %v3250_v40 }
 0xfbc   : > { %4688 = vpow2.f32 %v3265_v4 }
 0xfbd   : > { %4343 = vmatmul.msk.bf16.vlgmr.msrb.gmra.mxu3 %vm453_vm1, %v3427_v9  ;;  %4690 = vpow2.f32 %v3255_v52 }
 0xfbe   : > { %v3697_v56 = vpop.xlane.xlu2 %3696  ;;  %4692 = vpow2.f32 %v3259_v27 }
 0xfbf   : > { %v6684_v1 = vmax.f32 %v6681_v59, %v3697_v56  ;;  %4694 = vpow2.f32 %v3263_v3 }
 0xfc0   : > { %4696 = vpow2.f32 %v3261_v41 }
 0xfc1   : > { %3767 = vperm.xlu0 %4467, %v6684_v1  }
 0xfc2   : > { %v6697_v35 = vpop.eup %4688 }
 0xfc3   : > { %v6721_v0 = vpop.eup %4690 }
 0xfc4   : > { %v6728_v29 = vpop.eup %4692 }
 0xfc5   : > { %v6730_v63 = vpop.eup %4694 }
 0xfc6   : > { %v6738_v37 = vpop.eup %4696 }
 0xfc9   : > { %4469 = vset.pattern.permute.xlu0 %v4812_v39 }
 0xfca   : > { %3396 = vperm.xlu0 %4469, %v6689_v31  }
 0xfcd   : > { %4344 = vmatmul.msk.bf16.gmra.mxu3 %vm453_vm1, %v3428_v50 }
 0xfd2   : > { %3416 = vperm.xlu0 %4469, %v6697_v35  }
 0xfd8   : > { %v3691_v9 = vpop.xlane.xlu0 %3690 }
 0xfd9   : > { %v6705_v10 = vmax.f32 %v6702_v7, %v3691_v9 }
 0xfdb   : > { %3757 = vperm.xlu1 %4466, %v6705_v10  }
 0xfdd   : > { %4345 = vmatmul.msk.bf16.gmra.mxu3 %vm453_vm1, %v3429_v13 }
 0xfe0   : > { %v3694_v50 = vpop.xlane.xlu0 %3693 }
 0xfe1   : > { %v6719_v38 = vmax.f32 %v6716_v58, %v3694_v50 }
 0xfe3   : > { %4468 = vset.pattern.permute.xlu1 %v4812_v39  ;;  %3762 = vperm.xlu2 %4465, %v6719_v38  }
 0xfe4   : > { %3391 = vperm.xlu1 %4468, %v6721_v0  }
 0xfeb   : > { %4470 = vset.pattern.permute.xlu2 %v4812_v39  ;;  %v3778_v39 = vmul.f32 1.442695, %v3770_v46 }
 0xfec   : > { %3401 = vperm.xlu1 %4468, %v6728_v29   ;;  %3411 = vperm.xlu2 %4470, %v6730_v63  }
 0xfed   : > { %4346 = vmatmul.msk.bf16.gmra.mxu3 %vm453_vm1, %v3430_v21  ;;  %4698 = vpow2.f32 %v3778_v39 }
 0xff3   : > { %v3897_v5 = vpop.permute.xlu0 %3896  ;;  %v6746_v40 = vpop.eup %4698 }
 0xff4   : > { %3406 = vperm.xlu1 %4468, %v6738_v37   ;;  %3924 = vmatpush.bf16.msrb.mxu2 %v3897_v5 }
0x1007   : > { %v3738_v13 = vpop.permute.xlu1 %3737 }
0x1008   : > { %v3771_v36 = vsub.f32 %v6558_v51, %v3738_v13  ;;  %3997 = vst.msk [vmem:[#allocation2 + $0x8] sm:$0xff] %vm3987_vm9, %v3738_v13 }
0x100a   : > { %v3780_v20 = vmul.f32 1.442695, %v3771_v36 }
0x100c   : > { %4700 = vpow2.f32 %v3780_v20 }
0x100f   : > { %v3895_v56 = vpop.permute.xlu1 %3894  ;;  %v3748_v30 = vpop.permute.xlu0 %3747 }
0x1010   : > { %3999 = vst.msk [vmem:[#allocation2 + $0x18] sm:$0xff] %vm3987_vm9, %v3748_v30  ;;  %3925 = vmatpush.bf16.msrb.mxu2 %v3895_v56  ;;  %v3773_v24 = vsub.f32 %v6576_v57, %v3748_v30 }
0x1012   : > { %v6748_v4 = vpop.eup %4700  ;;  %v3784_v51 = vmul.f32 1.442695, %v3773_v24 }
0x1013   : > { %v3890_v14 = vpack.c.bf16 %v6748_v4, %v6746_v40 }
0x1014   : > { %4702 = vpow2.f32 %v3784_v51 }
0x1015   : > { %4351 = vmatmul.msk.bf16.vlgmr.msrb.gmra.mxu2 %vm453_vm1, %v3890_v14 }
0x1017   : > { %v3743_v6 = vpop.permute.xlu1 %3742 }
0x1018   : > { %v3772_v9 = vsub.f32 %v6565_v48, %v3743_v6  ;;  %3998 = vst.msk [vmem:[#allocation2 + $0x10] sm:$0xff] %vm3987_vm9, %v3743_v6 }
0x101a   : > { %v3782_v52 = vmul.f32 1.442695, %v3772_v9  ;;  %v6757_v61 = vpop.eup %4702 }
0x101c   : > { %4704 = vpow2.f32 %v3782_v52 }
0x101f   : > { %v3753_v15 = vpop.permute.xlu1 %3752 }
0x1020   : > { %4000 = vst.msk [vmem:[#allocation2 + $0x20] sm:$0xff] %vm3987_vm9, %v3753_v15  ;;  %v3774_v41 = vsub.f32 %v6580_v12, %v3753_v15 }
0x1022   : > { %v6759_v27 = vpop.eup %4704  ;;  %v3786_v21 = vmul.f32 1.442695, %v3774_v41 }
0x1023   : > { %v3891_v57 = vpack.c.bf16 %v6757_v61, %v6759_v27 }
0x1024   : > { %4706 = vpow2.f32 %v3786_v21 }
0x1025   : > { %4352 = vmatmul.msk.bf16.gmra.mxu2 %vm453_vm1, %v3891_v57 }
0x102a   : > { %v6772_v36 = vpop.eup %4706 }
0x1033   : > { %v3768_v50 = vpop.permute.xlu0 %3767 }
0x1034   : > { %4003 = vst.msk [vmem:[#allocation2 + $0x38] sm:$0xff] %vm3987_vm9, %v3768_v50  ;;  %v3777_v30 = vsub.f32 %v6628_v16, %v3768_v50  ;;  %v3203_v16 = vld [vmem:[#allocation3] sm:$0xff] }
0x1035   : > { %v3331_v15 = vmul.f32 %v6560_v19, %v3203_v16  ;;  %v3207_v19 = vld [vmem:[#allocation3 + $0x20] sm:$0xff] }
0x1036   : > { %v3792_v24 = vmul.f32 1.442695, %v3777_v30 }
0x1037   : > { %v3363_v57 = vadd.f32 %v6596_v17, %v3331_v15  ;;  %v3209_v17 = vld [vmem:[#allocation3 + $0x30] sm:$0xff]  ;;  %v3802_v15 = vsel %vm453_vm1, %v6746_v40, 0.0 }
0x103d   : > { %v3763_v48 = vpop.permute.xlu2 %3762 }
0x103e   : > { %4002 = vst.msk [vmem:[#allocation2 + $0x30] sm:$0xff] %vm3987_vm9, %v3763_v48  ;;  %v3776_v12 = vsub.f32 %v6626_v22, %v3763_v48  ;;  %v3206_v48 = vld [vmem:[#allocation3 + $0x18] sm:$0xff] }
0x1040   : > { %v3464_v3 = vpop.f32.mrf.mxu3  ;;  %v3790_v14 = vmul.f32 1.442695, %v3776_v12  ;;  %v3337_v12 = vmul.f32 %v6730_v63, %v3209_v17 }
0x1041   : > { %3492 = vrot.lane.b32.xlu1 %v3464_v3, %s4814_s11  ;;  %v3204_v3 = vld [vmem:[#allocation3 + $0x8] sm:$0xff] }
0x1042   : > { %v3332_v41 = vmul.f32 %v6573_v55, %v3204_v3 }
0x1048   : > { %v3466_v54 = vpop.f32.mrf.mxu3 }
0x1049   : > { %3494 = vrot.lane.b32.xlu2 %v3466_v54, %s4814_s11  ;;  %v3334_v54 = vmul.f32 %v6689_v31, %v3206_v48  ;;  %v3375_v48 = vld [vmem:[#allocation4 + $0x20] sm:$0xff] }
0x104b   : > { %v3366_v21 = vadd.f32 %v6600_v42, %v3334_v54  ;;  %v3369_v42 = vadd.f32 %v6604_v2, %v3337_v12  ;;  %v3412_v2 = vpop.permute.xlu2 %3411 }
0x104d   : > { %v3758_v5 = vpop.permute.xlu1 %3757 }
0x104e   : > { %v3775_v46 = vsub.f32 %v6623_v47, %v3758_v5  ;;  %4001 = vst.msk [vmem:[#allocation2 + $0x28] sm:$0xff] %vm3987_vm9, %v3758_v5  ;;  %v3364_v5 = vadd.f32 %v6640_v8, %v3332_v41 }
0x1050   : > { %v3788_v39 = vmul.f32 1.442695, %v3775_v46  ;;  %v3469_v13 = vpop.f32.mrf.mxu3 }
0x1051   : > { %3496 = vrot.lane.b32.xlu0 %v3469_v13, %s4814_s11  ;;  %v3335_v13 = vmul.f32 %v6728_v29, %v3207_v19 }
0x1052   : > { %4708 = vpow2.f32 %v3788_v39  ;;  %v3205_v39 = vld [vmem:[#allocation3 + $0x10] sm:$0xff] }
0x1053   : > { %4710 = vpow2.f32 %v3790_v14  ;;  %v3333_v31 = vmul.f32 %v6721_v0, %v3205_v39  ;;  %v3367_v55 = vadd.f32 %v6643_v23, %v3335_v13  ;;  %v6966_v0 = vmov 28   ;;  %v3372_v23 = vld [vmem:[#allocation4 + $0x8] sm:$0xff]  ;;  %v3378_v13 = vld [vmem:[#allocation4 + $0x38] sm:$0xff] }
0x1054   : > { %4712 = vpow2.f32 %v3792_v24 }
0x1055   : > { %v3365_v8 = vadd.f32 %v6591_v11, %v3333_v31 }
0x1056   : > { %v3392_v11 = vpop.permute.xlu1 %3391 }
0x1058   : > { %v6774_v20 = vpop.eup %4708  ;;  %v3471_v56 = vpop.f32.mrf.mxu3 }
0x1059   : > { %3498 = vrot.lane.b32.xlu1 %v3471_v56, %s4814_s11  ;;  %v3892_v47 = vpack.c.bf16 %v6774_v20, %v6772_v36  ;;  %v6783_v6 = vpop.eup %4710  ;;  %v3210_v56 = vld [vmem:[#allocation3 + $0x38] sm:$0xff] }
0x105a   : > { %v6785_v22 = vpop.eup %4712  ;;  %v3338_v30 = vmul.f32 %v6697_v35, %v3210_v56  ;;  %v3420_v35 = vmul.f32 %v6621_v25, %v3372_v23  ;;  %v3808_v25 = vsel %vm453_vm1, %v6759_v27, 0.0 }
0x105b   : > { %4353 = vmatmul.msk.bf16.gmra.mxu2 %vm453_vm1, %v3892_v47  ;;  %v3893_v52 = vpack.c.bf16 %v6785_v22, %v6783_v6  ;;  %v3208_v47 = vld [vmem:[#allocation3 + $0x28] sm:$0xff]  ;;  %v3823_v40 = vsel %vm453_vm1, %v6785_v22, 0.0  ;;  %v3374_v22 = vld [vmem:[#allocation4 + $0x18] sm:$0xff] }
0x105c   : > { %v3336_v14 = vmul.f32 %v6738_v37, %v3208_v47  ;;  %v3370_v29 = vadd.f32 %v6645_v62, %v3338_v30  ;;  %v3377_v30 = vld [vmem:[#allocation4 + $0x30] sm:$0xff] }
0x105e   : > { %v3368_v63 = vadd.f32 %v6598_v60, %v3336_v14  ;;  %v3402_v24 = vpop.permute.xlu1 %3401  ;;  %v3805_v60 = vsel %vm453_vm1, %v6748_v4, 0.0  ;;  %v3425_v14 = vmul.f32 %v3412_v2, %v3377_v30 }
0x105f   : > { %v3423_v3 = vmul.f32 %v3402_v24, %v3375_v48 }
0x1060   : > { %v3474_v51 = vpop.f32.mrf.mxu3 }
0x1061   : > { %3500 = vrot.lane.b32.xlu2 %v3474_v51, %s4814_s11 }
0x1066   : > { %v3407_v62 = vpop.permute.xlu1 %3406 }
0x1068   : > { %v3476_v9 = vpop.f32.mrf.mxu3 }
0x1069   : > { %3502 = vrot.lane.b32.xlu0 %v3476_v9, %s4814_s11  ;;  %v3371_v9 = vld [vmem:[#allocation4] sm:$0xff] }
0x106a   : > { %v3419_v16 = vmul.f32 %v6653_v26, %v3371_v9  ;;  %v3811_v26 = vsel %vm453_vm1, %v6757_v61, 0.0  ;;  %v3708_v9 = vsub.f32 %v6663_v34, %v6666_v43 }
0x106b   : > { %4354 = vmatmul.msk.bf16.gmra.mxu2 %vm453_vm1, %v3893_v52  ;;  %v3397_v52 = vpop.permute.xlu0 %3396 }
0x106c   : > { %v3422_v17 = vmul.f32 %v3397_v52, %v3374_v22 }
0x1070   : > { %v3479_v50 = vpop.f32.mrf.mxu3 }
0x1071   : > { %3543 = vperm.xlu0 %4469, %v3363_v57   ;;  %3504 = vrot.lane.b32.xlu1 %v3479_v50, %s4814_s11  ;;  %v3814_v57 = vsel %vm453_vm1, %v6772_v36, 0.0  ;;  %v3817_v36 = vsel %vm453_vm1, %v6774_v20, 0.0 }
0x1073   : > { %v3417_v54 = vpop.permute.xlu0 %3416 }
0x1074   : > { %v3426_v12 = vmul.f32 %v3417_v54, %v3378_v13 }
0x1078   : > { %v3481_v46 = vpop.f32.mrf.mxu3 }
0x1079   : > { %3558 = vperm.xlu0 %4469, %v3366_v21   ;;  %3548 = vperm.xlu1 %4468, %v3364_v5   ;;  %v3373_v21 = vld [vmem:[#allocation4 + $0x10] sm:$0xff] }
0x107a   : > { %3506 = vrot.lane.b32.xlu2 %v3481_v46, %s4814_s11  ;;  %v3421_v5 = vmul.f32 %v3392_v11, %v3373_v21  ;;  %v3820_v46 = vsel %vm453_vm1, %v6783_v6, 0.0 }
0x1081   : > { %3573 = vperm.xlu0 %4469, %v3369_v42   ;;  %3563 = vperm.xlu1 %4468, %v3367_v55   ;;  %v3376_v42 = vld [vmem:[#allocation4 + $0x28] sm:$0xff] }
0x1082   : > { %3553 = vperm.xlu2 %4470, %v3365_v8   ;;  %v3424_v8 = vmul.f32 %v3407_v62, %v3376_v42  ;;  %v3706_v62 = vsub.f32 %v6610_v45, %v6613_v44 }
0x1084   : > { %v3714_v52 = vmul.f32 1.442695, %v3706_v62 }
0x1089   : > { %3578 = vperm.xlu1 %4468, %v3370_v29   ;;  %4473 = vset.pattern.permute.xlu0 %v6966_v0 }
0x108a   : > { %3568 = vperm.xlu2 %4470, %v3368_v63  }
0x1091   : > { %4471 = vset.pattern.permute.xlu1 %v6966_v0 }
0x1092   : > { %4472 = vset.pattern.permute.xlu2 %v6966_v0 }
0x1098   : > { %v6856_v44 = vpop.f32.mrf.mxu2 }
0x10a3   : > { %v3495_v51 = vpop.permute.xlu2 %3494 }
0x10a4   : > { %v3517_v37 = vadd.f32 %v3495_v51, %v3420_v35 }
0x10a6   : > { %3526 = vst.msk [vmem:[#allocation4 + $0x8] sm:$0xff] %vm3524_vm8, %v3517_v37  ;;  %v3707_v37 = vsub.f32 %v6647_v28, %v6650_v32  ;;  %v3709_v28 = vsub.f32 %v6655_v33, %v6658_v53  ;;  %v3712_v33 = vsub.f32 %v6716_v58, %v6719_v38  ;;  %v3713_v58 = vsub.f32 %v6681_v59, %v6684_v1 }
0x10a8   : > { %v3720_v34 = vmul.f32 1.442695, %v3709_v28  ;;  %v3726_v21 = vmul.f32 1.442695, %v3712_v33  ;;  %v3728_v13 = vmul.f32 1.442695, %v3713_v58 }
0x10ab   : > { %3806 = vadd.xlane.f32.xlu0 %v3805_v60  ;;  %v3716_v60 = vmul.f32 1.442695, %v3707_v37 }
0x10ad   : > { %4714 = vpow2.f32 %v3716_v60 }
0x10ae   : > { %4716 = vpow2.f32 %v3714_v52 }
0x10b3   : > { %3803 = vadd.xlane.f32.xlu2 %v3802_v15  ;;  %3815 = vadd.xlane.f32.xlu0 %v3814_v57  ;;  %v3493_v50 = vpop.permute.xlu1 %3492  ;;  %v3718_v15 = vmul.f32 1.442695, %v3708_v9  ;;  %v4715_v57 = vpop.eup %4714 }
0x10b4   : > { %3809 = vadd.xlane.f32.xlu1 %v3808_v25  ;;  %v3516_v4 = vadd.f32 %v3493_v50, %v3419_v16  ;;  %v3710_v25 = vsub.f32 %v6669_v49, %v6672_v18  ;;  %v3711_v49 = vsub.f32 %v6702_v7, %v6705_v10 }
0x10b5   : > { %4718 = vpow2.f32 %v3718_v15 }
0x10b6   : > { %3525 = vst.msk [vmem:[#allocation4] sm:$0xff] %vm3524_vm8, %v3516_v4  ;;  %v3722_v45 = vmul.f32 1.442695, %v3710_v25 }
0x10b8   : > { %4720 = vpow2.f32 %v3722_v45 }
0x10b9   : > { %4722 = vpow2.f32 %v3720_v34 }
0x10bb   : > { %3812 = vadd.xlane.f32.xlu2 %v3811_v26  ;;  %v3501_v41 = vpop.permute.xlu2 %3500  ;;  %3824 = vadd.xlane.f32.xlu0 %v3823_v40 }
0x10bc   : > { %3818 = vadd.xlane.f32.xlu1 %v3817_v36  ;;  %v3520_v27 = vadd.f32 %v3501_v41, %v3423_v3  ;;  %v4717_v3 = vpop.eup %4716 }
0x10bd   : > { %v4719_v26 = vpop.eup %4718 }
0x10be   : > { %3529 = vst.msk [vmem:[#allocation4 + $0x20] sm:$0xff] %vm3524_vm8, %v3520_v27  ;;  %v3724_v27 = vmul.f32 1.442695, %v3711_v49 }
0x10c0   : > { %4724 = vpow2.f32 %v3724_v27 }
0x10c1   : > { %4726 = vpow2.f32 %v3726_v21 }
0x10c2   : > { %4728 = vpow2.f32 %v3728_v13 }
0x10c3   : > { %3821 = vadd.xlane.f32.xlu2 %v3820_v46  ;;  %v3497_v61 = vpop.permute.xlu0 %3496 }
0x10c4   : > { %v3518_v19 = vadd.f32 %v3497_v61, %v3421_v5  ;;  %v4721_v61 = vpop.eup %4720 }
0x10c5   : > { %v4723_v22 = vpop.eup %4722 }
0x10c6   : > { %3527 = vst.msk [vmem:[#allocation4 + $0x10] sm:$0xff] %vm3524_vm8, %v3518_v19  ;;  %v3929_v19 = vpop.f32.mrf.mxu2 }
0x10cb   : > { %v3499_v39 = vpop.permute.xlu1 %3498 }
0x10cc   : > { %v3519_v20 = vadd.f32 %v3499_v39, %v3422_v17 }
0x10ce   : > { %3528 = vst.msk [vmem:[#allocation4 + $0x18] sm:$0xff] %vm3524_vm8, %v3519_v20 }
0x10d4   : > { %v3507_v31 = vpop.permute.xlu2 %3506 }
0x10d5   : > { %v3523_v55 = vadd.f32 %v3507_v31, %v3426_v12 }
0x10d7   : > { %3532 = vst.msk [vmem:[#allocation4 + $0x38] sm:$0xff] %vm3524_vm8, %v3523_v55  ;;  %v4725_v55 = vpop.eup %4724 }
0x10d8   : > { %v4727_v42 = vpop.eup %4726 }
0x10db   : > { %v3503_v6 = vpop.permute.xlu0 %3502 }
0x10dc   : > { %v3554_v56 = vpop.permute.xlu2 %3553  ;;  %v3521_v47 = vadd.f32 %v3503_v6, %v3424_v8  ;;  %v3932_v6 = vpop.f32.mrf.mxu2 }
0x10dd   : > { %3583 = vst.msk [vmem:[#allocation3 + $0x10] sm:$0xff] %vm3524_vm8, %v3554_v56 }
0x10de   : > { %3530 = vst.msk [vmem:[#allocation4 + $0x28] sm:$0xff] %vm3524_vm8, %v3521_v47 }
0x10e3   : > { %v3505_v29 = vpop.permute.xlu1 %3504  ;;  %v3544_v63 = vpop.permute.xlu0 %3543 }
0x10e4   : > { %v3522_v0 = vadd.f32 %v3505_v29, %v3425_v14  ;;  %v3569_v11 = vpop.permute.xlu2 %3568  ;;  %3581 = vst.msk [vmem:[#allocation3] sm:$0xff] %vm3524_vm8, %v3544_v63  ;;  %v3668_v48 = vld [vmem:[#allocation3 + $0x10] sm:$0xff]  ;;  %v4729_v29 = vpop.eup %4728 }
0x10e5   : > { %3586 = vst.msk [vmem:[#allocation3 + $0x28] sm:$0xff] %vm3524_vm8, %v3569_v11  ;;  %v3796_v40 = vmul.f32 %v4719_v26, %v3668_v48  ;;  %v3934_v11 = vpop.f32.mrf.mxu2 }
0x10e6   : > { %3531 = vst.msk [vmem:[#allocation4 + $0x30] sm:$0xff] %vm3524_vm8, %v3522_v0 }
0x10eb   : > { %v3549_v23 = vpop.permute.xlu1 %3548  ;;  %v3559_v24 = vpop.permute.xlu0 %3558  ;;  %v3666_v43 = vld [vmem:[#allocation3] sm:$0xff] }
0x10ec   : > { %3582 = vst.msk [vmem:[#allocation3 + $0x8] sm:$0xff] %vm3524_vm8, %v3549_v23  ;;  %v3794_v18 = vmul.f32 %v4717_v3, %v3666_v43  ;;  %v3671_v12 = vld [vmem:[#allocation3 + $0x28] sm:$0xff] }
0x10ed   : > { %3584 = vst.msk [vmem:[#allocation3 + $0x18] sm:$0xff] %vm3524_vm8, %v3559_v24  ;;  %v3799_v56 = vmul.f32 %v4725_v55, %v3671_v12  ;;  %v3937_v24 = vpop.f32.mrf.mxu2 }
0x10f3   : > { %v3564_v35 = vpop.permute.xlu1 %3563  ;;  %v3574_v51 = vpop.permute.xlu0 %3573  ;;  %v3667_v16 = vld [vmem:[#allocation3 + $0x8] sm:$0xff] }
0x10f4   : > { %3585 = vst.msk [vmem:[#allocation3 + $0x20] sm:$0xff] %vm3524_vm8, %v3564_v35  ;;  %v3795_v50 = vmul.f32 %v4715_v57, %v3667_v16  ;;  %v3669_v46 = vld [vmem:[#allocation3 + $0x18] sm:$0xff] }
0x10f5   : > { %3587 = vst.msk [vmem:[#allocation3 + $0x30] sm:$0xff] %vm3524_vm8, %v3574_v51  ;;  %v3797_v17 = vmul.f32 %v4723_v22, %v3669_v46  ;;  %v3939_v35 = vpop.f32.mrf.mxu2 }
0x10fb   : > { %v3579_v2 = vpop.permute.xlu1 %3578  ;;  %v3670_v5 = vld [vmem:[#allocation3 + $0x20] sm:$0xff] }
0x10fc   : > { %3588 = vst.msk [vmem:[#allocation3 + $0x38] sm:$0xff] %vm3524_vm8, %v3579_v2  ;;  %v3798_v10 = vmul.f32 %v4721_v61, %v3670_v5  ;;  %v3672_v31 = vld [vmem:[#allocation3 + $0x30] sm:$0xff] }
0x10fd   : > { %v3800_v47 = vmul.f32 %v4727_v42, %v3672_v31  ;;  %v3942_v51 = vpop.f32.mrf.mxu2 }
0x1103   : > { %v3673_v59 = vld [vmem:[#allocation3 + $0x38] sm:$0xff] }
0x1104   : > { %v3801_v0 = vmul.f32 %v4729_v29, %v3673_v59 }
0x1105   : > { %v3944_v2 = vpop.f32.mrf.mxu2 }
0x111e   : > { %v3807_v32 = vpop.xlane.xlu0 %3806 }
0x111f   : > { %v3827_v4 = vadd.f32 %v3807_v32, %v3795_v50 }
0x1121   : > { %4011 = vperm.xlu2 %4472, %v3827_v4   ;;  %v3834_v4 = vld [vmem:[#allocation4] sm:$0xff] }
0x1126   : > { %v3804_v53 = vpop.xlane.xlu2 %3803  ;;  %v3816_v7 = vpop.xlane.xlu0 %3815 }
0x1127   : > { %v3826_v54 = vadd.f32 %v3804_v53, %v3794_v18  ;;  %v3810_v36 = vpop.xlane.xlu1 %3809  ;;  %v3830_v39 = vadd.f32 %v3816_v7, %v3798_v10  ;;  %v3837_v18 = vld [vmem:[#allocation4 + $0x18] sm:$0xff]  ;;  %v3840_v10 = vld [vmem:[#allocation4 + $0x30] sm:$0xff] }
0x1128   : > { %v3828_v41 = vadd.f32 %v3810_v36, %v3796_v40 }
0x1129   : > { %4006 = vperm.xlu1 %4471, %v3826_v54  }
0x112a   : > { %4016 = vperm.xlu0 %4473, %v3828_v41  }
0x112e   : > { %v3813_v38 = vpop.xlane.xlu2 %3812  ;;  %v3825_v63 = vpop.xlane.xlu0 %3824 }
0x112f   : > { %v3829_v20 = vadd.f32 %v3813_v38, %v3797_v17  ;;  %v3819_v8 = vpop.xlane.xlu1 %3818  ;;  %v3833_v23 = vadd.f32 %v3825_v63, %v3801_v0 }
0x1130   : > { %v3831_v14 = vadd.f32 %v3819_v8, %v3799_v56 }
0x1131   : > { %4021 = vperm.xlu2 %4472, %v3829_v20   ;;  %4026 = vperm.xlu1 %4471, %v3830_v39  }
0x1132   : > { %3849 = vperm.xlu0 %4473, %v4715_v57  }
0x1136   : > { %v3822_v30 = vpop.xlane.xlu2 %3821 }
0x1137   : > { %v3832_v1 = vadd.f32 %v3822_v30, %v3800_v47  ;;  %v3835_v30 = vld [vmem:[#allocation4 + $0x8] sm:$0xff] }
0x1139   : > { %4031 = vperm.xlu2 %4472, %v3831_v14   ;;  %4036 = vperm.xlu1 %4471, %v3832_v1  }
0x113a   : > { %3864 = vperm.xlu0 %4473, %v4721_v61  }
0x1141   : > { %3844 = vperm.xlu1 %4471, %v4717_v3   ;;  %4041 = vperm.xlu2 %4472, %v3833_v23  }
0x1142   : > { %3879 = vperm.xlu0 %4473, %v4729_v29  }
0x1149   : > { %3859 = vperm.xlu1 %4471, %v4723_v22   ;;  %3854 = vperm.xlu2 %4472, %v4719_v26   ;;  %v3836_v26 = vld [vmem:[#allocation4 + $0x10] sm:$0xff] }
0x114a   : > { %3959 = vrot.lane.b32.xlu0 %v3932_v6, %s4815_s12 }
0x1151   : > { %3874 = vperm.xlu1 %4471, %v4727_v42   ;;  %3869 = vperm.xlu2 %4472, %v4725_v55  }
0x1152   : > { %3965 = vrot.lane.b32.xlu0 %v3939_v35, %s4815_s12 }
0x1159   : > { %3957 = vrot.lane.b32.xlu1 %v3929_v19, %s4815_s12  ;;  %3955 = vrot.lane.b32.xlu2 %v6856_v44, %s4815_s12  ;;  %v3839_v19 = vld [vmem:[#allocation4 + $0x28] sm:$0xff] }
0x1161   : > { %3963 = vrot.lane.b32.xlu1 %v3937_v24, %s4815_s12  ;;  %3961 = vrot.lane.b32.xlu2 %v3934_v11, %s4815_s12 }
0x1169   : > { %3969 = vrot.lane.b32.xlu1 %v3944_v2, %s4815_s12  ;;  %3967 = vrot.lane.b32.xlu2 %v3942_v51, %s4815_s12 }
0x117b   : > { %v4012_v37 = vpop.permute.xlu2 %4011 }
0x117c   : > { %4045 = vst.msk [vmem:[#allocation3 + $0x8] sm:$0xff] %vm3987_vm9, %v4012_v37  ;;  %v3838_v37 = vld [vmem:[#allocation4 + $0x20] sm:$0xff] }
0x1183   : > { %v4056_v63 = vld [vmem:[#allocation3 + $0x8] sm:$0xff] }
0x118b   : > { %v4022_v60 = vpop.permute.xlu2 %4021 }
0x118c   : > { %4047 = vst.msk [vmem:[#allocation3 + $0x18] sm:$0xff] %vm3987_vm9, %v4022_v60 }
0x1193   : > { %v4032_v62 = vpop.permute.xlu2 %4031  ;;  %v4058_v27 = vld [vmem:[#allocation3 + $0x18] sm:$0xff] }
0x1194   : > { %4049 = vst.msk [vmem:[#allocation3 + $0x28] sm:$0xff] %vm3987_vm9, %v4032_v62 }
0x119b   : > { %v4007_v9 = vpop.permute.xlu1 %4006  ;;  %v4042_v52 = vpop.permute.xlu2 %4041  ;;  %v4060_v39 = vld [vmem:[#allocation3 + $0x28] sm:$0xff] }
0x119c   : > { %4044 = vst.msk [vmem:[#allocation3] sm:$0xff] %vm3987_vm9, %v4007_v9  ;;  %v4017_v16 = vpop.permute.xlu0 %4016 }
0x119d   : > { %4051 = vst.msk [vmem:[#allocation3 + $0x38] sm:$0xff] %vm3987_vm9, %v4042_v52 }
0x119e   : > { %4046 = vst.msk [vmem:[#allocation3 + $0x10] sm:$0xff] %vm3987_vm9, %v4017_v16 }
0x11a3   : > { %v4027_v15 = vpop.permute.xlu1 %4026  ;;  %v3855_v57 = vpop.permute.xlu2 %3854  ;;  %v4055_v48 = vld [vmem:[#allocation3] sm:$0xff] }
0x11a4   : > { %4048 = vst.msk [vmem:[#allocation3 + $0x20] sm:$0xff] %vm3987_vm9, %v4027_v15  ;;  %v3850_v25 = vpop.permute.xlu0 %3849  ;;  %4730 = vrcp.f32 %v4055_v48  ;;  %v3884_v49 = vmul.f32 %v3855_v57, %v3836_v26 }
0x11a5   : > { %v4057_v36 = vld [vmem:[#allocation3 + $0x10] sm:$0xff]  ;;  %v3883_v1 = vmul.f32 %v3850_v25, %v3835_v30 }
0x11a6   : > { %4732 = vrcp.f32 %v4057_v36 }
0x11a7   : > { %4734 = vrcp.f32 %v4058_v27 }
0x11a8   : > { %4736 = vrcp.f32 %v4060_v39 }
0x11aa   : > { %v4731_v5 = vpop.eup %4730 }
0x11ab   : > { %v4037_v50 = vpop.permute.xlu1 %4036  ;;  %v3870_v28 = vpop.permute.xlu2 %3869  ;;  %v4059_v16 = vld [vmem:[#allocation3 + $0x20] sm:$0xff] }
0x11ac   : > { %4050 = vst.msk [vmem:[#allocation3 + $0x30] sm:$0xff] %vm3987_vm9, %v4037_v50  ;;  %v6873_v32 = vpop.permute.xlu0 %3864  ;;  %v3887_v7 = vmul.f32 %v3870_v28, %v3839_v19  ;;  %v4733_v12 = vpop.eup %4732 }
0x11ad   : > { %v4735_v8 = vpop.eup %4734  ;;  %v3886_v62 = vmul.f32 %v6873_v32, %v3838_v37 }
0x11ae   : > { %v4737_v11 = vpop.eup %4736 }
0x11b3   : > { %v3845_v45 = vpop.permute.xlu1 %3844  ;;  %v3956_v44 = vpop.permute.xlu2 %3955  ;;  %v4061_v31 = vld [vmem:[#allocation3 + $0x30] sm:$0xff] }
0x11b4   : > { %v3882_v34 = vmul.f32 %v3845_v45, %v3834_v4  ;;  %v6875_v43 = vpop.permute.xlu0 %3879  ;;  %4738 = vrcp.f32 %v4061_v31  ;;  %v3841_v4 = vld [vmem:[#allocation4 + $0x38] sm:$0xff] }
0x11b5   : > { %4740 = vrcp.f32 %v4056_v63  ;;  %v3889_v45 = vmul.f32 %v6875_v43, %v3841_v4 }
0x11b6   : > { %v3979_v3 = vadd.f32 %v3956_v44, %v3882_v34  ;;  %4742 = vrcp.f32 %v4059_v16  ;;  %v4062_v44 = vld [vmem:[#allocation3 + $0x38] sm:$0xff] }
0x11b7   : > { %4744 = vrcp.f32 %v4062_v44 }
0x11b8   : > { %3988 = vst.msk [vmem:[#allocation4] sm:$0xff] %vm3987_vm9, %v3979_v3 }
0x11ba   : > { %v4739_v24 = vpop.eup %4738 }
0x11bb   : > { %v3860_v33 = vpop.permute.xlu1 %3859  ;;  %v3962_v53 = vpop.permute.xlu2 %3961 }
0x11bc   : > { %v3885_v40 = vmul.f32 %v3860_v33, %v3837_v18  ;;  %v3960_v54 = vpop.permute.xlu0 %3959  ;;  %v4741_v57 = vpop.eup %4740 }
0x11bd   : > { %v3981_v41 = vadd.f32 %v3960_v54, %v3884_v49  ;;  %v4743_v48 = vpop.eup %4742 }
0x11be   : > { %v3982_v21 = vadd.f32 %v3962_v53, %v3885_v40  ;;  %v4745_v18 = vpop.eup %4744 }
0x11bf   : > { %v4071_v46 = vld [vmem:[#allocation4] sm:$0xff]  ;;  %3990 = vst.msk [vmem:[#allocation4 + $0x10] sm:$0xff] %vm3987_vm9, %v3981_v41 }
0x11c0   : > { %v4079_v61 = vmul.f32 %v4731_v5, %v4071_v46  ;;  %3991 = vst.msk [vmem:[#allocation4 + $0x18] sm:$0xff] %vm3987_vm9, %v3982_v21 }
0x11c2   : > { %v4087_v22 = vpack.c.bf16 %v4079_v61, %v4079_v61 }
0x11c3   : > { %v3875_v17 = vpop.permute.xlu1 %3874  ;;  %v3968_v20 = vpop.permute.xlu2 %3967 }
0x11c4   : > { %4096 = vst.msk [vmem:[%s6884_s19] sm:$0xf] %vm4095_vm10, %v4087_v22  ;;  %v3888_v58 = vmul.f32 %v3875_v17, %v3840_v10  ;;  %v3966_v38 = vpop.permute.xlu0 %3965 }
0x11c5   : > { %v3984_v13 = vadd.f32 %v3966_v38, %v3887_v7 }
0x11c6   : > { %v4073_v55 = vld [vmem:[#allocation4 + $0x10] sm:$0xff]  ;;  %v3985_v42 = vadd.f32 %v3968_v20, %v3888_v58 }
0x11c7   : > { %v4074_v6 = vld [vmem:[#allocation4 + $0x18] sm:$0xff]  ;;  %v4081_v56 = vmul.f32 %v4733_v12, %v4073_v55  ;;  %3993 = vst.msk [vmem:[#allocation4 + $0x28] sm:$0xff] %vm3987_vm9, %v3984_v13 }
0x11c8   : > { %v4082_v47 = vmul.f32 %v4735_v8, %v4074_v6  ;;  %3994 = vst.msk [vmem:[#allocation4 + $0x30] sm:$0xff] %vm3987_vm9, %v3985_v42 }
0x11c9   : > { %v4089_v14 = vpack.c.bf16 %v4081_v56, %v4081_v56 }
0x11ca   : > { %v4090_v59 = vpack.c.bf16 %v4082_v47, %v4082_v47 }
0x11cb   : > { %4098 = vst.msk [vmem:[%s6884_s19 + $0x8] sm:$0xf] %vm4095_vm10, %v4089_v14  ;;  %v3958_v29 = vpop.permute.xlu1 %3957 }
0x11cc   : > { %4099 = vst.msk [vmem:[%s6884_s19 + $0xc] sm:$0xf] %vm4095_vm10, %v4090_v59  ;;  %v3980_v0 = vadd.f32 %v3958_v29, %v3883_v1 }
0x11ce   : > { %v4076_v23 = vld [vmem:[#allocation4 + $0x28] sm:$0xff]  ;;  %3989 = vst.msk [vmem:[#allocation4 + $0x8] sm:$0xff] %vm3987_vm9, %v3980_v0 }
0x11cf   : > { %v4077_v35 = vld [vmem:[#allocation4 + $0x30] sm:$0xff]  ;;  %v4084_v51 = vmul.f32 %v4737_v11, %v4076_v23 }
0x11d0   : > { %v4085_v2 = vmul.f32 %v4739_v24, %v4077_v35 }
0x11d1   : > { %v4092_v60 = vpack.c.bf16 %v4084_v51, %v4084_v51 }
0x11d2   : > { %v4093_v9 = vpack.c.bf16 %v4085_v2, %v4085_v2 }
0x11d3   : > { %4101 = vst.msk [vmem:[%s6884_s19 + $0x14] sm:$0xf] %vm4095_vm10, %v4092_v60  ;;  %v3964_v52 = vpop.permute.xlu1 %3963 }
0x11d4   : > { %4102 = vst.msk [vmem:[%s6884_s19 + $0x18] sm:$0xf] %vm4095_vm10, %v4093_v9  ;;  %v3983_v15 = vadd.f32 %v3964_v52, %v3886_v62 }
0x11d5   : > { %v4072_v25 = vld [vmem:[#allocation4 + $0x8] sm:$0xff] }
0x11d6   : > { %v4080_v50 = vmul.f32 %v4741_v57, %v4072_v25  ;;  %3992 = vst.msk [vmem:[#allocation4 + $0x20] sm:$0xff] %vm3987_vm9, %v3983_v15 }
0x11d8   : > { %v4088_v28 = vpack.c.bf16 %v4080_v50, %v4080_v50 }
0x11da   : > { %4097 = vst.msk [vmem:[%s6884_s19 + $0x4] sm:$0xf] %vm4095_vm10, %v4088_v28 }
0x11db   : > { %v3970_v32 = vpop.permute.xlu1 %3969 }
0x11dc   : > { %v3986_v34 = vadd.f32 %v3970_v32, %v3889_v45 }
0x11dd   : > { %v4075_v3 = vld [vmem:[#allocation4 + $0x20] sm:$0xff] }
0x11de   : > { %v4083_v26 = vmul.f32 %v4743_v48, %v4075_v3  ;;  %3995 = vst.msk [vmem:[#allocation4 + $0x38] sm:$0xff] %vm3987_vm9, %v3986_v34 }
0x11e0   : > { %v4091_v49 = vpack.c.bf16 %v4083_v26, %v4083_v26 }
0x11e2   : > { %4100 = vst.msk [vmem:[%s6884_s19 + $0x10] sm:$0xf] %vm4095_vm10, %v4091_v49 }
0x11e5   : > { %v4078_v33 = vld [vmem:[#allocation4 + $0x38] sm:$0xff] }
0x11e6   : > { %v4086_v53 = vmul.f32 %v4745_v18, %v4078_v33 }
0x11e8   : > { %v4094_v40 = vpack.c.bf16 %v4086_v53, %v4086_v53 }
0x11ea   : > { %4103 = vst.msk [vmem:[%s6884_s19 + $0x1c] sm:$0xf] %vm4095_vm10, %v4094_v40 }
0x11eb PF: > { %s13_s14 = sadd.s32 1, %s4790_s14   ;;  %s6967_s12 = smov %s4786_s13 }
0x11ec   : > { %p10_p5 = scmp.ge.s32.totalorder %s13_s14, 4   ;;  %s6968_s13 = smov %s6970_s15 }
0x11ee   :  { %12 = sbr.rel (!%p10_p5) target bundleno = 2 (0x2), region = 76 }

</bundles_post_ra>
